<compile_context>
chip_gen: v6e
topology: v6e:2x2x1
jax: 0.10.0
libtpu: 0.0.40
codegen_flags: <defaults>
</compile_context>

<pallas_src>
import jax
import jax.numpy as jnp
from jax.experimental import pallas as pl
from jax.experimental.pallas import tpu as pltpu

# ---------------- synthetic hyper-parameters (consistent with HybridPolicy.__init__) -------------
B = 2                    # batch
OBS_DIM = 32             # int(np.product(obs_space.shape))
N_NODES = 16             # map.get_graph_size()
BN = B * N_NODES         # merged (dgl.batch) node count
NODE_EMBED_SIZE = 8      # utils.NODE_EMBED_SIZE
GAT_LAYERS = 4           # self.GAT_LAYERS
N_HEADS = 4              # self.N_HEADS
HIDDEN_DIM = 4           # self.HIDDEN_DIM
GAT_HIDDEN = N_HEADS * HIDDEN_DIM     # 16
NUM_GAT_ACTIONS = 8      # self.gats.num_actions (readout size concatenated with obs)
HIDDEN_SIZE = 32         # kwargs['hidden_size'] -> self.hiddens = [32, 32]
NUM_OUTPUTS = 8          # num_outputs (policy logits)
VALUE_HIDDENS = (32, 32) # utils.VALUE_HIDDENS (separate value branch, vf_share_layers=False)

# packed lane-dense output slab: full (8,128) tile = [ features(32) | logits(8) | value(1) | pad ]
OUT_ROWS = 8
OUT_WIDTH = 128
FEAT_OFF = 0
LOGIT_OFF = HIDDEN_SIZE
VALUE_OFF = HIDDEN_SIZE + NUM_OUTPUTS
PAYLOAD = VALUE_OFF + 1

F32 = jnp.float32


# ================================ fused Pallas kernel ============================================
def hybrid_kernel(obs_ref, adjb_ref, wemb_ref, npos_ref, win_ref, wqkv_ref, wo_ref,
                  wro_ref, bro_ref,
                  pw1_ref, pb1_ref, pw2_ref, pb2_ref, pwl_ref, pbl_ref,
                  vw1_ref, vb1_ref, vw2_ref, vb2_ref, vw3_ref, vb3_ref,
                  out_ref):
    """Whole HybridPolicy forward (embed + batched-graph GAT + policy head + value branch)."""
    obs = obs_ref[...]                                            # [B, OBS_DIM]
    inv_sqrt_d = 1.0 / (HIDDEN_DIM ** 0.5)

    # ---- in-kernel node embedding (stand-in for efficient_embed_obs_in_map) ----------------------
    # TODO(synk): utils.efficient_embed_obs_in_map is a map-specific scatter of agent/obs tokens
    # onto graph nodes (and dgl.from_networkx/dgl.batch build the graph); modeled here as a dense
    # obs projection plus a per-node positional embedding, computed directly in the merged
    # [B*N, E] node layout so no lane->sublane re-layout is needed.
    emb = jnp.dot(obs, wemb_ref[...], preferred_element_type=F32)                 # [B, E]
    x = jnp.broadcast_to(emb[:, None, :], (B, N_NODES, NODE_EMBED_SIZE))
    x = jnp.tanh(x.reshape(BN, NODE_EMBED_SIZE) + npos_ref[...])                  # [BN, E]

    # ---- GAT input projection on the merged 32-node graph ---------------------------------------
    h = jnp.tanh(jnp.dot(x, win_ref[...], preferred_element_type=F32))            # [BN, GH]

    # block-diagonal adjacency bias (dgl.batch): off-batch and off-edge pairs get -1e9
    adj_b = jnp.broadcast_to(adjb_ref[...][None, :, :], (N_HEADS, BN, BN))        # hoisted once

    for l in range(GAT_LAYERS):                                   # static unroll (L = 4)
        # fused per-head Q/K/V projection: heads are the batch axis of ONE rank-3 einsum
        hb = jnp.broadcast_to(h[None, :, :], (N_HEADS, BN, GAT_HIDDEN))            # [NH, BN, GH]
        qkv = jnp.einsum('hnf,hfe->hne', hb, wqkv_ref[l],
                         preferred_element_type=F32)                                # [NH, BN, 3D]
        q = qkv[:, :, 0:HIDDEN_DIM]
        k = qkv[:, :, HIDDEN_DIM:2 * HIDDEN_DIM]
        v = qkv[:, :, 2 * HIDDEN_DIM:3 * HIDDEN_DIM]
        # adjacency-masked attention over the merged graph, all heads & both batches at once
        scores = jnp.einsum('hnd,hmd->hnm', q, k, preferred_element_type=F32) * inv_sqrt_d
        scores = scores + adj_b
        scores = scores - jnp.max(scores, axis=-1, keepdims=True)                   # numerics
        p = jnp.exp(scores)
        p = p * pl.reciprocal(jnp.sum(p, axis=-1, keepdims=True), approx=True)      # EUP slot
        attn = jnp.einsum('hnm,hmd->hnd', p, v, preferred_element_type=F32)         # [NH, BN, D]
        # concat-over-heads @ Wo  ==  sum over heads of attn_h @ Wo_h (no cross-sublane transpose)
        o = jnp.sum(jnp.einsum('hnd,hdk->hnk', attn, wo_ref[l],
                               preferred_element_type=F32), axis=0)                 # [BN, GH]
        h = jnp.tanh(h + o)                                        # residual + nonlinearity

    # ---- agent-node selection: one block-diagonal [B, BN] @ [BN, GH] matmul ----------------------
    obs_n = obs[:, :N_NODES]                                                        # [B, N]
    col_n = jax.lax.broadcasted_iota(jnp.int32, (B, N_NODES), 1).astype(F32)
    mx = jnp.max(obs_n, axis=-1, keepdims=True)
    first = jnp.min(jnp.where(obs_n >= mx, col_n, jnp.float32(N_NODES)),
                    axis=-1, keepdims=True)                                         # [B, 1] first-argmax
    col_bn = jax.lax.broadcasted_iota(jnp.int32, (B, BN), 1)
    row_b = jax.lax.broadcasted_iota(jnp.int32, (B, BN), 0)
    local = (col_bn - row_b * N_NODES).astype(F32)                                  # col idx within own block
    sel = (local == first).astype(F32)                                              # [B, BN] block-diag one-hot
    agent_h = jnp.dot(sel, h, preferred_element_type=F32)                           # [B, GH]
    gat_out = jnp.dot(agent_h, wro_ref[...], preferred_element_type=F32) + bro_ref[...]   # [B, A]

    # ---- policy FC stack: _hiddens(cat([gat_output, obs])) then _logits --------------------------
    feat_in = jnp.concatenate([gat_out, obs], axis=-1)                              # [B, A+OBS]
    h1 = jnp.tanh(jnp.dot(feat_in, pw1_ref[...], preferred_element_type=F32) + pb1_ref[...])
    feats = jnp.tanh(jnp.dot(h1, pw2_ref[...], preferred_element_type=F32) + pb2_ref[...])
    logits = jnp.dot(feats, pwl_ref[...], preferred_element_type=F32) + pbl_ref[...]

    # ---- separate value branch on obs_flat (vf_share_layers=False) -------------------------------
    vh1 = jnp.tanh(jnp.dot(obs, vw1_ref[...], preferred_element_type=F32) + vb1_ref[...])
    vh2 = jnp.tanh(jnp.dot(vh1, vw2_ref[...], preferred_element_type=F32) + vb2_ref[...])
    value = jnp.dot(vh2, vw3_ref[...], preferred_element_type=F32) + vb3_ref[...]   # [B, 1]

    # ---- full (8,128) lane-dense packed output (unmasked tile store) -----------------------------
    lane_pad = jnp.zeros((B, OUT_WIDTH - PAYLOAD), F32)
    payload = jnp.concatenate([feats, logits, value, lane_pad], axis=-1)            # [B, 128]
    row_pad = jnp.zeros((OUT_ROWS - B, OUT_WIDTH), F32)
    out_ref[...] = jnp.concatenate([payload, row_pad], axis=0)                      # [8, 128]


# ================================ wrapper ========================================================
def run_hybrid_fused(obs, adj_bias_block, p):
    vmem = pl.BlockSpec(memory_space=pltpu.MemorySpace.VMEM)
    return pl.pallas_call(
        hybrid_kernel,
        out_shape=jax.ShapeDtypeStruct((OUT_ROWS, OUT_WIDTH), F32),
        in_specs=[vmem] * 21,           # every operand DMA'd once, fully VMEM-resident (no grid)
        out_specs=vmem,
    )(obs, adj_bias_block,
      p["embed_proj"], p["node_pos_bn"], p["gat_win"], p["gat_wqkv_h"], p["gat_wo_h"],
      p["gat_wro"], p["gat_bro"],
      p["p_w1"], p["p_b1"], p["p_w2"], p["p_b2"], p["p_wl"], p["p_bl"],
      p["v_w1"], p["v_b1"], p["v_w2"], p["v_b2"], p["v_w3"], p["v_b3"])


@jax.jit
def hybrid_policy_forward(obs, params, adj_bias_block):
    """Mirrors HybridPolicy.forward + value_function (vf_share_layers=False)."""
    out = run_hybrid_fused(obs, adj_bias_block, params)            # [8, 128] packed slab
    features = out[:B, FEAT_OFF:FEAT_OFF + HIDDEN_SIZE]
    logits = out[:B, LOGIT_OFF:LOGIT_OFF + NUM_OUTPUTS]
    value = out[:B, VALUE_OFF]                                     # == .squeeze(1)
    return logits, features, value


# ================================ deterministic parameter init ===================================
def init_params(key):
    ks = iter(jax.random.split(key, 32))

    def lin(k, fan_in, fan_out):
        return jax.random.normal(k, (fan_in, fan_out), F32) / jnp.sqrt(float(fan_in))

    p = {}
    # GAT (graph transformer)
    p["gat_win"] = lin(next(ks), NODE_EMBED_SIZE, GAT_HIDDEN)
    wq = jnp.stack([lin(next(ks), GAT_HIDDEN, GAT_HIDDEN) for _ in range(GAT_LAYERS)])
    wk = jnp.stack([lin(next(ks), GAT_HIDDEN, GAT_HIDDEN) for _ in range(GAT_LAYERS)])
    wv = jnp.stack([lin(next(ks), GAT_HIDDEN, GAT_HIDDEN) for _ in range(GAT_LAYERS)])
    wo = jnp.stack([lin(next(ks), GAT_HIDDEN, GAT_HIDDEN) for _ in range(GAT_LAYERS)])

    def cols_to_heads(w):   # [L, H, H] -> [L, NH, H, D]  (split output columns into heads)
        return jnp.transpose(w.reshape(GAT_LAYERS, GAT_HIDDEN, N_HEADS, HIDDEN_DIM), (0, 2, 1, 3))

    # fused per-head Q/K/V weights [L, NH, H, 3D] and per-head Wo blocks [L, NH, D, H]
    p["gat_wqkv_h"] = jnp.concatenate(
        [cols_to_heads(wq), cols_to_heads(wk), cols_to_heads(wv)], axis=-1)
    p["gat_wo_h"] = wo.reshape(GAT_LAYERS, N_HEADS, HIDDEN_DIM, GAT_HIDDEN)
    p["gat_wro"] = lin(next(ks), GAT_HIDDEN, NUM_GAT_ACTIONS)
    p["gat_bro"] = jnp.zeros((1, NUM_GAT_ACTIONS), F32)
    # policy FC (_hiddens: [HIDDEN_SIZE, HIDDEN_SIZE] tanh, then _logits)
    pol_in = NUM_GAT_ACTIONS + OBS_DIM
    p["p_w1"] = lin(next(ks), pol_in, HIDDEN_SIZE)
    p["p_b1"] = jnp.zeros((1, HIDDEN_SIZE), F32)
    p["p_w2"] = lin(next(ks), HIDDEN_SIZE, HIDDEN_SIZE)
    p["p_b2"] = jnp.zeros((1, HIDDEN_SIZE), F32)
    p["p_wl"] = lin(next(ks), HIDDEN_SIZE, NUM_OUTPUTS)
    p["p_bl"] = jnp.zeros((1, NUM_OUTPUTS), F32)
    # value branch (separate, VALUE_HIDDENS tanh, then Linear->1)
    p["v_w1"] = lin(next(ks), OBS_DIM, VALUE_HIDDENS[0])
    p["v_b1"] = jnp.zeros((1, VALUE_HIDDENS[0]), F32)
    p["v_w2"] = lin(next(ks), VALUE_HIDDENS[0], VALUE_HIDDENS[1])
    p["v_b2"] = jnp.zeros((1, VALUE_HIDDENS[1]), F32)
    p["v_w3"] = lin(next(ks), VALUE_HIDDENS[1], 1)
    p["v_b3"] = jnp.zeros((1, 1), F32)
    # deterministic stand-in for efficient_embed_obs_in_map: obs projection + node pos embedding
    p["embed_proj"] = lin(next(ks), OBS_DIM, NODE_EMBED_SIZE)
    node_pos = jax.random.normal(next(ks), (N_NODES, NODE_EMBED_SIZE), F32)
    p["node_pos_bn"] = jnp.tile(node_pos, (B, 1))                  # [BN, E], batch-tiled
    return p


def make_block_adjacency_bias():
    """dgl.batch-style block-diagonal adjacency bias over B ring graphs with self-loops."""
    i = jnp.arange(N_NODES)[:, None]
    j = jnp.arange(N_NODES)[None, :]
    adj = ((j == i) | (j == (i + 1) % N_NODES) | (j == (i - 1) % N_NODES)).astype(F32)
    bias = (1.0 - adj) * (-1e9)                                    # [N, N] on-graph bias
    off = jnp.full((N_NODES, N_NODES), -1e9, F32)                  # cross-batch: fully masked
    rows = [jnp.concatenate([bias if bb == b else off for bb in range(B)], axis=1)
            for b in range(B)]
    return jnp.concatenate(rows, axis=0)                           # [BN, BN]


# ================================ main ============================================================
if __name__ == "__main__":
    key = jax.random.PRNGKey(0)
    k_param, k_obs = jax.random.split(key)
    params = init_params(k_param)
    adj_bias_block = make_block_adjacency_bias()

    obs = jax.random.normal(k_obs, (B, OBS_DIM), F32)              # input_dict['obs_flat'].float()

    logits, features, value = hybrid_policy_forward(obs, params, adj_bias_block)
    jax.block_until_ready((logits, features, value))

    assert logits.shape == (B, NUM_OUTPUTS)
    assert features.shape == (B, HIDDEN_SIZE)
    assert value.shape == (B,)
    assert bool(jnp.all(jnp.isfinite(logits))) and bool(jnp.all(jnp.isfinite(value)))
    print("KERNEL_OK")
</pallas_src>

<mosaic_0001>
module attributes {stable_mosaic.version = 11 : i64} {
  func.func @hybrid_kernel(%arg0: memref<2x32xf32, #tpu.memory_space<vmem>>, %arg1: memref<32x32xf32, #tpu.memory_space<vmem>>, %arg2: memref<32x8xf32, #tpu.memory_space<vmem>>, %arg3: memref<32x8xf32, #tpu.memory_space<vmem>>, %arg4: memref<8x16xf32, #tpu.memory_space<vmem>>, %arg5: memref<4x4x16x12xf32, #tpu.memory_space<vmem>>, %arg6: memref<4x4x4x16xf32, #tpu.memory_space<vmem>>, %arg7: memref<16x8xf32, #tpu.memory_space<vmem>>, %arg8: memref<1x8xf32, #tpu.memory_space<vmem>>, %arg9: memref<40x32xf32, #tpu.memory_space<vmem>>, %arg10: memref<1x32xf32, #tpu.memory_space<vmem>>, %arg11: memref<32x32xf32, #tpu.memory_space<vmem>>, %arg12: memref<1x32xf32, #tpu.memory_space<vmem>>, %arg13: memref<32x8xf32, #tpu.memory_space<vmem>>, %arg14: memref<1x8xf32, #tpu.memory_space<vmem>>, %arg15: memref<32x32xf32, #tpu.memory_space<vmem>>, %arg16: memref<1x32xf32, #tpu.memory_space<vmem>>, %arg17: memref<32x32xf32, #tpu.memory_space<vmem>>, %arg18: memref<1x32xf32, #tpu.memory_space<vmem>>, %arg19: memref<32x1xf32, #tpu.memory_space<vmem>>, %arg20: memref<1x1xf32, #tpu.memory_space<vmem>>, %arg21: memref<8x128xf32, #tpu.memory_space<vmem>>) attributes {dimension_semantics = [], scalar_prefetch = 0 : i64, scratch_operands = 0 : i64, tpu.core_type = #tpu.core_type<tc>} {
    %c0 = arith.constant 0 : index
    %c0_0 = arith.constant 0 : index
    %0 = vector.load %arg0[%c0, %c0_0] : memref<2x32xf32, #tpu.memory_space<vmem>>, vector<2x32xf32>
    %c0_1 = arith.constant 0 : index
    %c0_2 = arith.constant 0 : index
    %1 = vector.load %arg2[%c0_1, %c0_2] : memref<32x8xf32, #tpu.memory_space<vmem>>, vector<32x8xf32>
    %cst = arith.constant dense<0.000000e+00> : vector<2x8xf32>
    %2 = tpu.matmul %0, %1, %cst {dimension_numbers = #tpu.dot_dimension_numbers<[1], [0], [0], [1], [0, 0, 1, 1], [], []>} : vector<2x32xf32>, vector<32x8xf32>, vector<2x8xf32> -> vector<2x8xf32>
    %3 = vector.shape_cast %2 : vector<2x8xf32> to vector<2x1x8xf32>
    %4 = vector.shape_cast %3 : vector<2x1x8xf32> to vector<2x1x8xf32>
    %5 = vector.broadcast %4 : vector<2x1x8xf32> to vector<2x16x8xf32>
    %6 = vector.shape_cast %5 : vector<2x16x8xf32> to vector<32x8xf32>
    %c0_3 = arith.constant 0 : index
    %c0_4 = arith.constant 0 : index
    %7 = vector.load %arg3[%c0_3, %c0_4] : memref<32x8xf32, #tpu.memory_space<vmem>>, vector<32x8xf32>
    %8 = arith.addf %6, %7 : vector<32x8xf32>
    %9 = math.tanh %8 : vector<32x8xf32>
    %c0_5 = arith.constant 0 : index
    %c0_6 = arith.constant 0 : index
    %10 = vector.load %arg4[%c0_5, %c0_6] : memref<8x16xf32, #tpu.memory_space<vmem>>, vector<8x16xf32>
    %cst_7 = arith.constant dense<0.000000e+00> : vector<32x16xf32>
    %11 = tpu.matmul %9, %10, %cst_7 {dimension_numbers = #tpu.dot_dimension_numbers<[1], [0], [0], [1], [0, 0, 1, 1], [], []>} : vector<32x8xf32>, vector<8x16xf32>, vector<32x16xf32> -> vector<32x16xf32>
    %12 = math.tanh %11 : vector<32x16xf32>
    %c0_8 = arith.constant 0 : index
    %c0_9 = arith.constant 0 : index
    %13 = vector.load %arg1[%c0_8, %c0_9] : memref<32x32xf32, #tpu.memory_space<vmem>>, vector<32x32xf32>
    %14 = vector.shape_cast %13 : vector<32x32xf32> to vector<1x32x32xf32>
    %15 = vector.shape_cast %14 : vector<1x32x32xf32> to vector<1x32x32xf32>
    %16 = vector.broadcast %15 : vector<1x32x32xf32> to vector<4x32x32xf32>
    %17 = vector.shape_cast %12 : vector<32x16xf32> to vector<1x32x16xf32>
    %18 = vector.shape_cast %17 : vector<1x32x16xf32> to vector<1x32x16xf32>
    %19 = vector.broadcast %18 : vector<1x32x16xf32> to vector<4x32x16xf32>
    %c0_10 = arith.constant 0 : index
    %c0_11 = arith.constant 0 : index
    %c0_12 = arith.constant 0 : index
    %c0_13 = arith.constant 0 : index
    %20 = vector.load %arg5[%c0_10, %c0_11, %c0_12, %c0_13] : memref<4x4x16x12xf32, #tpu.memory_space<vmem>>, vector<1x4x16x12xf32>
    %21 = vector.shape_cast %20 : vector<1x4x16x12xf32> to vector<4x16x12xf32>
    "tpu.trace_start"() <{level = 10 : i32, message = "hnf,hfe->hne"}> : () -> ()
    %cst_14 = arith.constant dense<0.000000e+00> : vector<4x32x12xf32>
    %22 = tpu.matmul %19, %21, %cst_14 {dimension_numbers = #tpu.dot_dimension_numbers<[2], [1], [1], [2], [0, 0, 0, 1, 1, 2], [0], [0]>} : vector<4x32x16xf32>, vector<4x16x12xf32>, vector<4x32x12xf32> -> vector<4x32x12xf32>
    "tpu.trace_stop"() : () -> ()
    %23 = vector.extract_strided_slice %22 {offsets = [0, 0, 0], sizes = [4, 32, 4], strides = [1, 1, 1]} : vector<4x32x12xf32> to vector<4x32x4xf32>
    %24 = vector.extract_strided_slice %22 {offsets = [0, 0, 4], sizes = [4, 32, 4], strides = [1, 1, 1]} : vector<4x32x12xf32> to vector<4x32x4xf32>
    %25 = vector.extract_strided_slice %22 {offsets = [0, 0, 8], sizes = [4, 32, 4], strides = [1, 1, 1]} : vector<4x32x12xf32> to vector<4x32x4xf32>
    "tpu.trace_start"() <{level = 10 : i32, message = "hnd,hmd->hnm"}> : () -> ()
    %cst_15 = arith.constant dense<0.000000e+00> : vector<4x32x32xf32>
    %26 = tpu.matmul %23, %24, %cst_15 {dimension_numbers = #tpu.dot_dimension_numbers<[2], [2], [1], [1], [0, 0, 0, 1, 1, 1], [0], [0]>} : vector<4x32x4xf32>, vector<4x32x4xf32>, vector<4x32x32xf32> -> vector<4x32x32xf32>
    "tpu.trace_stop"() : () -> ()
    %cst_16 = arith.constant 5.000000e-01 : f32
    %27 = vector.broadcast %cst_16 : f32 to vector<4x32x32xf32>
    %28 = arith.mulf %26, %27 : vector<4x32x32xf32>
    %29 = arith.addf %28, %16 : vector<4x32x32xf32>
    %cst_17 = arith.constant dense<0xFF800000> : vector<4x32xf32>
    %30 = vector.multi_reduction <maximumf>, %29, %cst_17 [2] : vector<4x32x32xf32> to vector<4x32xf32>
    %31 = vector.shape_cast %30 : vector<4x32xf32> to vector<4x32x1xf32>
    %32 = vector.broadcast %31 : vector<4x32x1xf32> to vector<4x32x32xf32>
    %33 = arith.subf %29, %32 : vector<4x32x32xf32>
    %34 = math.exp %33 : vector<4x32x32xf32>
    %cst_18 = arith.constant dense<0.000000e+00> : vector<4x32xf32>
    %35 = vector.multi_reduction <add>, %34, %cst_18 [2] : vector<4x32x32xf32> to vector<4x32xf32>
    %36 = vector.shape_cast %35 : vector<4x32xf32> to vector<4x32x1xf32>
    %37 = tpu.reciprocal %36 {approx = true} : vector<4x32x1xf32> -> vector<4x32x1xf32>
    %38 = vector.broadcast %37 : vector<4x32x1xf32> to vector<4x32x32xf32>
    %39 = arith.mulf %34, %38 : vector<4x32x32xf32>
    "tpu.trace_start"() <{level = 10 : i32, message = "hnm,hmd->hnd"}> : () -> ()
    %cst_19 = arith.constant dense<0.000000e+00> : vector<4x32x4xf32>
    %40 = tpu.matmul %39, %25, %cst_19 {dimension_numbers = #tpu.dot_dimension_numbers<[2], [1], [1], [2], [0, 0, 0, 1, 1, 2], [0], [0]>} : vector<4x32x32xf32>, vector<4x32x4xf32>, vector<4x32x4xf32> -> vector<4x32x4xf32>
    "tpu.trace_stop"() : () -> ()
    %c0_20 = arith.constant 0 : index
    %c0_21 = arith.constant 0 : index
    %c0_22 = arith.constant 0 : index
    %c0_23 = arith.constant 0 : index
    %41 = vector.load %arg6[%c0_20, %c0_21, %c0_22, %c0_23] : memref<4x4x4x16xf32, #tpu.memory_space<vmem>>, vector<1x4x4x16xf32>
    %42 = vector.shape_cast %41 : vector<1x4x4x16xf32> to vector<4x4x16xf32>
    "tpu.trace_start"() <{level = 10 : i32, message = "hnd,hdk->hnk"}> : () -> ()
    %cst_24 = arith.constant dense<0.000000e+00> : vector<4x32x16xf32>
    %43 = tpu.matmul %40, %42, %cst_24 {dimension_numbers = #tpu.dot_dimension_numbers<[2], [1], [1], [2], [0, 0, 0, 1, 1, 2], [0], [0]>} : vector<4x32x4xf32>, vector<4x4x16xf32>, vector<4x32x16xf32> -> vector<4x32x16xf32>
    "tpu.trace_stop"() : () -> ()
    %cst_25 = arith.constant dense<0.000000e+00> : vector<32x16xf32>
    %44 = vector.multi_reduction <add>, %43, %cst_25 [0] : vector<4x32x16xf32> to vector<32x16xf32>
    %45 = arith.addf %12, %44 : vector<32x16xf32>
    %46 = math.tanh %45 : vector<32x16xf32>
    %47 = vector.shape_cast %46 : vector<32x16xf32> to vector<1x32x16xf32>
    %48 = vector.shape_cast %47 : vector<1x32x16xf32> to vector<1x32x16xf32>
    %49 = vector.broadcast %48 : vector<1x32x16xf32> to vector<4x32x16xf32>
    %c1 = arith.constant 1 : index
    %c0_26 = arith.constant 0 : index
    %c0_27 = arith.constant 0 : index
    %c0_28 = arith.constant 0 : index
    %50 = vector.load %arg5[%c1, %c0_26, %c0_27, %c0_28] : memref<4x4x16x12xf32, #tpu.memory_space<vmem>>, vector<1x4x16x12xf32>
    %51 = vector.shape_cast %50 : vector<1x4x16x12xf32> to vector<4x16x12xf32>
    "tpu.trace_start"() <{level = 10 : i32, message = "hnf,hfe->hne"}> : () -> ()
    %cst_29 = arith.constant dense<0.000000e+00> : vector<4x32x12xf32>
    %52 = tpu.matmul %49, %51, %cst_29 {dimension_numbers = #tpu.dot_dimension_numbers<[2], [1], [1], [2], [0, 0, 0, 1, 1, 2], [0], [0]>} : vector<4x32x16xf32>, vector<4x16x12xf32>, vector<4x32x12xf32> -> vector<4x32x12xf32>
    "tpu.trace_stop"() : () -> ()
    %53 = vector.extract_strided_slice %52 {offsets = [0, 0, 0], sizes = [4, 32, 4], strides = [1, 1, 1]} : vector<4x32x12xf32> to vector<4x32x4xf32>
    %54 = vector.extract_strided_slice %52 {offsets = [0, 0, 4], sizes = [4, 32, 4], strides = [1, 1, 1]} : vector<4x32x12xf32> to vector<4x32x4xf32>
    %55 = vector.extract_strided_slice %52 {offsets = [0, 0, 8], sizes = [4, 32, 4], strides = [1, 1, 1]} : vector<4x32x12xf32> to vector<4x32x4xf32>
    "tpu.trace_start"() <{level = 10 : i32, message = "hnd,hmd->hnm"}> : () -> ()
    %cst_30 = arith.constant dense<0.000000e+00> : vector<4x32x32xf32>
    %56 = tpu.matmul %53, %54, %cst_30 {dimension_numbers = #tpu.dot_dimension_numbers<[2], [2], [1], [1], [0, 0, 0, 1, 1, 1], [0], [0]>} : vector<4x32x4xf32>, vector<4x32x4xf32>, vector<4x32x32xf32> -> vector<4x32x32xf32>
    "tpu.trace_stop"() : () -> ()
    %cst_31 = arith.constant 5.000000e-01 : f32
    %57 = vector.broadcast %cst_31 : f32 to vector<4x32x32xf32>
    %58 = arith.mulf %56, %57 : vector<4x32x32xf32>
    %59 = arith.addf %58, %16 : vector<4x32x32xf32>
    %cst_32 = arith.constant dense<0xFF800000> : vector<4x32xf32>
    %60 = vector.multi_reduction <maximumf>, %59, %cst_32 [2] : vector<4x32x32xf32> to vector<4x32xf32>
    %61 = vector.shape_cast %60 : vector<4x32xf32> to vector<4x32x1xf32>
    %62 = vector.broadcast %61 : vector<4x32x1xf32> to vector<4x32x32xf32>
    %63 = arith.subf %59, %62 : vector<4x32x32xf32>
    %64 = math.exp %63 : vector<4x32x32xf32>
    %cst_33 = arith.constant dense<0.000000e+00> : vector<4x32xf32>
    %65 = vector.multi_reduction <add>, %64, %cst_33 [2] : vector<4x32x32xf32> to vector<4x32xf32>
    %66 = vector.shape_cast %65 : vector<4x32xf32> to vector<4x32x1xf32>
    %67 = tpu.reciprocal %66 {approx = true} : vector<4x32x1xf32> -> vector<4x32x1xf32>
    %68 = vector.broadcast %67 : vector<4x32x1xf32> to vector<4x32x32xf32>
    %69 = arith.mulf %64, %68 : vector<4x32x32xf32>
    "tpu.trace_start"() <{level = 10 : i32, message = "hnm,hmd->hnd"}> : () -> ()
    %cst_34 = arith.constant dense<0.000000e+00> : vector<4x32x4xf32>
    %70 = tpu.matmul %69, %55, %cst_34 {dimension_numbers = #tpu.dot_dimension_numbers<[2], [1], [1], [2], [0, 0, 0, 1, 1, 2], [0], [0]>} : vector<4x32x32xf32>, vector<4x32x4xf32>, vector<4x32x4xf32> -> vector<4x32x4xf32>
    "tpu.trace_stop"() : () -> ()
    %c1_35 = arith.constant 1 : index
    %c0_36 = arith.constant 0 : index
    %c0_37 = arith.constant 0 : index
    %c0_38 = arith.constant 0 : index
    %71 = vector.load %arg6[%c1_35, %c0_36, %c0_37, %c0_38] : memref<4x4x4x16xf32, #tpu.memory_space<vmem>>, vector<1x4x4x16xf32>
    %72 = vector.shape_cast %71 : vector<1x4x4x16xf32> to vector<4x4x16xf32>
    "tpu.trace_start"() <{level = 10 : i32, message = "hnd,hdk->hnk"}> : () -> ()
    %cst_39 = arith.constant dense<0.000000e+00> : vector<4x32x16xf32>
    %73 = tpu.matmul %70, %72, %cst_39 {dimension_numbers = #tpu.dot_dimension_numbers<[2], [1], [1], [2], [0, 0, 0, 1, 1, 2], [0], [0]>} : vector<4x32x4xf32>, vector<4x4x16xf32>, vector<4x32x16xf32> -> vector<4x32x16xf32>
    "tpu.trace_stop"() : () -> ()
    %cst_40 = arith.constant dense<0.000000e+00> : vector<32x16xf32>
    %74 = vector.multi_reduction <add>, %73, %cst_40 [0] : vector<4x32x16xf32> to vector<32x16xf32>
    %75 = arith.addf %46, %74 : vector<32x16xf32>
    %76 = math.tanh %75 : vector<32x16xf32>
    %77 = vector.shape_cast %76 : vector<32x16xf32> to vector<1x32x16xf32>
    %78 = vector.shape_cast %77 : vector<1x32x16xf32> to vector<1x32x16xf32>
    %79 = vector.broadcast %78 : vector<1x32x16xf32> to vector<4x32x16xf32>
    %c2 = arith.constant 2 : index
    %c0_41 = arith.constant 0 : index
    %c0_42 = arith.constant 0 : index
    %c0_43 = arith.constant 0 : index
    %80 = vector.load %arg5[%c2, %c0_41, %c0_42, %c0_43] : memref<4x4x16x12xf32, #tpu.memory_space<vmem>>, vector<1x4x16x12xf32>
    %81 = vector.shape_cast %80 : vector<1x4x16x12xf32> to vector<4x16x12xf32>
    "tpu.trace_start"() <{level = 10 : i32, message = "hnf,hfe->hne"}> : () -> ()
    %cst_44 = arith.constant dense<0.000000e+00> : vector<4x32x12xf32>
    %82 = tpu.matmul %79, %81, %cst_44 {dimension_numbers = #tpu.dot_dimension_numbers<[2], [1], [1], [2], [0, 0, 0, 1, 1, 2], [0], [0]>} : vector<4x32x16xf32>, vector<4x16x12xf32>, vector<4x32x12xf32> -> vector<4x32x12xf32>
    "tpu.trace_stop"() : () -> ()
    %83 = vector.extract_strided_slice %82 {offsets = [0, 0, 0], sizes = [4, 32, 4], strides = [1, 1, 1]} : vector<4x32x12xf32> to vector<4x32x4xf32>
    %84 = vector.extract_strided_slice %82 {offsets = [0, 0, 4], sizes = [4, 32, 4], strides = [1, 1, 1]} : vector<4x32x12xf32> to vector<4x32x4xf32>
    %85 = vector.extract_strided_slice %82 {offsets = [0, 0, 8], sizes = [4, 32, 4], strides = [1, 1, 1]} : vector<4x32x12xf32> to vector<4x32x4xf32>
    "tpu.trace_start"() <{level = 10 : i32, message = "hnd,hmd->hnm"}> : () -> ()
    %cst_45 = arith.constant dense<0.000000e+00> : vector<4x32x32xf32>
    %86 = tpu.matmul %83, %84, %cst_45 {dimension_numbers = #tpu.dot_dimension_numbers<[2], [2], [1], [1], [0, 0, 0, 1, 1, 1], [0], [0]>} : vector<4x32x4xf32>, vector<4x32x4xf32>, vector<4x32x32xf32> -> vector<4x32x32xf32>
    "tpu.trace_stop"() : () -> ()
    %cst_46 = arith.constant 5.000000e-01 : f32
    %87 = vector.broadcast %cst_46 : f32 to vector<4x32x32xf32>
    %88 = arith.mulf %86, %87 : vector<4x32x32xf32>
    %89 = arith.addf %88, %16 : vector<4x32x32xf32>
    %cst_47 = arith.constant dense<0xFF800000> : vector<4x32xf32>
    %90 = vector.multi_reduction <maximumf>, %89, %cst_47 [2] : vector<4x32x32xf32> to vector<4x32xf32>
    %91 = vector.shape_cast %90 : vector<4x32xf32> to vector<4x32x1xf32>
    %92 = vector.broadcast %91 : vector<4x32x1xf32> to vector<4x32x32xf32>
    %93 = arith.subf %89, %92 : vector<4x32x32xf32>
    %94 = math.exp %93 : vector<4x32x32xf32>
    %cst_48 = arith.constant dense<0.000000e+00> : vector<4x32xf32>
    %95 = vector.multi_reduction <add>, %94, %cst_48 [2] : vector<4x32x32xf32> to vector<4x32xf32>
    %96 = vector.shape_cast %95 : vector<4x32xf32> to vector<4x32x1xf32>
    %97 = tpu.reciprocal %96 {approx = true} : vector<4x32x1xf32> -> vector<4x32x1xf32>
    %98 = vector.broadcast %97 : vector<4x32x1xf32> to vector<4x32x32xf32>
    %99 = arith.mulf %94, %98 : vector<4x32x32xf32>
    "tpu.trace_start"() <{level = 10 : i32, message = "hnm,hmd->hnd"}> : () -> ()
    %cst_49 = arith.constant dense<0.000000e+00> : vector<4x32x4xf32>
    %100 = tpu.matmul %99, %85, %cst_49 {dimension_numbers = #tpu.dot_dimension_numbers<[2], [1], [1], [2], [0, 0, 0, 1, 1, 2], [0], [0]>} : vector<4x32x32xf32>, vector<4x32x4xf32>, vector<4x32x4xf32> -> vector<4x32x4xf32>
    "tpu.trace_stop"() : () -> ()
    %c2_50 = arith.constant 2 : index
    %c0_51 = arith.constant 0 : index
    %c0_52 = arith.constant 0 : index
    %c0_53 = arith.constant 0 : index
    %101 = vector.load %arg6[%c2_50, %c0_51, %c0_52, %c0_53] : memref<4x4x4x16xf32, #tpu.memory_space<vmem>>, vector<1x4x4x16xf32>
    %102 = vector.shape_cast %101 : vector<1x4x4x16xf32> to vector<4x4x16xf32>
    "tpu.trace_start"() <{level = 10 : i32, message = "hnd,hdk->hnk"}> : () -> ()
    %cst_54 = arith.constant dense<0.000000e+00> : vector<4x32x16xf32>
    %103 = tpu.matmul %100, %102, %cst_54 {dimension_numbers = #tpu.dot_dimension_numbers<[2], [1], [1], [2], [0, 0, 0, 1, 1, 2], [0], [0]>} : vector<4x32x4xf32>, vector<4x4x16xf32>, vector<4x32x16xf32> -> vector<4x32x16xf32>
    "tpu.trace_stop"() : () -> ()
    %cst_55 = arith.constant dense<0.000000e+00> : vector<32x16xf32>
    %104 = vector.multi_reduction <add>, %103, %cst_55 [0] : vector<4x32x16xf32> to vector<32x16xf32>
    %105 = arith.addf %76, %104 : vector<32x16xf32>
    %106 = math.tanh %105 : vector<32x16xf32>
    %107 = vector.shape_cast %106 : vector<32x16xf32> to vector<1x32x16xf32>
    %108 = vector.shape_cast %107 : vector<1x32x16xf32> to vector<1x32x16xf32>
    %109 = vector.broadcast %108 : vector<1x32x16xf32> to vector<4x32x16xf32>
    %c3 = arith.constant 3 : index
    %c0_56 = arith.constant 0 : index
    %c0_57 = arith.constant 0 : index
    %c0_58 = arith.constant 0 : index
    %110 = vector.load %arg5[%c3, %c0_56, %c0_57, %c0_58] : memref<4x4x16x12xf32, #tpu.memory_space<vmem>>, vector<1x4x16x12xf32>
    %111 = vector.shape_cast %110 : vector<1x4x16x12xf32> to vector<4x16x12xf32>
    "tpu.trace_start"() <{level = 10 : i32, message = "hnf,hfe->hne"}> : () -> ()
    %cst_59 = arith.constant dense<0.000000e+00> : vector<4x32x12xf32>
    %112 = tpu.matmul %109, %111, %cst_59 {dimension_numbers = #tpu.dot_dimension_numbers<[2], [1], [1], [2], [0, 0, 0, 1, 1, 2], [0], [0]>} : vector<4x32x16xf32>, vector<4x16x12xf32>, vector<4x32x12xf32> -> vector<4x32x12xf32>
    "tpu.trace_stop"() : () -> ()
    %113 = vector.extract_strided_slice %112 {offsets = [0, 0, 0], sizes = [4, 32, 4], strides = [1, 1, 1]} : vector<4x32x12xf32> to vector<4x32x4xf32>
    %114 = vector.extract_strided_slice %112 {offsets = [0, 0, 4], sizes = [4, 32, 4], strides = [1, 1, 1]} : vector<4x32x12xf32> to vector<4x32x4xf32>
    %115 = vector.extract_strided_slice %112 {offsets = [0, 0, 8], sizes = [4, 32, 4], strides = [1, 1, 1]} : vector<4x32x12xf32> to vector<4x32x4xf32>
    "tpu.trace_start"() <{level = 10 : i32, message = "hnd,hmd->hnm"}> : () -> ()
    %cst_60 = arith.constant dense<0.000000e+00> : vector<4x32x32xf32>
    %116 = tpu.matmul %113, %114, %cst_60 {dimension_numbers = #tpu.dot_dimension_numbers<[2], [2], [1], [1], [0, 0, 0, 1, 1, 1], [0], [0]>} : vector<4x32x4xf32>, vector<4x32x4xf32>, vector<4x32x32xf32> -> vector<4x32x32xf32>
    "tpu.trace_stop"() : () -> ()
    %cst_61 = arith.constant 5.000000e-01 : f32
    %117 = vector.broadcast %cst_61 : f32 to vector<4x32x32xf32>
    %118 = arith.mulf %116, %117 : vector<4x32x32xf32>
    %119 = arith.addf %118, %16 : vector<4x32x32xf32>
    %cst_62 = arith.constant dense<0xFF800000> : vector<4x32xf32>
    %120 = vector.multi_reduction <maximumf>, %119, %cst_62 [2] : vector<4x32x32xf32> to vector<4x32xf32>
    %121 = vector.shape_cast %120 : vector<4x32xf32> to vector<4x32x1xf32>
    %122 = vector.broadcast %121 : vector<4x32x1xf32> to vector<4x32x32xf32>
    %123 = arith.subf %119, %122 : vector<4x32x32xf32>
    %124 = math.exp %123 : vector<4x32x32xf32>
    %cst_63 = arith.constant dense<0.000000e+00> : vector<4x32xf32>
    %125 = vector.multi_reduction <add>, %124, %cst_63 [2] : vector<4x32x32xf32> to vector<4x32xf32>
    %126 = vector.shape_cast %125 : vector<4x32xf32> to vector<4x32x1xf32>
    %127 = tpu.reciprocal %126 {approx = true} : vector<4x32x1xf32> -> vector<4x32x1xf32>
    %128 = vector.broadcast %127 : vector<4x32x1xf32> to vector<4x32x32xf32>
    %129 = arith.mulf %124, %128 : vector<4x32x32xf32>
    "tpu.trace_start"() <{level = 10 : i32, message = "hnm,hmd->hnd"}> : () -> ()
    %cst_64 = arith.constant dense<0.000000e+00> : vector<4x32x4xf32>
    %130 = tpu.matmul %129, %115, %cst_64 {dimension_numbers = #tpu.dot_dimension_numbers<[2], [1], [1], [2], [0, 0, 0, 1, 1, 2], [0], [0]>} : vector<4x32x32xf32>, vector<4x32x4xf32>, vector<4x32x4xf32> -> vector<4x32x4xf32>
    "tpu.trace_stop"() : () -> ()
    %c3_65 = arith.constant 3 : index
    %c0_66 = arith.constant 0 : index
    %c0_67 = arith.constant 0 : index
    %c0_68 = arith.constant 0 : index
    %131 = vector.load %arg6[%c3_65, %c0_66, %c0_67, %c0_68] : memref<4x4x4x16xf32, #tpu.memory_space<vmem>>, vector<1x4x4x16xf32>
    %132 = vector.shape_cast %131 : vector<1x4x4x16xf32> to vector<4x4x16xf32>
    "tpu.trace_start"() <{level = 10 : i32, message = "hnd,hdk->hnk"}> : () -> ()
    %cst_69 = arith.constant dense<0.000000e+00> : vector<4x32x16xf32>
    %133 = tpu.matmul %130, %132, %cst_69 {dimension_numbers = #tpu.dot_dimension_numbers<[2], [1], [1], [2], [0, 0, 0, 1, 1, 2], [0], [0]>} : vector<4x32x4xf32>, vector<4x4x16xf32>, vector<4x32x16xf32> -> vector<4x32x16xf32>
    "tpu.trace_stop"() : () -> ()
    %cst_70 = arith.constant dense<0.000000e+00> : vector<32x16xf32>
    %134 = vector.multi_reduction <add>, %133, %cst_70 [0] : vector<4x32x16xf32> to vector<32x16xf32>
    %135 = arith.addf %106, %134 : vector<32x16xf32>
    %136 = math.tanh %135 : vector<32x16xf32>
    %137 = vector.extract_strided_slice %0 {offsets = [0, 0], sizes = [2, 16], strides = [1, 1]} : vector<2x32xf32> to vector<2x16xf32>
    %138 = tpu.iota {dimensions = array<i32: 1>} : vector<2x16xi32>
    %139 = arith.sitofp %138 : vector<2x16xi32> to vector<2x16xf32>
    %cst_71 = arith.constant dense<0xFF800000> : vector<2xf32>
    %140 = vector.multi_reduction <maximumf>, %137, %cst_71 [1] : vector<2x16xf32> to vector<2xf32>
    %141 = vector.shape_cast %140 : vector<2xf32> to vector<2x1xf32>
    %142 = vector.broadcast %141 : vector<2x1xf32> to vector<2x16xf32>
    %143 = arith.cmpf oge, %137, %142 : vector<2x16xf32>
    %cst_72 = arith.constant 1.600000e+01 : f32
    %144 = vector.broadcast %cst_72 : f32 to vector<2x16xf32>
    %145 = arith.select %143, %139, %144 : vector<2x16xi1>, vector<2x16xf32>
    %cst_73 = arith.constant dense<0x7F800000> : vector<2xf32>
    %146 = vector.multi_reduction <minimumf>, %145, %cst_73 [1] : vector<2x16xf32> to vector<2xf32>
    %147 = vector.shape_cast %146 : vector<2xf32> to vector<2x1xf32>
    %148 = tpu.iota {dimensions = array<i32: 1>} : vector<2x32xi32>
    %149 = tpu.iota {dimensions = array<i32: 0>} : vector<2x32xi32>
    %c16_i32 = arith.constant 16 : i32
    %150 = vector.broadcast %c16_i32 : i32 to vector<2x32xi32>
    %151 = arith.muli %149, %150 : vector<2x32xi32>
    %152 = arith.subi %148, %151 : vector<2x32xi32>
    %153 = arith.sitofp %152 : vector<2x32xi32> to vector<2x32xf32>
    %154 = vector.broadcast %147 : vector<2x1xf32> to vector<2x32xf32>
    %155 = arith.cmpf oeq, %153, %154 : vector<2x32xf32>
    %156 = arith.extui %155 : vector<2x32xi1> to vector<2x32xi32>
    %157 = arith.sitofp %156 : vector<2x32xi32> to vector<2x32xf32>
    %cst_74 = arith.constant dense<0.000000e+00> : vector<2x16xf32>
    %158 = tpu.matmul %157, %136, %cst_74 {dimension_numbers = #tpu.dot_dimension_numbers<[1], [0], [0], [1], [0, 0, 1, 1], [], []>} : vector<2x32xf32>, vector<32x16xf32>, vector<2x16xf32> -> vector<2x16xf32>
    %c0_75 = arith.constant 0 : index
    %c0_76 = arith.constant 0 : index
    %159 = vector.load %arg7[%c0_75, %c0_76] : memref<16x8xf32, #tpu.memory_space<vmem>>, vector<16x8xf32>
    %cst_77 = arith.constant dense<0.000000e+00> : vector<2x8xf32>
    %160 = tpu.matmul %158, %159, %cst_77 {dimension_numbers = #tpu.dot_dimension_numbers<[1], [0], [0], [1], [0, 0, 1, 1], [], []>} : vector<2x16xf32>, vector<16x8xf32>, vector<2x8xf32> -> vector<2x8xf32>
    %c0_78 = arith.constant 0 : index
    %c0_79 = arith.constant 0 : index
    %161 = vector.load %arg8[%c0_78, %c0_79] : memref<1x8xf32, #tpu.memory_space<vmem>>, vector<1x8xf32>
    %162 = vector.broadcast %161 : vector<1x8xf32> to vector<2x8xf32>
    %163 = arith.addf %160, %162 : vector<2x8xf32>
    %164 = tpu.concatenate %163, %0 in 1 : vector<2x8xf32>, vector<2x32xf32> -> vector<2x40xf32>
    %c0_80 = arith.constant 0 : index
    %c0_81 = arith.constant 0 : index
    %165 = vector.load %arg9[%c0_80, %c0_81] : memref<40x32xf32, #tpu.memory_space<vmem>>, vector<40x32xf32>
    %cst_82 = arith.constant dense<0.000000e+00> : vector<2x32xf32>
    %166 = tpu.matmul %164, %165, %cst_82 {dimension_numbers = #tpu.dot_dimension_numbers<[1], [0], [0], [1], [0, 0, 1, 1], [], []>} : vector<2x40xf32>, vector<40x32xf32>, vector<2x32xf32> -> vector<2x32xf32>
    %c0_83 = arith.constant 0 : index
    %c0_84 = arith.constant 0 : index
    %167 = vector.load %arg10[%c0_83, %c0_84] : memref<1x32xf32, #tpu.memory_space<vmem>>, vector<1x32xf32>
    %168 = vector.broadcast %167 : vector<1x32xf32> to vector<2x32xf32>
    %169 = arith.addf %166, %168 : vector<2x32xf32>
    %170 = math.tanh %169 : vector<2x32xf32>
    %c0_85 = arith.constant 0 : index
    %c0_86 = arith.constant 0 : index
    %171 = vector.load %arg11[%c0_85, %c0_86] : memref<32x32xf32, #tpu.memory_space<vmem>>, vector<32x32xf32>
    %cst_87 = arith.constant dense<0.000000e+00> : vector<2x32xf32>
    %172 = tpu.matmul %170, %171, %cst_87 {dimension_numbers = #tpu.dot_dimension_numbers<[1], [0], [0], [1], [0, 0, 1, 1], [], []>} : vector<2x32xf32>, vector<32x32xf32>, vector<2x32xf32> -> vector<2x32xf32>
    %c0_88 = arith.constant 0 : index
    %c0_89 = arith.constant 0 : index
    %173 = vector.load %arg12[%c0_88, %c0_89] : memref<1x32xf32, #tpu.memory_space<vmem>>, vector<1x32xf32>
    %174 = vector.broadcast %173 : vector<1x32xf32> to vector<2x32xf32>
    %175 = arith.addf %172, %174 : vector<2x32xf32>
    %176 = math.tanh %175 : vector<2x32xf32>
    %c0_90 = arith.constant 0 : index
    %c0_91 = arith.constant 0 : index
    %177 = vector.load %arg13[%c0_90, %c0_91] : memref<32x8xf32, #tpu.memory_space<vmem>>, vector<32x8xf32>
    %cst_92 = arith.constant dense<0.000000e+00> : vector<2x8xf32>
    %178 = tpu.matmul %176, %177, %cst_92 {dimension_numbers = #tpu.dot_dimension_numbers<[1], [0], [0], [1], [0, 0, 1, 1], [], []>} : vector<2x32xf32>, vector<32x8xf32>, vector<2x8xf32> -> vector<2x8xf32>
    %c0_93 = arith.constant 0 : index
    %c0_94 = arith.constant 0 : index
    %179 = vector.load %arg14[%c0_93, %c0_94] : memref<1x8xf32, #tpu.memory_space<vmem>>, vector<1x8xf32>
    %180 = vector.broadcast %179 : vector<1x8xf32> to vector<2x8xf32>
    %181 = arith.addf %178, %180 : vector<2x8xf32>
    %c0_95 = arith.constant 0 : index
    %c0_96 = arith.constant 0 : index
    %182 = vector.load %arg15[%c0_95, %c0_96] : memref<32x32xf32, #tpu.memory_space<vmem>>, vector<32x32xf32>
    %cst_97 = arith.constant dense<0.000000e+00> : vector<2x32xf32>
    %183 = tpu.matmul %0, %182, %cst_97 {dimension_numbers = #tpu.dot_dimension_numbers<[1], [0], [0], [1], [0, 0, 1, 1], [], []>} : vector<2x32xf32>, vector<32x32xf32>, vector<2x32xf32> -> vector<2x32xf32>
    %c0_98 = arith.constant 0 : index
    %c0_99 = arith.constant 0 : index
    %184 = vector.load %arg16[%c0_98, %c0_99] : memref<1x32xf32, #tpu.memory_space<vmem>>, vector<1x32xf32>
    %185 = vector.broadcast %184 : vector<1x32xf32> to vector<2x32xf32>
    %186 = arith.addf %183, %185 : vector<2x32xf32>
    %187 = math.tanh %186 : vector<2x32xf32>
    %c0_100 = arith.constant 0 : index
    %c0_101 = arith.constant 0 : index
    %188 = vector.load %arg17[%c0_100, %c0_101] : memref<32x32xf32, #tpu.memory_space<vmem>>, vector<32x32xf32>
    %cst_102 = arith.constant dense<0.000000e+00> : vector<2x32xf32>
    %189 = tpu.matmul %187, %188, %cst_102 {dimension_numbers = #tpu.dot_dimension_numbers<[1], [0], [0], [1], [0, 0, 1, 1], [], []>} : vector<2x32xf32>, vector<32x32xf32>, vector<2x32xf32> -> vector<2x32xf32>
    %c0_103 = arith.constant 0 : index
    %c0_104 = arith.constant 0 : index
    %190 = vector.load %arg18[%c0_103, %c0_104] : memref<1x32xf32, #tpu.memory_space<vmem>>, vector<1x32xf32>
    %191 = vector.broadcast %190 : vector<1x32xf32> to vector<2x32xf32>
    %192 = arith.addf %189, %191 : vector<2x32xf32>
    %193 = math.tanh %192 : vector<2x32xf32>
    %c0_105 = arith.constant 0 : index
    %c0_106 = arith.constant 0 : index
    %194 = vector.load %arg19[%c0_105, %c0_106] : memref<32x1xf32, #tpu.memory_space<vmem>>, vector<32x1xf32>
    %cst_107 = arith.constant dense<0.000000e+00> : vector<2x1xf32>
    %195 = tpu.matmul %193, %194, %cst_107 {dimension_numbers = #tpu.dot_dimension_numbers<[1], [0], [0], [1], [0, 0, 1, 1], [], []>} : vector<2x32xf32>, vector<32x1xf32>, vector<2x1xf32> -> vector<2x1xf32>
    %c0_108 = arith.constant 0 : index
    %c0_109 = arith.constant 0 : index
    %196 = vector.load %arg20[%c0_108, %c0_109] : memref<1x1xf32, #tpu.memory_space<vmem>>, vector<1x1xf32>
    %197 = vector.broadcast %196 : vector<1x1xf32> to vector<2x1xf32>
    %198 = arith.addf %195, %197 : vector<2x1xf32>
    %cst_110 = arith.constant 0.000000e+00 : f32
    %199 = vector.broadcast %cst_110 : f32 to vector<2x87xf32>
    %200 = tpu.concatenate %176, %181, %198, %199 in 1 : vector<2x32xf32>, vector<2x8xf32>, vector<2x1xf32>, vector<2x87xf32> -> vector<2x128xf32>
    %cst_111 = arith.constant 0.000000e+00 : f32
    %201 = vector.broadcast %cst_111 : f32 to vector<6x128xf32>
    %202 = tpu.concatenate %200, %201 in 0 : vector<2x128xf32>, vector<6x128xf32> -> vector<8x128xf32>
    %c0_112 = arith.constant 0 : index
    %c0_113 = arith.constant 0 : index
    %203 = vector.load %arg21[%c0_112, %c0_113] : memref<8x128xf32, #tpu.memory_space<vmem>>, vector<8x128xf32>
    tpu.vector_store %arg21[%c0_112, %c0_113], %202 {strides = array<i32>} : memref<8x128xf32, #tpu.memory_space<vmem>>, vector<8x128xf32>,
    return
  }
}

</mosaic_0001>

<bundles_post_ra>
// kernel: hybrid_policy_forward.1
= control target key start
LH: loop header
LB: loop body
LE: loop exit
PB: predicated region body
PF: predicated region fallthrough
CT: control target
= control target key end

     0   :  { %v10647_v0 = vmov 0.0   ;;  %vm10648_vm0 = vmmov 0   ;;  %vm75_vm1 = vcmask 261120   ;;  %v10649_v7 = vmov 1966171168   ;;  %s10653_s30 = smov 32   ;;  %s12918_s2 = inlined_call_operand.vmem [shape: f32[32,8], index: 2, kind: input, shape index: {}]   ;;  %s12919_s0 = inlined_call_operand.vmem [shape: f32[2,32], index: 0, kind: input, shape index: {}]   ;;  %s12920_s4 = inlined_call_operand.vmem [shape: f32[8,16], index: 4, kind: input, shape index: {}]   ;;  %s12921_s3 = inlined_call_operand.vmem [shape: f32[32,8], index: 3, kind: input, shape index: {}]   ;;  %s12922_s5 = inlined_call_operand.vmem [shape: f32[4,4,16,12], index: 5, kind: input, shape index: {}]   ;;  %s12923_s1 = inlined_call_operand.vmem [shape: f32[32,32], index: 1, kind: input, shape index: {}]   ;;  %s12924_s6 = inlined_call_operand.vmem [shape: f32[4,4,4,16], index: 6, kind: input, shape index: {}]   ;;  %s12925_s7 = inlined_call_operand.vmem [shape: f32[16,8], index: 7, kind: input, shape index: {}]   ;;  %s12926_s9 = inlined_call_operand.vmem [shape: f32[40,32], index: 9, kind: input, shape index: {}]   ;;  %s12927_s8 = inlined_call_operand.vmem [shape: f32[1,8], index: 8, kind: input, shape index: {}]   ;;  %s12928_s11 = inlined_call_operand.vmem [shape: f32[32,32], index: 11, kind: input, shape index: {}]   ;;  %s12929_s15 = inlined_call_operand.vmem [shape: f32[32,32], index: 15, kind: input, shape index: {}]   ;;  %s12930_s10 = inlined_call_operand.vmem [shape: f32[1,32], index: 10, kind: input, shape index: {}]   ;;  %s12931_s13 = inlined_call_operand.vmem [shape: f32[32,8], index: 13, kind: input, shape index: {}]   ;;  %s12932_s12 = inlined_call_operand.vmem [shape: f32[1,32], index: 12, kind: input, shape index: {}]   ;;  %s12933_s16 = inlined_call_operand.vmem [shape: f32[1,32], index: 16, kind: input, shape index: {}]   ;;  %s12934_s17 = inlined_call_operand.vmem [shape: f32[32,32], index: 17, kind: input, shape index: {}]   ;;  %s12935_s19 = inlined_call_operand.vmem [shape: f32[32,1], index: 19, kind: input, shape index: {}]   ;;  %s12936_s20 = inlined_call_operand.<no memory space> [shape: f32[1,1], index: 20, kind: input, shape index: {}]   ;;  %s12937_s14 = inlined_call_operand.vmem [shape: f32[1,8], index: 14, kind: input, shape index: {}]   ;;  %s12938_s18 = inlined_call_operand.vmem [shape: f32[1,32], index: 18, kind: input, shape index: {}]   ;;  %s12939_s21 = inlined_call_operand.vmem [shape: f32[8,128], index: 21, kind: output, shape index: {}]  }
   0x1   :  { %12945 = sst [smem:[#allocation3_spill]] %s12918_s2  ;;  %9473 = vmatprep.subr.mxu0 %v10647_v0  ;;  %9481 = vmatprep.mubr.msk.f32.mxu0 %vm10648_vm0, %v10647_v0  ;;  %v151_v8 = vunpack.c.l.s4 %v10649_v7  ;;  %v153_v9 = vlaneseq  ;;  %vm195_vm2 = vcmask 64512   ;;  %vm309_vm3 = vcmask 130048  }
   0x2   :  { %12946 = sst [smem:[#allocation4_spill]] %s12919_s0  ;;  %vm674_vm4 = vcmask 31744   ;;  %vm1775_vm5 = vcmask 1043456   ;;  %vm7897_vm6 = vcmask 123904   ;;  %vm8085_vm9 = vcmask 326656  }
   0x3   :  { %12947 = sst [smem:[#allocation5_spill]] %s12920_s4  ;;  %v152_v10 = vunpack.c.0.s8 %v151_v8  ;;  %v10791_v11 = vshrl.u32 %v153_v9, 7  ;;  %s10651_s4 = smov 120   ;;  %vm8590_vm10 = vcmask 334848   ;;  %vm8592_vm11 = vcmask 1041408  }
   0x4   :  { %12948 = sst [smem:[#allocation6_spill]] %s12921_s3 }
   0x5   :  { %12949 = sst [smem:[#allocation7_spill]] %s12922_s5  ;;  %v155_v12 = vsub.s32 %v152_v10, %v10791_v11  ;;  %v174_v15 = vsub.s32 0, %v10791_v11 }
   0x6   :  { %12950 = sst [smem:[#allocation8_spill]] %s12923_s1 }
   0x7   :  { %s12951_s26 = sld [smem:[#allocation3_spill]] }
   0x8   :  { %s12952_s22 = sld [smem:[#allocation4_spill]] }
   0x9   :  { %s12953_s24 = sld [smem:[#allocation5_spill]] }
   0xa   :  { %s12955_s23 = sld [smem:[#allocation7_spill]] }
   0xb   :  { %s12956_s27 = sld [smem:[#allocation8_spill]] }
   0xd   :  { %v74_v1 = vld [vmem:[%s12951_s26 + $0x18] sm:$0xff]  ;;  %v73_v2 = vld [vmem:[%s12951_s26 + $0x10] sm:$0xff]  ;;  %v72_v3 = vld [vmem:[%s12951_s26 + $0x8] sm:$0xff] }
   0xe   :  { %9474 = vmatpush3.msra.mxu0 %v74_v1  ;;  %v71_v4 = vld [vmem:[%s12951_s26] sm:$0xff]  ;;  %s12954_s26 = sld [smem:[#allocation6_spill]] }
   0xf   :  { %9475 = vmatprep.subr.mxu0 %v10647_v0  ;;  %v70_v5 = vld [vmem:[%s12952_s22] sm:$0x3] }
  0x10   :  { %9476 = vmatpush3.msra.mxu0 %v73_v2  ;;  %v194_v6 = vld [vmem:[%s12953_s24] sm:$0xff]  ;;  %v302_v34 = vld [vmem:[%s12955_s23 + $0x8] sm:$0xff]  ;;  %v304_v36 = vld [vmem:[%s12955_s23 + $0x18] sm:$0xff]  ;;  %s10650_s24 = smov 124  }
  0x11   :  { %9477 = vmatprep.subr.mxu0 %v10647_v0  ;;  %9484 = vmatprep.subr.mxu1 %v194_v6  ;;  %v301_v35 = vld [vmem:[%s12955_s23] sm:$0xff]  ;;  %v303_v37 = vld [vmem:[%s12955_s23 + $0x10] sm:$0xff]  ;;  %v306_v38 = vld [vmem:[%s12955_s23 + $0x28] sm:$0xff] }
  0x12   :  { %9478 = vmatpush3.msra.mxu0 %v72_v3  ;;  %9485 = vmatpush3.msra.mxu1 %v194_v6  ;;  %v308_v39 = vld [vmem:[%s12955_s23 + $0x38] sm:$0xff]  ;;  %v305_v46 = vld [vmem:[%s12955_s23 + $0x20] sm:$0xff]  ;;  %v307_v47 = vld [vmem:[%s12955_s23 + $0x30] sm:$0xff] }
  0x13   :  { %9479 = vmatprep.subr.mxu0 %v10647_v0  ;;  %9492 = vmatprep.subr.mxu1 %v302_v34 }
  0x14   :  { %9480 = vmatpush3.msra.mxu0 %v71_v4  ;;  %v182_v19 = vld [vmem:[%s12954_s26] sm:$0xff]  ;;  %v183_v20 = vld [vmem:[%s12954_s26 + $0x8] sm:$0xff]  ;;  %v184_v23 = vld [vmem:[%s12954_s26 + $0x10] sm:$0xff] }
  0x15   :  { %9482 = vmatmul.mubr.msk.f32.vlgmr.msra.gmra.mxu0 %vm75_vm1, %v70_v5  ;;  %v185_v25 = vld [vmem:[%s12954_s26 + $0x18] sm:$0xff]  ;;  %9502 = vmatprep.subr.mxu0 %v304_v36 }
  0x16   :  { %9503 = vmatpush3.msra.mxu0 %v304_v36 }
  0x17   :  { %9504 = vmatprep.subr.mxu0 %v303_v37 }
  0x18   :  { %9505 = vmatpush3.msra.mxu0 %v303_v37 }
  0x19   :  { %9522 = vmatprep.subr.mxu0 %v308_v39 }
  0xd5   :  { %v145_v13 = vpop.f32.mrf.mxu0 }
  0xd6   :  { %v156_v14 = vrot.slane %v145_v13, %v155_v12 }
  0xd7   :  { %v9483_v16 = vpop.f32.mrf.mxu0 }
  0xd8   :  { %v157_v17 = vcombine.high %v156_v14, %v156_v14  ;;  %v164_v18 = vrot.slane %v156_v14, %v155_v12 }
  0xda   :  { %v171_v21 = vrot.slane %v157_v17, %v155_v12  ;;  %v175_v22 = vrot.slane %v164_v18, %v174_v15 }
  0xdc   :  { %v179_v24 = vrot.slane %v171_v21, %v174_v15  ;;  %v186_v26 = vadd.f32 %v182_v19, %v175_v22  ;;  %v187_v27 = vadd.f32 %v183_v20, %v175_v22 }
  0xde   :  { %v188_v28 = vadd.f32 %v184_v23, %v179_v24  ;;  %10322 = vtanh.f32 %v186_v26  ;;  %v189_v29 = vadd.f32 %v185_v25, %v179_v24 }
  0xdf   :  { %10324 = vtanh.f32 %v187_v27 }
  0xe0   :  { %10326 = vtanh.f32 %v188_v28 }
  0xe1   :  { %10328 = vtanh.f32 %v189_v29 }
  0xeb   :  { %v10323_v30 = vpop.eup %10322 }
  0xec   :  { %v10325_v31 = vpop.eup %10324  ;;  %9486 = vmatprep.mubr.msk.f32.mxu1 %vm195_vm2, %v10323_v30 }
  0xed   :  { %v10327_v32 = vpop.eup %10326  ;;  %9487 = vmatmul.mubr.msk.f32.vlgmr.msra.gmra.mxu1 %vm195_vm2, %v10325_v31 }
  0xee   :  { %9489 = vmatprep.mubr.msk.f32.mxu1 %vm195_vm2, %v10327_v32  ;;  %v10329_v33 = vpop.eup %10328  ;;  %9493 = vmatpush3.msra.mxu1 %v302_v34  ;;  %v11026_v32 = vld [vmem:[%s12956_s27 + $0x8] sm:$0xff] }
  0xef   :  { %9494 = vmatprep.subr.mxu1 %v301_v35 }
  0xf0   :  { %9495 = vmatpush3.msra.mxu1 %v301_v35 }
  0xf1   :  { %9490 = vmatmul.mubr.msk.f32.gmra.mxu1 %vm195_vm2, %v10329_v33  ;;  %9512 = vmatprep.subr.mxu1 %v306_v38 }
 0x1ad   :  { %v9488_v40 = vpop.f32.mrf.mxu1 }
 0x1af   :  { %v274_v41 = vpop.f32.mrf.mxu1 }
 0x1b0   :  { %10330 = vtanh.f32 %v274_v41 }
 0x1b1   :  { %10332 = vtanh.f32 %v9488_v40  ;;  %v9491_v42 = vpop.f32.mrf.mxu1 }
 0x1b3   :  { %v284_v43 = vpop.f32.mrf.mxu1 }
 0x1b4   :  { %10334 = vtanh.f32 %v284_v43  ;;  %v299_v43 = vld [vmem:[%s12956_s27 + $0x10] sm:$0xff] }
 0x1b5   :  { %10336 = vtanh.f32 %v9491_v42 }
 0x1bd   :  { %v10829_v44 = vpop.eup %10330 }
 0x1be   :  { %v10831_v45 = vpop.eup %10332  ;;  %9496 = vmatprep.mubr.msk.f32.mxu1 %vm309_vm3, %v10829_v44  ;;  %9506 = vmatprep.mubr.msk.f32.mxu0 %vm309_vm3, %v10829_v44 }
 0x1bf   :  { %9497 = vmatmul.mubr.msk.f32.vlgmr.msra.gmra.mxu1 %vm309_vm3, %v10831_v45  ;;  %9507 = vmatmul.mubr.msk.f32.vlgmr.msra.gmra.mxu0 %vm309_vm3, %v10831_v45 }
 0x1c0   :  { %9513 = vmatpush3.msra.mxu1 %v306_v38  ;;  %9523 = vmatpush3.msra.mxu0 %v308_v39 }
 0x1c1   :  { %v10847_v48 = vpop.eup %10334  ;;  %9514 = vmatprep.subr.mxu1 %v305_v46  ;;  %9524 = vmatprep.subr.mxu0 %v307_v47 }
 0x1c2   :  { %v10849_v49 = vpop.eup %10336  ;;  %9499 = vmatprep.mubr.msk.f32.mxu1 %vm309_vm3, %v10847_v48  ;;  %9509 = vmatprep.mubr.msk.f32.mxu0 %vm309_vm3, %v10847_v48 }
 0x1c3   :  { %9500 = vmatmul.mubr.msk.f32.gmra.mxu1 %vm309_vm3, %v10849_v49  ;;  %9510 = vmatmul.mubr.msk.f32.gmra.mxu0 %vm309_vm3, %v10849_v49 }
 0x1c4   :  { %9516 = vmatprep.mubr.msk.f32.mxu1 %vm309_vm3, %v10829_v44  ;;  %9526 = vmatprep.mubr.msk.f32.mxu0 %vm309_vm3, %v10829_v44 }
 0x1c5   :  { %9515 = vmatpush3.msra.mxu1 %v305_v46  ;;  %9525 = vmatpush3.msra.mxu0 %v307_v47  ;;  %v297_v46 = vld [vmem:[%s12956_s27] sm:$0xff] }
 0x1c7   :  { %9517 = vmatmul.mubr.msk.f32.vlgmr.msra.gmra.mxu1 %vm309_vm3, %v10831_v45  ;;  %9527 = vmatmul.mubr.msk.f32.vlgmr.msra.gmra.mxu0 %vm309_vm3, %v10831_v45 }
 0x1c8   :  { %9519 = vmatprep.mubr.msk.f32.mxu1 %vm309_vm3, %v10847_v48  ;;  %9529 = vmatprep.mubr.msk.f32.mxu0 %vm309_vm3, %v10847_v48 }
 0x1cb   :  { %9520 = vmatmul.mubr.msk.f32.gmra.mxu1 %vm309_vm3, %v10849_v49  ;;  %9530 = vmatmul.mubr.msk.f32.gmra.mxu0 %vm309_vm3, %v10849_v49 }
 0x27f   :  { %v10875_v50 = vpop.f32.mrf.mxu1  ;;  %v10877_v51 = vpop.f32.mrf.mxu0 }
 0x281   :  { %v388_v52 = vpop.f32.mrf.mxu1  ;;  %v473_v53 = vpop.f32.mrf.mxu0 }
 0x282   :  { %9540 = vmatprep.mubr.msk.f32.mxu1 %vm674_vm4, %v388_v52  ;;  %9554 = vmatprep.mubr.msk.f32.mxu0 %vm674_vm4, %v473_v53 }
 0x283   :  { %v10881_v54 = vpop.f32.mrf.mxu1  ;;  %v10885_v55 = vpop.f32.mrf.mxu0 }
 0x284   :  { %672 = vrot.lane.b32.xlu0 %v10881_v54, %s10650_s24 }
 0x285   :  { %v10887_v56 = vpop.f32.mrf.mxu1  ;;  %v10893_v57 = vpop.f32.mrf.mxu0 }
 0x286   :  { %670 = vrot.lane.b32.xlu1 %v10887_v56, %s10650_s24 }
 0x287   :  { %v10897_v58 = vpop.f32.mrf.mxu1  ;;  %v10901_v59 = vpop.f32.mrf.mxu0 }
 0x288   :  { %786 = vrot.lane.b32.xlu0 %v10885_v55, %s10650_s24 }
 0x289   :  { %v10905_v60 = vpop.f32.mrf.mxu1  ;;  %v10908_v61 = vpop.f32.mrf.mxu0 }
 0x28a   :  { %784 = vrot.lane.b32.xlu1 %v10893_v57, %s10650_s24 }
 0x28b   :  { %v10911_v62 = vpop.f32.mrf.mxu1  ;;  %v10915_v63 = vpop.f32.mrf.mxu0 }
 0x28c   :  { %668 = vrot.lane.b32.xlu0 %v10875_v50, %s10650_s24 }
 0x28d   :  { %v10919_v1 = vpop.f32.mrf.mxu1  ;;  %v10923_v2 = vpop.f32.mrf.mxu0 }
 0x28e   :  { %782 = vrot.lane.b32.xlu1 %v10877_v51, %s10650_s24 }
 0x290   :  { %666 = vrot.lane.b32.xlu0 %v388_v52, %s10650_s24 }
 0x292   :  { %780 = vrot.lane.b32.xlu1 %v473_v53, %s10650_s24 }
 0x294   :  { %899 = vrot.lane.b32.xlu0 %v10911_v62, %s10650_s24 }
 0x296   :  { %1012 = vrot.lane.b32.xlu1 %v10915_v63, %s10650_s24 }
 0x298   :  { %897 = vrot.lane.b32.xlu0 %v10919_v1, %s10650_s24 }
 0x29a   :  { %1010 = vrot.lane.b32.xlu1 %v10923_v2, %s10650_s24 }
 0x29c   :  { %895 = vrot.lane.b32.xlu0 %v10897_v58, %s10650_s24 }
 0x29e   :  { %1008 = vrot.lane.b32.xlu1 %v10901_v59, %s10650_s24 }
 0x2a0   :  { %893 = vrot.lane.b32.xlu0 %v10905_v60, %s10650_s24 }
 0x2a2   :  { %1006 = vrot.lane.b32.xlu1 %v10908_v61, %s10650_s24 }
 0x2a4   :  { %1327 = vrot.lane.b32.xlu0 %v10887_v56, %s10651_s4 }
 0x2a6   :  { %1329 = vrot.lane.b32.xlu1 %v10881_v54, %s10651_s4 }
 0x2a8   :  { %1436 = vrot.lane.b32.xlu0 %v10893_v57, %s10651_s4 }
 0x2aa   :  { %1438 = vrot.lane.b32.xlu1 %v10885_v55, %s10651_s4 }
 0x2ac   :  { %1434 = vrot.lane.b32.xlu0 %v10877_v51, %s10651_s4 }
 0x2ae   :  { %1325 = vrot.lane.b32.xlu1 %v10875_v50, %s10651_s4 }
 0x2b0   :  { %1547 = vrot.lane.b32.xlu0 %v10911_v62, %s10651_s4 }
 0x2b2   :  { %1323 = vrot.lane.b32.xlu1 %v388_v52, %s10651_s4 }
 0x2b4   :  { %1656 = vrot.lane.b32.xlu0 %v10915_v63, %s10651_s4 }
 0x2b6   :  { %1432 = vrot.lane.b32.xlu1 %v473_v53, %s10651_s4 }
 0x2ba   :  { %1543 = vrot.lane.b32.xlu1 %v10897_v58, %s10651_s4 }
 0x2be   :  { %1545 = vrot.lane.b32.xlu1 %v10919_v1, %s10651_s4 }
 0x2f6   :  { %v673_v3 = vpop.permute.xlu0 %672 }
 0x2f7   :  { %9532 = vmatprep.subr.msk.mxu1 %vm674_vm4, %v673_v3 }
 0x2f8   :  { %9533 = vmatpush3.xpose.msk.msra.mxu1 %vm674_vm4, %v673_v3  ;;  %v671_v4 = vpop.permute.xlu1 %670 }
 0x2f9   :  { %9534 = vmatprep.subr.msk.mxu1 %vm674_vm4, %v671_v4 }
 0x2fa   :  { %v787_v5 = vpop.permute.xlu0 %786 }
 0x2fb   :  { %9546 = vmatprep.subr.msk.mxu0 %vm674_vm4, %v787_v5 }
 0x2fc   :  { %9535 = vmatpush3.xpose.msk.msra.mxu1 %vm674_vm4, %v671_v4  ;;  %9547 = vmatpush3.xpose.msk.msra.mxu0 %vm674_vm4, %v787_v5  ;;  %v785_v6 = vpop.permute.xlu1 %784  ;;  %v300_v4 = vld [vmem:[%s12956_s27 + $0x18] sm:$0xff] }
 0x2fd   :  { %9548 = vmatprep.subr.msk.mxu0 %vm674_vm4, %v785_v6 }
 0x2fe   :  { %v669_v7 = vpop.permute.xlu0 %668 }
 0x2ff   :  { %9536 = vmatprep.subr.msk.mxu1 %vm674_vm4, %v669_v7 }
 0x300   :  { %9537 = vmatpush3.xpose.msk.msra.mxu1 %vm674_vm4, %v669_v7  ;;  %9549 = vmatpush3.xpose.msk.msra.mxu0 %vm674_vm4, %v785_v6  ;;  %v783_v8 = vpop.permute.xlu1 %782 }
 0x301   :  { %9550 = vmatprep.subr.msk.mxu0 %vm674_vm4, %v783_v8 }
 0x302   :  { %v667_v10 = vpop.permute.xlu0 %666 }
 0x303   :  { %9538 = vmatprep.subr.msk.mxu1 %vm674_vm4, %v667_v10 }
 0x304   :  { %9539 = vmatpush3.xpose.msk.msra.mxu1 %vm674_vm4, %v667_v10  ;;  %9551 = vmatpush3.xpose.msk.msra.mxu0 %vm674_vm4, %v783_v8  ;;  %v781_v12 = vpop.permute.xlu1 %780 }
 0x305   :  { %9552 = vmatprep.subr.msk.mxu0 %vm674_vm4, %v781_v12 }
 0x306   :  { %v900_v13 = vpop.permute.xlu0 %899 }
 0x307   :  { %9541 = vmatmul.mubr.msk.f32.vlgmr.msra.gmra.mxu1 %vm674_vm4, %v10875_v50  ;;  %9560 = vmatprep.subr.msk.mxu1 %vm674_vm4, %v900_v13 }
 0x308   :  { %9543 = vmatprep.mubr.msk.f32.mxu1 %vm674_vm4, %v10887_v56  ;;  %9553 = vmatpush3.xpose.msk.msra.mxu0 %vm674_vm4, %v781_v12  ;;  %v1013_v14 = vpop.permute.xlu1 %1012 }
 0x309   :  { %9561 = vmatpush3.xpose.msk.msra.mxu1 %vm674_vm4, %v900_v13  ;;  %9574 = vmatprep.subr.msk.mxu0 %vm674_vm4, %v1013_v14 }
 0x30a   :  { %v898_v15 = vpop.permute.xlu0 %897 }
 0x30b   :  { %9544 = vmatmul.mubr.msk.f32.gmra.mxu1 %vm674_vm4, %v10881_v54  ;;  %9555 = vmatmul.mubr.msk.f32.vlgmr.msra.gmra.mxu0 %vm674_vm4, %v10877_v51 }
 0x30c   :  { %9562 = vmatprep.subr.msk.mxu1 %vm674_vm4, %v898_v15  ;;  %9557 = vmatprep.mubr.msk.f32.mxu0 %vm674_vm4, %v10893_v57  ;;  %v1011_v16 = vpop.permute.xlu1 %1010 }
 0x30d   :  { %9563 = vmatpush3.xpose.msk.msra.mxu1 %vm674_vm4, %v898_v15  ;;  %9568 = vmatprep.mubr.msk.f32.mxu1 %vm674_vm4, %v10905_v60 }
 0x30e   :  { %9575 = vmatpush3.xpose.msk.msra.mxu0 %vm674_vm4, %v1013_v14  ;;  %v896_v17 = vpop.permute.xlu0 %895 }
 0x30f   :  { %9576 = vmatprep.subr.msk.mxu0 %vm674_vm4, %v1011_v16  ;;  %9558 = vmatmul.mubr.msk.f32.gmra.mxu0 %vm674_vm4, %v10885_v55 }
 0x310   :  { %9564 = vmatprep.subr.msk.mxu1 %vm674_vm4, %v896_v17  ;;  %9582 = vmatprep.mubr.msk.f32.mxu0 %vm674_vm4, %v10908_v61  ;;  %v1009_v18 = vpop.permute.xlu1 %1008 }
 0x311   :  { %9565 = vmatpush3.xpose.msk.msra.mxu1 %vm674_vm4, %v896_v17 }
 0x312   :  { %9577 = vmatpush3.xpose.msk.msra.mxu0 %vm674_vm4, %v1011_v16  ;;  %v894_v19 = vpop.permute.xlu0 %893 }
 0x313   :  { %9578 = vmatprep.subr.msk.mxu0 %vm674_vm4, %v1009_v18  ;;  %9566 = vmatprep.subr.msk.mxu1 %vm674_vm4, %v894_v19 }
 0x314   :  { %v1007_v20 = vpop.permute.xlu1 %1006 }
 0x315   :  { %9567 = vmatpush3.xpose.msk.msra.mxu1 %vm674_vm4, %v894_v19 }
 0x316   :  { %9579 = vmatpush3.xpose.msk.msra.mxu0 %vm674_vm4, %v1009_v18  ;;  %v1328_v21 = vpop.permute.xlu0 %1327 }
 0x317   :  { %9580 = vmatprep.subr.msk.mxu0 %vm674_vm4, %v1007_v20 }
 0x318   :  { %9569 = vmatmul.mubr.msk.f32.vlgmr.msra.gmra.mxu1 %vm674_vm4, %v10897_v58  ;;  %v1330_v22 = vpop.permute.xlu1 %1329 }
 0x319   :  { %9571 = vmatprep.mubr.msk.f32.mxu1 %vm674_vm4, %v10919_v1  ;;  %9588 = vmatprep.subr.mxu1 %v1330_v22 }
 0x31a   :  { %9581 = vmatpush3.xpose.msk.msra.mxu0 %vm674_vm4, %v1007_v20  ;;  %v1437_v23 = vpop.permute.xlu0 %1436  ;;  %9589 = vmatpush3.msra.mxu1 %v1330_v22 }
 0x31b   :  { %9590 = vmatprep.subr.mxu1 %v1328_v21 }
 0x31c   :  { %9572 = vmatmul.mubr.msk.f32.gmra.mxu1 %vm674_vm4, %v10911_v62  ;;  %v1439_v24 = vpop.permute.xlu1 %1438 }
 0x31d   :  { %9583 = vmatmul.mubr.msk.f32.vlgmr.msra.gmra.mxu0 %vm674_vm4, %v10901_v59  ;;  %9591 = vmatpush3.msra.mxu1 %v1328_v21 }
 0x31e   :  { %9585 = vmatprep.mubr.msk.f32.mxu0 %vm674_vm4, %v10923_v2  ;;  %9602 = vmatprep.subr.mxu0 %v1439_v24  ;;  %v1435_v25 = vpop.permute.xlu0 %1434 }
 0x31f   :  { %9603 = vmatpush3.msra.mxu0 %v1439_v24 }
 0x320   :  { %9604 = vmatprep.subr.mxu0 %v1437_v23  ;;  %v1326_v26 = vpop.permute.xlu1 %1325 }
 0x321   :  { %9586 = vmatmul.mubr.msk.f32.gmra.mxu0 %vm674_vm4, %v10915_v63  ;;  %9592 = vmatprep.subr.mxu1 %v1326_v26 }
 0x322   :  { %9605 = vmatpush3.msra.mxu0 %v1437_v23  ;;  %9593 = vmatpush3.msra.mxu1 %v1326_v26  ;;  %v11017_v27 = vpop.permute.xlu0 %1547 }
 0x323   :  { %9606 = vmatprep.subr.mxu0 %v1435_v25 }
 0x324   :  { %9607 = vmatpush3.msra.mxu0 %v1435_v25  ;;  %v1324_v28 = vpop.permute.xlu1 %1323 }
 0x325   :  { %9594 = vmatprep.subr.mxu1 %v1324_v28 }
 0x326   :  { %9595 = vmatpush3.msra.mxu1 %v1324_v28  ;;  %v11020_v30 = vpop.permute.xlu0 %1656 }
 0x327   :  { %9616 = vmatprep.subr.mxu1 %v11017_v27 }
 0x328   :  { %v1433_v29 = vpop.permute.xlu1 %1432 }
 0x329   :  { %9608 = vmatprep.subr.mxu0 %v1433_v29 }
 0x32a   :  { %9609 = vmatpush3.msra.mxu0 %v1433_v29 }
 0x32b   :  { %9630 = vmatprep.subr.mxu0 %v11020_v30 }
 0x3c7   :  { %v9542_v31 = vpop.f32.mrf.mxu1 }
 0x3c8   :  { %v1116_v33 = vmul.f32 0.5, %v9542_v31 }
 0x3c9   :  { %v757_v34 = vpop.f32.mrf.mxu1 }
 0x3ca   :  { %v11029_v35 = vadd.f32 %v1116_v33, %v11026_v32  ;;  %v1115_v38 = vmul.f32 0.5, %v757_v34 }
 0x3cb   :  { %v9545_v36 = vpop.f32.mrf.mxu1  ;;  %v9556_v37 = vpop.f32.mrf.mxu0 }
 0x3cc   :  { %v1120_v39 = vmul.f32 0.5, %v9556_v37  ;;  %v1150_v40 = vsel %vm75_vm1, %v11029_v35, -inf  ;;  %v11046_v55 = vadd.f32 %v1115_v38, %v297_v46  ;;  %v1118_v62 = vmul.f32 0.5, %v9545_v36 }
 0x3cd   :  { %v767_v41 = vpop.f32.mrf.mxu1  ;;  %1151 = vmax.xlane.f32.xlu1 %v1150_v40  ;;  %v870_v42 = vpop.f32.mrf.mxu0 }
 0x3ce   :  { %v1117_v47 = vmul.f32 0.5, %v767_v41  ;;  %v11040_v50 = vadd.f32 %v1120_v39, %v11026_v32  ;;  %v1119_v52 = vmul.f32 0.5, %v870_v42  ;;  %v1147_v63 = vsel %vm75_vm1, %v11046_v55, -inf }
 0x3cf   :  { %v9559_v51 = vpop.f32.mrf.mxu0  ;;  %v11063_v10 = vadd.f32 %v1118_v62, %v300_v4 }
 0x3d0   :  { %v1162_v53 = vsel %vm75_vm1, %v11040_v50, -inf  ;;  %v11044_v54 = vadd.f32 %v1117_v47, %v299_v43  ;;  %v11054_v3 = vadd.f32 %v1119_v52, %v297_v46  ;;  %v1122_v6 = vmul.f32 0.5, %v9559_v51 }
 0x3d1   :  { %1163 = vmax.xlane.f32.xlu0 %v1162_v53  ;;  %v880_v56 = vpop.f32.mrf.mxu0  ;;  %v1156_v16 = vsel %vm75_vm1, %v11063_v10, -inf }
 0x3d2   :  { %v1121_v57 = vmul.f32 0.5, %v880_v56  ;;  %v1153_v58 = vsel %vm75_vm1, %v11044_v54, -inf  ;;  %v1159_v8 = vsel %vm75_vm1, %v11054_v3, -inf  ;;  %v11067_v17 = vadd.f32 %v1122_v6, %v300_v4 }
 0x3d3   :  { %1154 = vmax.xlane.f32.xlu1 %v1153_v58 }
 0x3d4   :  { %v11052_v1 = vadd.f32 %v1121_v57, %v299_v43  ;;  %v1168_v28 = vsel %vm75_vm1, %v11067_v17, -inf }
 0x3d5   :  { %1148 = vmax.xlane.f32.xlu0 %v1147_v63 }
 0x3d6   :  { %v1165_v5 = vsel %vm75_vm1, %v11052_v1, -inf }
 0x3d7   :  { %1166 = vmax.xlane.f32.xlu1 %v1165_v5 }
 0x3d8   :  { %v9570_v7 = vpop.f32.mrf.mxu1 }
 0x3d9   :  { %1160 = vmax.xlane.f32.xlu0 %v1159_v8  ;;  %v1124_v13 = vmul.f32 0.5, %v9570_v7 }
 0x3da   :  { %v983_v12 = vpop.f32.mrf.mxu1 }
 0x3db   :  { %v1123_v14 = vmul.f32 0.5, %v983_v12  ;;  %v11074_v23 = vadd.f32 %v1124_v13, %v11026_v32 }
 0x3dc   :  { %v9573_v15 = vpop.f32.mrf.mxu1 }
 0x3dd   :  { %v9584_v18 = vpop.f32.mrf.mxu0  ;;  %1157 = vmax.xlane.f32.xlu0 %v1156_v16  ;;  %v11069_v19 = vadd.f32 %v1123_v14, %v297_v46  ;;  %v1126_v33 = vmul.f32 0.5, %v9573_v15  ;;  %v1174_v36 = vsel %vm75_vm1, %v11074_v23, -inf }
 0x3de   :  { %v993_v20 = vpop.f32.mrf.mxu1  ;;  %v1128_v24 = vmul.f32 0.5, %v9584_v18 }
 0x3df   :  { %v1096_v21 = vpop.f32.mrf.mxu0  ;;  %v1171_v22 = vsel %vm75_vm1, %v11069_v19, -inf  ;;  %v1125_v25 = vmul.f32 0.5, %v993_v20  ;;  %v11089_v41 = vadd.f32 %v1126_v33, %v300_v4 }
 0x3e0   :  { %v1127_v26 = vmul.f32 0.5, %v1096_v21  ;;  %1172 = vmax.xlane.f32.xlu1 %v1171_v22  ;;  %v11087_v40 = vadd.f32 %v1128_v24, %v11026_v32 }
 0x3e1   :  { %v9587_v29 = vpop.f32.mrf.mxu0  ;;  %1169 = vmax.xlane.f32.xlu0 %v1168_v28  ;;  %v11084_v39 = vadd.f32 %v1125_v25, %v299_v43  ;;  %v1180_v32 = vsel %vm75_vm1, %v11089_v41, -inf }
 0x3e2   :  { %v11078_v31 = vadd.f32 %v1127_v26, %v297_v46  ;;  %v1130_v42 = vmul.f32 0.5, %v9587_v29  ;;  %v1186_v47 = vsel %vm75_vm1, %v11087_v40, -inf }
 0x3e3   :  { %v1106_v34 = vpop.f32.mrf.mxu0  ;;  %v1177_v46 = vsel %vm75_vm1, %v11084_v39, -inf }
 0x3e4   :  { %v1129_v37 = vmul.f32 0.5, %v1106_v34  ;;  %v1183_v38 = vsel %vm75_vm1, %v11078_v31, -inf  ;;  %v11101_v53 = vadd.f32 %v1130_v42, %v300_v4 }
 0x3e5   :  { %1184 = vmax.xlane.f32.xlu1 %v1183_v38  ;;  %1175 = vmax.xlane.f32.xlu0 %v1174_v36 }
 0x3e6   :  { %v11095_v51 = vadd.f32 %v1129_v37, %v299_v43  ;;  %v1192_v56 = vsel %vm75_vm1, %v11101_v53, -inf  ;;  %v11109_v43 = vpop.permute.xlu1 %1543 }
 0x3e8   :  { %v1189_v52 = vsel %vm75_vm1, %v11095_v51, -inf }
 0x3e9   :  { %1178 = vmax.xlane.f32.xlu1 %v1177_v46  ;;  %1187 = vmax.xlane.f32.xlu0 %v1186_v47 }
 0x3ea   :  { %v11111_v57 = vpop.permute.xlu1 %1545 }
 0x3ed   :  { %1190 = vmax.xlane.f32.xlu1 %v1189_v52  ;;  %1181 = vmax.xlane.f32.xlu0 %v1180_v32 }
 0x3f1   :  { %1193 = vmax.xlane.f32.xlu0 %v1192_v56 }
 0x3fe   :  { %1541 = vrot.lane.b32.xlu1 %v10905_v60, %s10651_s4 }
 0x407   :  { %1654 = vrot.lane.b32.xlu0 %v10923_v2, %s10651_s4 }
 0x456   :  { %v1152_v58 = vpop.xlane.xlu1 %1151 }
 0x457   :  { %v1196_v62 = vsub.f32 %v11029_v35, %v1152_v58 }
 0x459   :  { %v1213_v63 = vmul.f32 1.442695, %v1196_v62 }
 0x45a   :  { %v1164_v4 = vpop.xlane.xlu0 %1163 }
 0x45b   :  { %10338 = vpow2.f32 %v1213_v63  ;;  %v1200_v5 = vsub.f32 %v11040_v50, %v1164_v4 }
 0x45c   :  { %v1155_v6 = vpop.xlane.xlu1 %1154 }
 0x45d   :  { %v1221_v7 = vmul.f32 1.442695, %v1200_v5  ;;  %v1197_v2 = vsub.f32 %v11044_v54, %v1155_v6 }
 0x45e   :  { %v1149_v8 = vpop.xlane.xlu0 %1148 }
 0x45f   :  { %10340 = vpow2.f32 %v1221_v7  ;;  %v1195_v60 = vsub.f32 %v11046_v55, %v1149_v8  ;;  %v1215_v35 = vmul.f32 1.442695, %v1197_v2 }
 0x460   :  { %v1167_v13 = vpop.xlane.xlu1 %1166 }
 0x461   :  { %v1211_v12 = vmul.f32 1.442695, %v1195_v60  ;;  %v1201_v16 = vsub.f32 %v11052_v1, %v1167_v13 }
 0x462   :  { %v1161_v14 = vpop.xlane.xlu0 %1160 }
 0x463   :  { %10342 = vpow2.f32 %v1211_v12  ;;  %v1199_v15 = vsub.f32 %v11054_v3, %v1161_v14  ;;  %v1223_v55 = vmul.f32 1.442695, %v1201_v16 }
 0x465   :  { %v1219_v18 = vmul.f32 1.442695, %v1199_v15 }
 0x466   :  { %v1158_v20 = vpop.xlane.xlu0 %1157 }
 0x467   :  { %10344 = vpow2.f32 %v1219_v18  ;;  %v1198_v50 = vsub.f32 %v11063_v10, %v1158_v20 }
 0x468   :  { %v11120_v21 = vpop.eup %10338  ;;  %10346 = vpow2.f32 %v1215_v35 }
 0x469   :  { %v1217_v22 = vmul.f32 1.442695, %v1198_v50  ;;  %v1173_v54 = vpop.xlane.xlu1 %1172  ;;  %v1246_v24 = vsel %vm75_vm1, %v11120_v21, 0.0 }
 0x46a   :  { %v1203_v25 = vsub.f32 %v11069_v19, %v1173_v54  ;;  %v1170_v3 = vpop.xlane.xlu0 %1169  ;;  %1247 = vadd.xlane.f32.xlu0 %v1246_v24 }
 0x46b   :  { %10348 = vpow2.f32 %v1217_v22  ;;  %v1202_v1 = vsub.f32 %v11067_v17, %v1170_v3 }
 0x46c   :  { %v11126_v26 = vpop.eup %10340  ;;  %10350 = vpow2.f32 %v1223_v55  ;;  %v1227_v10 = vmul.f32 1.442695, %v1203_v25 }
 0x46d   :  { %v1225_v28 = vmul.f32 1.442695, %v1202_v1  ;;  %v1258_v29 = vsel %vm75_vm1, %v11126_v26, 0.0 }
 0x46e   :  { %v1185_v33 = vpop.xlane.xlu1 %1184  ;;  %v1176_v34 = vpop.xlane.xlu0 %1175  ;;  %1259 = vadd.xlane.f32.xlu0 %v1258_v29 }
 0x46f   :  { %10352 = vpow2.f32 %v1225_v28  ;;  %v1207_v36 = vsub.f32 %v11078_v31, %v1185_v33  ;;  %v1204_v19 = vsub.f32 %v11074_v23, %v1176_v34 }
 0x470   :  { %v11132_v37 = vpop.eup %10342  ;;  %10354 = vpow2.f32 %v1227_v10 }
 0x471   :  { %v1235_v17 = vmul.f32 1.442695, %v1207_v36  ;;  %v1229_v38 = vmul.f32 1.442695, %v1204_v19  ;;  %v1243_v42 = vsel %vm75_vm1, %v11132_v37, 0.0 }
 0x472   :  { %v1179_v46 = vpop.xlane.xlu1 %1178  ;;  %v1188_v47 = vpop.xlane.xlu0 %1187  ;;  %1244 = vadd.xlane.f32.xlu1 %v1243_v42 }
 0x473   :  { %v1205_v52 = vsub.f32 %v11084_v39, %v1179_v46  ;;  %v1208_v32 = vsub.f32 %v11087_v40, %v1188_v47  ;;  %10356 = vpow2.f32 %v1229_v38 }
 0x474   :  { %v11138_v56 = vpop.eup %10344  ;;  %10358 = vpow2.f32 %v1235_v17 }
 0x475   :  { %v11140_v31 = vpop.eup %10346  ;;  %v1231_v23 = vmul.f32 1.442695, %v1205_v52  ;;  %v1237_v58 = vmul.f32 1.442695, %v1208_v32  ;;  %v1255_v62 = vsel %vm75_vm1, %v11138_v56, 0.0 }
 0x476   :  { %v1191_v63 = vpop.xlane.xlu1 %1190  ;;  %v1182_v4 = vpop.xlane.xlu0 %1181  ;;  %1256 = vadd.xlane.f32.xlu1 %v1255_v62  ;;  %v1249_v40 = vsel %vm75_vm1, %v11140_v31, 0.0 }
 0x477   :  { %v1209_v5 = vsub.f32 %v11095_v51, %v1191_v63  ;;  %v1206_v39 = vsub.f32 %v11089_v41, %v1182_v4  ;;  %10360 = vpow2.f32 %v1237_v58 }
 0x478   :  { %v11146_v6 = vpop.eup %10348  ;;  %10362 = vpow2.f32 %v1231_v23 }
 0x479   :  { %v1239_v7 = vmul.f32 1.442695, %v1209_v5  ;;  %v1233_v8 = vmul.f32 1.442695, %v1206_v39  ;;  %v1252_v60 = vsel %vm75_vm1, %v11146_v6, 0.0  ;;  %v11152_v2 = vpop.eup %10350 }
 0x47a   :  { %1253 = vadd.xlane.f32.xlu0 %v1252_v60  ;;  %v1194_v12 = vpop.xlane.xlu0 %1193  ;;  %1250 = vadd.xlane.f32.xlu1 %v1249_v40  ;;  %v1261_v15 = vsel %vm75_vm1, %v11152_v2, 0.0  ;;  %v1542_v36 = vpop.permute.xlu1 %1541 }
 0x47b   :  { %v1210_v51 = vsub.f32 %v11101_v53, %v1194_v12  ;;  %10364 = vpow2.f32 %v1233_v8 }
 0x47c   :  { %v11155_v41 = vpop.eup %10352  ;;  %10366 = vpow2.f32 %v1239_v7 }
 0x47d   :  { %v1241_v13 = vmul.f32 1.442695, %v1210_v51  ;;  %v1264_v14 = vsel %vm75_vm1, %v11155_v41, 0.0  ;;  %v11161_v35 = vpop.eup %10354 }
 0x47e   :  { %1265 = vadd.xlane.f32.xlu0 %v1264_v14  ;;  %1262 = vadd.xlane.f32.xlu1 %v1261_v15  ;;  %v1267_v53 = vsel %vm75_vm1, %v11161_v35, 0.0  ;;  %v1655_v33 = vpop.permute.xlu0 %1654 }
 0x47f   :  { %10368 = vpow2.f32 %v1241_v13 }
 0x480   :  { %v11163_v16 = vpop.eup %10356 }
 0x481   :  { %v11167_v18 = vpop.eup %10358  ;;  %v1270_v20 = vsel %vm75_vm1, %v11163_v16, 0.0 }
 0x482   :  { %1268 = vadd.xlane.f32.xlu1 %v1267_v53  ;;  %1271 = vadd.xlane.f32.xlu0 %v1270_v20  ;;  %v1279_v55 = vsel %vm75_vm1, %v11167_v18, 0.0 }
 0x484   :  { %v11171_v50 = vpop.eup %10360 }
 0x485   :  { %v11175_v22 = vpop.eup %10362  ;;  %v1282_v54 = vsel %vm75_vm1, %v11171_v50, 0.0 }
 0x486   :  { %1280 = vadd.xlane.f32.xlu1 %v1279_v55  ;;  %1283 = vadd.xlane.f32.xlu0 %v1282_v54  ;;  %v1273_v25 = vsel %vm75_vm1, %v11175_v22, 0.0 }
 0x488   :  { %v11179_v24 = vpop.eup %10364 }
 0x489   :  { %v11183_v3 = vpop.eup %10366  ;;  %v1276_v1 = vsel %vm75_vm1, %v11179_v24, 0.0 }
 0x48a   :  { %1274 = vadd.xlane.f32.xlu1 %v1273_v25  ;;  %1277 = vadd.xlane.f32.xlu0 %v1276_v1  ;;  %v1285_v29 = vsel %vm75_vm1, %v11183_v3, 0.0 }
 0x48c   :  { %v11187_v10 = vpop.eup %10368 }
 0x48d   :  { %v1288_v28 = vsel %vm75_vm1, %v11187_v10, 0.0 }
 0x48e   :  { %1286 = vadd.xlane.f32.xlu1 %v1285_v29  ;;  %1289 = vadd.xlane.f32.xlu0 %v1288_v28 }
 0x49f   :  { %1650 = vrot.lane.b32.xlu1 %v10908_v61, %s10651_s4 }
 0x4a4   :  { %1652 = vrot.lane.b32.xlu0 %v10901_v59, %s10651_s4 }
 0x4f3   :  { %v1248_v34 = vpop.xlane.xlu0 %1247 }
 0x4f4   :  { %10370 = vrcp.f32 %v1248_v34 }
 0x4f7   :  { %v1260_v17 = vpop.xlane.xlu0 %1259 }
 0x4fb   :  { %v1245_v19 = vpop.xlane.xlu1 %1244 }
 0x4fc   :  { %10372 = vrcp.f32 %v1245_v19 }
 0x4fd   :  { %10374 = vrcp.f32 %v1260_v17 }
 0x4ff   :  { %v1257_v38 = vpop.xlane.xlu1 %1256 }
 0x500   :  { %10376 = vrcp.f32 %v1257_v38 }
 0x501   :  { %v10371_v61 = vpop.eup %10370 }
 0x502   :  { %v1308_v23 = vmul.f32 %v10371_v61, %v11120_v21 }
 0x503   :  { %v1254_v42 = vpop.xlane.xlu0 %1253  ;;  %v1251_v46 = vpop.xlane.xlu1 %1250 }
 0x504   :  { %10378 = vrcp.f32 %v1254_v42 }
 0x505   :  { %10380 = vrcp.f32 %v1251_v46 }
 0x507   :  { %v1266_v47 = vpop.xlane.xlu0 %1265  ;;  %v1263_v52 = vpop.xlane.xlu1 %1262 }
 0x508   :  { %10382 = vrcp.f32 %v1266_v47 }
 0x509   :  { %v10373_v32 = vpop.eup %10372  ;;  %10384 = vrcp.f32 %v1263_v52 }
 0x50a   :  { %v1307_v59 = vmul.f32 %v10373_v32, %v11132_v37  ;;  %v10375_v62 = vpop.eup %10374 }
 0x50b   :  { %v1269_v58 = vpop.xlane.xlu1 %1268  ;;  %v1272_v63 = vpop.xlane.xlu0 %1271  ;;  %v1312_v39 = vmul.f32 %v10375_v62, %v11126_v26  ;;  %v8689_v62 = vld [vmem:[%s12955_s23 + $0x48] sm:$0xff] }
 0x50c   :  { %10386 = vrcp.f32 %v1269_v58  ;;  %9596 = vmatprep.mubr.msk.f32.mxu1 %vm75_vm1, %v1307_v59 }
 0x50d   :  { %v10377_v4 = vpop.eup %10376  ;;  %10388 = vrcp.f32 %v1272_v63  ;;  %9597 = vmatmul.mubr.msk.f32.vlgmr.msra.gmra.mxu1 %vm75_vm1, %v1308_v23  ;;  %v8691_v63 = vld [vmem:[%s12955_s23 + $0x58] sm:$0xff] }
 0x50e   :  { %9617 = vmatpush3.msra.mxu1 %v11017_v27  ;;  %v1311_v5 = vmul.f32 %v10377_v4, %v11138_v56  ;;  %v8688_v4 = vld [vmem:[%s12955_s23 + $0x40] sm:$0xff] }
 0x50f   :  { %9618 = vmatprep.subr.mxu1 %v11111_v57  ;;  %v1281_v37 = vpop.xlane.xlu1 %1280  ;;  %v1284_v21 = vpop.xlane.xlu0 %1283 }
 0x510   :  { %9619 = vmatpush3.msra.mxu1 %v11111_v57  ;;  %10390 = vrcp.f32 %v1281_v37  ;;  %9610 = vmatprep.mubr.msk.f32.mxu0 %vm75_vm1, %v1311_v5  ;;  %v8690_v5 = vld [vmem:[%s12955_s23 + $0x50] sm:$0xff]  ;;  %v11291_v37 = vld [vmem:[%s12955_s23 + $0x78] sm:$0xff] }
 0x511   :  { %v10379_v40 = vpop.eup %10378  ;;  %10392 = vrcp.f32 %v1284_v21  ;;  %9620 = vmatprep.subr.mxu1 %v11109_v43  ;;  %9611 = vmatmul.mubr.msk.f32.vlgmr.msra.gmra.mxu0 %vm75_vm1, %v1312_v39  ;;  %v11286_v39 = vld [vmem:[%s12955_s23 + $0x68] sm:$0xff] }
 0x512   :  { %v10381_v27 = vpop.eup %10380  ;;  %9621 = vmatpush3.msra.mxu1 %v11109_v43  ;;  %9631 = vmatpush3.msra.mxu0 %v11020_v30  ;;  %v1310_v26 = vmul.f32 %v10379_v40, %v11146_v6 }
 0x513   :  { %9622 = vmatprep.subr.mxu1 %v1542_v36  ;;  %9632 = vmatprep.subr.mxu0 %v1655_v33  ;;  %v1275_v56 = vpop.xlane.xlu1 %1274  ;;  %v1309_v57 = vmul.f32 %v10381_v27, %v11140_v31  ;;  %v1278_v7 = vpop.xlane.xlu0 %1277 }
 0x514   :  { %9623 = vmatpush3.msra.mxu1 %v1542_v36  ;;  %9633 = vmatpush3.msra.mxu0 %v1655_v33  ;;  %10394 = vrcp.f32 %v1275_v56 }
 0x515   :  { %v10383_v8 = vpop.eup %10382  ;;  %10396 = vrcp.f32 %v1278_v7  ;;  %9599 = vmatprep.mubr.msk.f32.mxu1 %vm75_vm1, %v1309_v57 }
 0x516   :  { %v10385_v60 = vpop.eup %10384  ;;  %9600 = vmatmul.mubr.msk.f32.gmra.mxu1 %vm75_vm1, %v1310_v26  ;;  %v1314_v30 = vmul.f32 %v10383_v8, %v11155_v41 }
 0x517   :  { %v1287_v43 = vpop.xlane.xlu1 %1286  ;;  %v1313_v6 = vmul.f32 %v10385_v60, %v11152_v2  ;;  %v1290_v12 = vpop.xlane.xlu0 %1289 }
 0x518   :  { %10398 = vrcp.f32 %v1287_v43 }
 0x519   :  { %v10387_v51 = vpop.eup %10386  ;;  %10400 = vrcp.f32 %v1290_v12  ;;  %9613 = vmatprep.mubr.msk.f32.mxu0 %vm75_vm1, %v1313_v6 }
 0x51a   :  { %v10389_v31 = vpop.eup %10388  ;;  %9614 = vmatmul.mubr.msk.f32.gmra.mxu0 %vm75_vm1, %v1314_v30  ;;  %v1315_v13 = vmul.f32 %v10387_v51, %v11161_v35 }
 0x51b   :  { %v1316_v14 = vmul.f32 %v10389_v31, %v11163_v16  ;;  %v1653_v15 = vpop.permute.xlu0 %1652  ;;  %v1651_v53 = vpop.permute.xlu1 %1650 }
 0x51c   :  { %9624 = vmatprep.mubr.msk.f32.mxu1 %vm75_vm1, %v1315_v13  ;;  %9634 = vmatprep.subr.mxu0 %v1653_v15 }
 0x51d   :  { %v10391_v41 = vpop.eup %10390  ;;  %9625 = vmatmul.mubr.msk.f32.vlgmr.msra.gmra.mxu1 %vm75_vm1, %v1316_v14  ;;  %9635 = vmatpush3.msra.mxu0 %v1653_v15 }
 0x51e   :  { %v10393_v2 = vpop.eup %10392  ;;  %v1319_v20 = vmul.f32 %v10391_v41, %v11167_v18  ;;  %9636 = vmatprep.subr.mxu0 %v1651_v53 }
 0x51f   :  { %v1320_v55 = vmul.f32 %v10393_v2, %v11171_v50  ;;  %9637 = vmatpush3.msra.mxu0 %v1651_v53 }
 0x520   :  { %9638 = vmatprep.mubr.msk.f32.mxu0 %vm75_vm1, %v1319_v20 }
 0x521   :  { %v10395_v35 = vpop.eup %10394  ;;  %9639 = vmatmul.mubr.msk.f32.vlgmr.msra.gmra.mxu0 %vm75_vm1, %v1320_v55 }
 0x522   :  { %v10397_v16 = vpop.eup %10396  ;;  %v1317_v54 = vmul.f32 %v10395_v35, %v11175_v22  ;;  %v1759_v22 = vld [vmem:[%s12924_s6] sm:$0xf] }
 0x523   :  { %v1318_v25 = vmul.f32 %v10397_v16, %v11179_v24  ;;  %9644 = vmatprep.subr.msk.mxu1 %vm1775_vm5, %v1759_v22  ;;  %v1760_v24 = vld [vmem:[%s12924_s6 + $0x4] sm:$0xf] }
 0x524   :  { %9627 = vmatprep.mubr.msk.f32.mxu1 %vm75_vm1, %v1317_v54  ;;  %9645 = vmatpush3.msk.msra.mxu1 %vm1775_vm5, %v1759_v22 }
 0x525   :  { %v10399_v1 = vpop.eup %10398  ;;  %9628 = vmatmul.mubr.msk.f32.gmra.mxu1 %vm75_vm1, %v1318_v25  ;;  %9652 = vmatprep.subr.msk.mxu0 %vm1775_vm5, %v1760_v24 }
 0x526   :  { %v10401_v18 = vpop.eup %10400  ;;  %v1321_v50 = vmul.f32 %v10399_v1, %v11183_v3  ;;  %9653 = vmatpush3.msk.msra.mxu0 %vm1775_vm5, %v1760_v24  ;;  %v1761_v3 = vld [vmem:[%s12924_s6 + $0x8] sm:$0xf] }
 0x527   :  { %v1322_v28 = vmul.f32 %v10401_v18, %v11187_v10  ;;  %9660 = vmatprep.subr.msk.mxu1 %vm1775_vm5, %v1761_v3  ;;  %v1762_v10 = vld [vmem:[%s12924_s6 + $0xc] sm:$0xf] }
 0x528   :  { %9641 = vmatprep.mubr.msk.f32.mxu0 %vm75_vm1, %v1321_v50  ;;  %9668 = vmatprep.subr.msk.mxu0 %vm1775_vm5, %v1762_v10 }
 0x529   :  { %9642 = vmatmul.mubr.msk.f32.gmra.mxu0 %vm75_vm1, %v1322_v28 }
 0x5cd   :  { %v9598_v29 = vpop.f32.mrf.mxu1 }
 0x5cf   :  { %v1413_v33 = vpop.f32.mrf.mxu1 }
 0x5d0   :  { %9646 = vmatprep.mubr.msk.f32.mxu1 %vm674_vm4, %v1413_v33 }
 0x5d1   :  { %v9612_v34 = vpop.f32.mrf.mxu0  ;;  %9647 = vmatmul.mubr.msk.f32.vlgmr.msra.gmra.mxu1 %vm674_vm4, %v9598_v29 }
 0x5d2   :  { %9661 = vmatpush3.msk.msra.mxu1 %vm1775_vm5, %v1761_v3 }
 0x5d3   :  { %v1522_v36 = vpop.f32.mrf.mxu0  ;;  %9676 = vmatprep.subr.mxu1 %v8689_v62 }
 0x5d4   :  { %9654 = vmatprep.mubr.msk.f32.mxu0 %vm674_vm4, %v1522_v36 }
 0x5d5   :  { %9655 = vmatmul.mubr.msk.f32.vlgmr.msra.gmra.mxu0 %vm674_vm4, %v9612_v34 }
 0x5d6   :  { %v9601_v19 = vpop.f32.mrf.mxu1  ;;  %9669 = vmatpush3.msk.msra.mxu0 %vm1775_vm5, %v1762_v10 }
 0x5d7   :  { %9686 = vmatprep.subr.mxu0 %v8691_v63 }
 0x5d8   :  { %v1423_v17 = vpop.f32.mrf.mxu1 }
 0x5d9   :  { %9649 = vmatprep.mubr.msk.f32.mxu1 %vm674_vm4, %v1423_v17 }
 0x5da   :  { %v9615_v38 = vpop.f32.mrf.mxu0  ;;  %9650 = vmatmul.mubr.msk.f32.gmra.mxu1 %vm674_vm4, %v9601_v19 }
 0x5dc   :  { %v1532_v42 = vpop.f32.mrf.mxu0 }
 0x5dd   :  { %9657 = vmatprep.mubr.msk.f32.mxu0 %vm674_vm4, %v1532_v42  ;;  %v9626_v46 = vpop.f32.mrf.mxu1 }
 0x5de   :  { %9658 = vmatmul.mubr.msk.f32.gmra.mxu0 %vm674_vm4, %v9615_v38 }
 0x5df   :  { %v1631_v47 = vpop.f32.mrf.mxu1 }
 0x5e0   :  { %9662 = vmatprep.mubr.msk.f32.mxu1 %vm674_vm4, %v1631_v47 }
 0x5e1   :  { %v9640_v52 = vpop.f32.mrf.mxu0  ;;  %9663 = vmatmul.mubr.msk.f32.vlgmr.msra.gmra.mxu1 %vm674_vm4, %v9626_v46 }
 0x5e2   :  { %9677 = vmatpush3.msra.mxu1 %v8689_v62 }
 0x5e3   :  { %v1740_v61 = vpop.f32.mrf.mxu0  ;;  %9678 = vmatprep.subr.mxu1 %v8688_v4 }
 0x5e4   :  { %9670 = vmatprep.mubr.msk.f32.mxu0 %vm674_vm4, %v1740_v61  ;;  %9679 = vmatpush3.msra.mxu1 %v8688_v4 }
 0x5e5   :  { %v9629_v32 = vpop.f32.mrf.mxu1  ;;  %9671 = vmatmul.mubr.msk.f32.vlgmr.msra.gmra.mxu0 %vm674_vm4, %v9640_v52  ;;  %9696 = vmatprep.subr.mxu1 %v11286_v39 }
 0x5e6   :  { %9687 = vmatpush3.msra.mxu0 %v8691_v63 }
 0x5e7   :  { %v1641_v59 = vpop.f32.mrf.mxu1  ;;  %9688 = vmatprep.subr.mxu0 %v8690_v5 }
 0x5e8   :  { %9665 = vmatprep.mubr.msk.f32.mxu1 %vm674_vm4, %v1641_v59  ;;  %9689 = vmatpush3.msra.mxu0 %v8690_v5  ;;  %v8692_v59 = vld [vmem:[%s12955_s23 + $0x60] sm:$0xff] }
 0x5e9   :  { %v9643_v23 = vpop.f32.mrf.mxu0  ;;  %9666 = vmatmul.mubr.msk.f32.gmra.mxu1 %vm674_vm4, %v9629_v32  ;;  %9706 = vmatprep.subr.mxu0 %v11291_v37 }
 0x5eb   :  { %v1750_v58 = vpop.f32.mrf.mxu0 }
 0x5ec   :  { %9673 = vmatprep.mubr.msk.f32.mxu0 %vm674_vm4, %v1750_v58 }
 0x5ed   :  { %9674 = vmatmul.mubr.msk.f32.gmra.mxu0 %vm674_vm4, %v9643_v23 }
 0x691   :  { %v9648_v21 = vpop.f32.mrf.mxu1 }
 0x692   :  { %v2171_v30 = vsel %vm309_vm3, %v9648_v21, 0.0 }
 0x693   :  { %v1845_v40 = vpop.f32.mrf.mxu1 }
 0x694   :  { %v2164_v13 = vsel %vm309_vm3, %v1845_v40, 0.0 }
 0x695   :  { %v9656_v27 = vpop.f32.mrf.mxu0 }
 0x696   :  { %v2172_v8 = vsel %vm309_vm3, %v9656_v27, 0.0 }
 0x697   :  { %v1945_v56 = vpop.f32.mrf.mxu0  ;;  %v2173_v12 = vadd.f32 %v2172_v8, %v2171_v30 }
 0x698   :  { %v2165_v43 = vsel %vm309_vm3, %v1945_v56, 0.0 }
 0x699   :  { %v2166_v15 = vadd.f32 %v2165_v43, %v2164_v13 }
 0x69a   :  { %v9651_v26 = vpop.f32.mrf.mxu1 }
 0x69b   :  { %v2185_v18 = vsel %vm309_vm3, %v9651_v26, 0.0 }
 0x69c   :  { %v1855_v57 = vpop.f32.mrf.mxu1 }
 0x69d   :  { %v2178_v29 = vsel %vm309_vm3, %v1855_v57, 0.0 }
 0x69e   :  { %v9659_v7 = vpop.f32.mrf.mxu0 }
 0x69f   :  { %v2186_v16 = vsel %vm309_vm3, %v9659_v7, 0.0 }
 0x6a0   :  { %v1955_v51 = vpop.f32.mrf.mxu0  ;;  %v2187_v24 = vadd.f32 %v2186_v16, %v2185_v18 }
 0x6a1   :  { %v9664_v60 = vpop.f32.mrf.mxu1  ;;  %v2179_v50 = vsel %vm309_vm3, %v1955_v51, 0.0 }
 0x6a2   :  { %v2174_v6 = vsel %vm309_vm3, %v9664_v60, 0.0  ;;  %v2180_v34 = vadd.f32 %v2179_v50, %v2178_v29 }
 0x6a3   :  { %v2045_v31 = vpop.f32.mrf.mxu1  ;;  %v2175_v41 = vadd.f32 %v2174_v6, %v2173_v12 }
 0x6a4   :  { %v2167_v14 = vsel %vm309_vm3, %v2045_v31, 0.0 }
 0x6a5   :  { %v9672_v2 = vpop.f32.mrf.mxu0  ;;  %v2168_v20 = vadd.f32 %v2167_v14, %v2166_v15 }
 0x6a6   :  { %v2176_v53 = vsel %vm309_vm3, %v9672_v2, 0.0 }
 0x6a7   :  { %v2177_v55 = vadd.f32 %v2176_v53, %v2175_v41  ;;  %v2145_v35 = vpop.f32.mrf.mxu0 }
 0x6a8   :  { %v2169_v54 = vsel %vm309_vm3, %v2145_v35, 0.0 }
 0x6a9   :  { %v2170_v25 = vadd.f32 %v2169_v54, %v2168_v20  ;;  %v9667_v1 = vpop.f32.mrf.mxu1  ;;  %v2193_v28 = vadd.f32 %v10831_v45, %v2177_v55 }
 0x6aa   :  { %v2188_v22 = vsel %vm309_vm3, %v9667_v1, 0.0 }
 0x6ab   :  { %v2192_v3 = vadd.f32 %v10829_v44, %v2170_v25  ;;  %v2055_v10 = vpop.f32.mrf.mxu1  ;;  %v2189_v36 = vadd.f32 %v2188_v22, %v2187_v24 }
 0x6ac   :  { %v2181_v33 = vsel %vm309_vm3, %v2055_v10, 0.0 }
 0x6ad   :  { %10402 = vtanh.f32 %v2192_v3  ;;  %v9675_v19 = vpop.f32.mrf.mxu0  ;;  %v2182_v38 = vadd.f32 %v2181_v33, %v2180_v34 }
 0x6ae   :  { %10404 = vtanh.f32 %v2193_v28  ;;  %v2190_v17 = vsel %vm309_vm3, %v9675_v19, 0.0 }
 0x6af   :  { %v2191_v42 = vadd.f32 %v2190_v17, %v2189_v36  ;;  %v2155_v45 = vpop.f32.mrf.mxu0 }
 0x6b0   :  { %v2183_v46 = vsel %vm309_vm3, %v2155_v45, 0.0 }
 0x6b1   :  { %v2184_v47 = vadd.f32 %v2183_v46, %v2182_v38  ;;  %v2195_v44 = vadd.f32 %v10849_v49, %v2191_v42  ;;  %v10634_v42 = vld [vmem:[%s12956_s27 + $0x8] sm:$0xff] }
 0x6b3   :  { %v2194_v52 = vadd.f32 %v10847_v48, %v2184_v47  ;;  %v8694_v48 = vld [vmem:[%s12955_s23 + $0x70] sm:$0xff] }
 0x6b5   :  { %10406 = vtanh.f32 %v2194_v52 }
 0x6b6   :  { %10408 = vtanh.f32 %v2195_v44 }
 0x6ba   :  { %v11315_v61 = vpop.eup %10402 }
 0x6bb   :  { %v11317_v32 = vpop.eup %10404  ;;  %9680 = vmatprep.mubr.msk.f32.mxu1 %vm309_vm3, %v11315_v61  ;;  %9690 = vmatprep.mubr.msk.f32.mxu0 %vm309_vm3, %v11315_v61 }
 0x6bc   :  { %9681 = vmatmul.mubr.msk.f32.vlgmr.msra.gmra.mxu1 %vm309_vm3, %v11317_v32  ;;  %9691 = vmatmul.mubr.msk.f32.vlgmr.msra.gmra.mxu0 %vm309_vm3, %v11317_v32 }
 0x6bd   :  { %9697 = vmatpush3.msra.mxu1 %v11286_v39  ;;  %9707 = vmatpush3.msra.mxu0 %v11291_v37 }
 0x6be   :  { %9698 = vmatprep.subr.mxu1 %v8692_v59  ;;  %9708 = vmatprep.subr.mxu0 %v8694_v48 }
 0x6bf   :  { %9699 = vmatpush3.msra.mxu1 %v8692_v59  ;;  %9709 = vmatpush3.msra.mxu0 %v8694_v48 }
 0x6c2   :  { %v11335_v49 = vpop.eup %10406 }
 0x6c3   :  { %v11337_v23 = vpop.eup %10408  ;;  %9683 = vmatprep.mubr.msk.f32.mxu1 %vm309_vm3, %v11335_v49  ;;  %9693 = vmatprep.mubr.msk.f32.mxu0 %vm309_vm3, %v11335_v49 }
 0x6c4   :  { %9684 = vmatmul.mubr.msk.f32.gmra.mxu1 %vm309_vm3, %v11337_v23  ;;  %9694 = vmatmul.mubr.msk.f32.gmra.mxu0 %vm309_vm3, %v11337_v23 }
 0x6c5   :  { %9700 = vmatprep.mubr.msk.f32.mxu1 %vm309_vm3, %v11315_v61  ;;  %9710 = vmatprep.mubr.msk.f32.mxu0 %vm309_vm3, %v11315_v61 }
 0x6c8   :  { %9701 = vmatmul.mubr.msk.f32.vlgmr.msra.gmra.mxu1 %vm309_vm3, %v11317_v32  ;;  %9711 = vmatmul.mubr.msk.f32.vlgmr.msra.gmra.mxu0 %vm309_vm3, %v11317_v32 }
 0x6c9   :  { %9703 = vmatprep.mubr.msk.f32.mxu1 %vm309_vm3, %v11335_v49  ;;  %9713 = vmatprep.mubr.msk.f32.mxu0 %vm309_vm3, %v11335_v49 }
 0x6cc   :  { %9704 = vmatmul.mubr.msk.f32.gmra.mxu1 %vm309_vm3, %v11337_v23  ;;  %9714 = vmatmul.mubr.msk.f32.gmra.mxu0 %vm309_vm3, %v11337_v23 }
 0x77c   :  { %v11363_v58 = vpop.f32.mrf.mxu1  ;;  %v11365_v62 = vpop.f32.mrf.mxu0 }
 0x77e   :  { %v2287_v63 = vpop.f32.mrf.mxu1  ;;  %v2372_v4 = vpop.f32.mrf.mxu0 }
 0x77f   :  { %9724 = vmatprep.mubr.msk.f32.mxu1 %vm674_vm4, %v2287_v63  ;;  %9738 = vmatprep.mubr.msk.f32.mxu0 %vm674_vm4, %v2372_v4 }
 0x784   :  { %v11369_v5 = vpop.f32.mrf.mxu1  ;;  %v11371_v39 = vpop.f32.mrf.mxu0 }
 0x785   :  { %2684 = vrot.lane.b32.xlu1 %v11371_v39, %s10650_s24  ;;  %2571 = vrot.lane.b32.xlu0 %v11369_v5, %s10650_s24 }
 0x786   :  { %v11377_v37 = vpop.f32.mrf.mxu1  ;;  %v11379_v21 = vpop.f32.mrf.mxu0 }
 0x788   :  { %v11385_v40 = vpop.f32.mrf.mxu1  ;;  %v11387_v27 = vpop.f32.mrf.mxu0 }
 0x789   :  { %2682 = vrot.lane.b32.xlu1 %v11379_v21, %s10650_s24  ;;  %2569 = vrot.lane.b32.xlu0 %v11377_v37, %s10650_s24 }
 0x78a   :  { %v11393_v26 = vpop.f32.mrf.mxu1  ;;  %v11395_v56 = vpop.f32.mrf.mxu0 }
 0x78c   :  { %v11399_v57 = vpop.f32.mrf.mxu1  ;;  %v11401_v7 = vpop.f32.mrf.mxu0 }
 0x78d   :  { %2680 = vrot.lane.b32.xlu1 %v11365_v62, %s10650_s24  ;;  %2567 = vrot.lane.b32.xlu0 %v11363_v58, %s10650_s24 }
 0x78e   :  { %v11407_v8 = vpop.f32.mrf.mxu1  ;;  %v11409_v60 = vpop.f32.mrf.mxu0 }
 0x791   :  { %2678 = vrot.lane.b32.xlu1 %v2372_v4, %s10650_s24  ;;  %2565 = vrot.lane.b32.xlu0 %v2287_v63, %s10650_s24 }
 0x795   :  { %2910 = vrot.lane.b32.xlu1 %v11401_v7, %s10650_s24  ;;  %2797 = vrot.lane.b32.xlu0 %v11399_v57, %s10650_s24 }
 0x799   :  { %2908 = vrot.lane.b32.xlu1 %v11409_v60, %s10650_s24  ;;  %2795 = vrot.lane.b32.xlu0 %v11407_v8, %s10650_s24 }
 0x79d   :  { %2906 = vrot.lane.b32.xlu1 %v11387_v27, %s10650_s24  ;;  %2793 = vrot.lane.b32.xlu0 %v11385_v40, %s10650_s24 }
 0x7a1   :  { %2904 = vrot.lane.b32.xlu1 %v11395_v56, %s10650_s24  ;;  %2791 = vrot.lane.b32.xlu0 %v11393_v26, %s10650_s24 }
 0x7a5   :  { %3227 = vrot.lane.b32.xlu1 %v11369_v5, %s10651_s4  ;;  %3225 = vrot.lane.b32.xlu0 %v11377_v37, %s10651_s4 }
 0x7a9   :  { %3336 = vrot.lane.b32.xlu1 %v11371_v39, %s10651_s4  ;;  %3334 = vrot.lane.b32.xlu0 %v11379_v21, %s10651_s4 }
 0x7ad   :  { %3223 = vrot.lane.b32.xlu1 %v11363_v58, %s10651_s4  ;;  %3332 = vrot.lane.b32.xlu0 %v11365_v62, %s10651_s4 }
 0x7b1   :  { %3221 = vrot.lane.b32.xlu1 %v2287_v63, %s10651_s4  ;;  %3445 = vrot.lane.b32.xlu0 %v11399_v57, %s10651_s4  ;;  %v10635_v63 = vld [vmem:[%s12956_s27] sm:$0xff] }
 0x7b5   :  { %3330 = vrot.lane.b32.xlu1 %v2372_v4, %s10651_s4  ;;  %3554 = vrot.lane.b32.xlu0 %v11401_v7, %s10651_s4 }
 0x7b9   :  { %3441 = vrot.lane.b32.xlu1 %v11385_v40, %s10651_s4 }
 0x7bd   :  { %3443 = vrot.lane.b32.xlu1 %v11407_v8, %s10651_s4 }
 0x7f7   :  { %v2685_v30 = vpop.permute.xlu1 %2684  ;;  %v2572_v43 = vpop.permute.xlu0 %2571 }
 0x7f8   :  { %9716 = vmatprep.subr.msk.mxu1 %vm674_vm4, %v2572_v43  ;;  %9730 = vmatprep.subr.msk.mxu0 %vm674_vm4, %v2685_v30 }
 0x7f9   :  { %9717 = vmatpush3.xpose.msk.msra.mxu1 %vm674_vm4, %v2572_v43  ;;  %9731 = vmatpush3.xpose.msk.msra.mxu0 %vm674_vm4, %v2685_v30 }
 0x7fb   :  { %v2683_v6 = vpop.permute.xlu1 %2682  ;;  %v2570_v12 = vpop.permute.xlu0 %2569 }
 0x7fc   :  { %9718 = vmatprep.subr.msk.mxu1 %vm674_vm4, %v2570_v12  ;;  %9732 = vmatprep.subr.msk.mxu0 %vm674_vm4, %v2683_v6 }
 0x7fd   :  { %9719 = vmatpush3.xpose.msk.msra.mxu1 %vm674_vm4, %v2570_v12  ;;  %9733 = vmatpush3.xpose.msk.msra.mxu0 %vm674_vm4, %v2683_v6  ;;  %v10637_v12 = vld [vmem:[%s12956_s27 + $0x18] sm:$0xff] }
 0x7ff   :  { %v2681_v51 = vpop.permute.xlu1 %2680  ;;  %v2568_v31 = vpop.permute.xlu0 %2567 }
 0x800   :  { %9720 = vmatprep.subr.msk.mxu1 %vm674_vm4, %v2568_v31  ;;  %9734 = vmatprep.subr.msk.mxu0 %vm674_vm4, %v2681_v51 }
 0x801   :  { %9721 = vmatpush3.xpose.msk.msra.mxu1 %vm674_vm4, %v2568_v31  ;;  %9735 = vmatpush3.xpose.msk.msra.mxu0 %vm674_vm4, %v2681_v51 }
 0x803   :  { %v2679_v13 = vpop.permute.xlu1 %2678  ;;  %v2566_v14 = vpop.permute.xlu0 %2565 }
 0x804   :  { %9722 = vmatprep.subr.msk.mxu1 %vm674_vm4, %v2566_v14  ;;  %9736 = vmatprep.subr.msk.mxu0 %vm674_vm4, %v2679_v13 }
 0x805   :  { %9723 = vmatpush3.xpose.msk.msra.mxu1 %vm674_vm4, %v2566_v14  ;;  %9737 = vmatpush3.xpose.msk.msra.mxu0 %vm674_vm4, %v2679_v13 }
 0x807   :  { %v2911_v15 = vpop.permute.xlu1 %2910  ;;  %v2798_v41 = vpop.permute.xlu0 %2797 }
 0x808   :  { %9725 = vmatmul.mubr.msk.f32.vlgmr.msra.gmra.mxu1 %vm674_vm4, %v11363_v58  ;;  %9739 = vmatmul.mubr.msk.f32.vlgmr.msra.gmra.mxu0 %vm674_vm4, %v11365_v62 }
 0x809   :  { %9744 = vmatprep.subr.msk.mxu1 %vm674_vm4, %v2798_v41  ;;  %9758 = vmatprep.subr.msk.mxu0 %vm674_vm4, %v2911_v15 }
 0x80a   :  { %9727 = vmatprep.mubr.msk.f32.mxu1 %vm674_vm4, %v11377_v37  ;;  %9741 = vmatprep.mubr.msk.f32.mxu0 %vm674_vm4, %v11379_v21 }
 0x80b   :  { %9745 = vmatpush3.xpose.msk.msra.mxu1 %vm674_vm4, %v2798_v41  ;;  %9759 = vmatpush3.xpose.msk.msra.mxu0 %vm674_vm4, %v2911_v15  ;;  %v2909_v2 = vpop.permute.xlu1 %2908  ;;  %v2796_v53 = vpop.permute.xlu0 %2795 }
 0x80c   :  { %9728 = vmatmul.mubr.msk.f32.gmra.mxu1 %vm674_vm4, %v11369_v5  ;;  %9742 = vmatmul.mubr.msk.f32.gmra.mxu0 %vm674_vm4, %v11371_v39 }
 0x80d   :  { %9746 = vmatprep.subr.msk.mxu1 %vm674_vm4, %v2796_v53  ;;  %9760 = vmatprep.subr.msk.mxu0 %vm674_vm4, %v2909_v2 }
 0x80e   :  { %9752 = vmatprep.mubr.msk.f32.mxu1 %vm674_vm4, %v11393_v26  ;;  %9766 = vmatprep.mubr.msk.f32.mxu0 %vm674_vm4, %v11395_v56 }
 0x80f   :  { %9747 = vmatpush3.xpose.msk.msra.mxu1 %vm674_vm4, %v2796_v53  ;;  %9761 = vmatpush3.xpose.msk.msra.mxu0 %vm674_vm4, %v2909_v2  ;;  %v2907_v20 = vpop.permute.xlu1 %2906  ;;  %v2794_v55 = vpop.permute.xlu0 %2793 }
 0x810   :  { %9748 = vmatprep.subr.msk.mxu1 %vm674_vm4, %v2794_v55  ;;  %9762 = vmatprep.subr.msk.mxu0 %vm674_vm4, %v2907_v20 }
 0x813   :  { %9749 = vmatpush3.xpose.msk.msra.mxu1 %vm674_vm4, %v2794_v55  ;;  %9763 = vmatpush3.xpose.msk.msra.mxu0 %vm674_vm4, %v2907_v20  ;;  %v2905_v35 = vpop.permute.xlu1 %2904  ;;  %v2792_v16 = vpop.permute.xlu0 %2791 }
 0x814   :  { %9750 = vmatprep.subr.msk.mxu1 %vm674_vm4, %v2792_v16  ;;  %9764 = vmatprep.subr.msk.mxu0 %vm674_vm4, %v2905_v35 }
 0x817   :  { %9751 = vmatpush3.xpose.msk.msra.mxu1 %vm674_vm4, %v2792_v16  ;;  %9765 = vmatpush3.xpose.msk.msra.mxu0 %vm674_vm4, %v2905_v35  ;;  %v3228_v54 = vpop.permute.xlu1 %3227  ;;  %v3226_v25 = vpop.permute.xlu0 %3225 }
 0x818   :  { %9772 = vmatprep.subr.mxu1 %v3228_v54 }
 0x81a   :  { %9753 = vmatmul.mubr.msk.f32.vlgmr.msra.gmra.mxu1 %vm674_vm4, %v11385_v40  ;;  %9767 = vmatmul.mubr.msk.f32.vlgmr.msra.gmra.mxu0 %vm674_vm4, %v11387_v27  ;;  %v10636_v40 = vld [vmem:[%s12956_s27 + $0x10] sm:$0xff] }
 0x81b   :  { %9755 = vmatprep.mubr.msk.f32.mxu1 %vm674_vm4, %v11407_v8  ;;  %9769 = vmatprep.mubr.msk.f32.mxu0 %vm674_vm4, %v11409_v60  ;;  %v3337_v1 = vpop.permute.xlu1 %3336  ;;  %v3335_v18 = vpop.permute.xlu0 %3334 }
 0x81c   :  { %9773 = vmatpush3.msra.mxu1 %v3228_v54  ;;  %9786 = vmatprep.subr.mxu0 %v3337_v1 }
 0x81d   :  { %9774 = vmatprep.subr.mxu1 %v3226_v25  ;;  %9787 = vmatpush3.msra.mxu0 %v3337_v1 }
 0x81e   :  { %9775 = vmatpush3.msra.mxu1 %v3226_v25  ;;  %9770 = vmatmul.mubr.msk.f32.gmra.mxu0 %vm674_vm4, %v11401_v7 }
 0x81f   :  { %9756 = vmatmul.mubr.msk.f32.gmra.mxu1 %vm674_vm4, %v11399_v57  ;;  %9788 = vmatprep.subr.mxu0 %v3335_v18  ;;  %v3224_v50 = vpop.permute.xlu1 %3223  ;;  %v3333_v28 = vpop.permute.xlu0 %3332 }
 0x820   :  { %9789 = vmatpush3.msra.mxu0 %v3335_v18  ;;  %9776 = vmatprep.subr.mxu1 %v3224_v50 }
 0x821   :  { %9790 = vmatprep.subr.mxu0 %v3333_v28  ;;  %9777 = vmatpush3.msra.mxu1 %v3224_v50 }
 0x822   :  { %9791 = vmatpush3.msra.mxu0 %v3333_v28 }
 0x823   :  { %v3222_v22 = vpop.permute.xlu1 %3221  ;;  %v11505_v24 = vpop.permute.xlu0 %3445 }
 0x824   :  { %9778 = vmatprep.subr.mxu1 %v3222_v22 }
 0x825   :  { %9779 = vmatpush3.msra.mxu1 %v3222_v22 }
 0x826   :  { %9800 = vmatprep.subr.mxu1 %v11505_v24 }
 0x827   :  { %v3331_v3 = vpop.permute.xlu1 %3330  ;;  %v11508_v10 = vpop.permute.xlu0 %3554 }
 0x828   :  { %9792 = vmatprep.subr.mxu0 %v3331_v3 }
 0x829   :  { %9793 = vmatpush3.msra.mxu0 %v3331_v3 }
 0x82a   :  { %9814 = vmatprep.subr.mxu0 %v11508_v10 }
 0x8c8   :  { %v9726_v29 = vpop.f32.mrf.mxu1  ;;  %v9740_v33 = vpop.f32.mrf.mxu0 }
 0x8c9   :  { %v3014_v34 = vmul.f32 0.5, %v9726_v29  ;;  %v3018_v36 = vmul.f32 0.5, %v9740_v33 }
 0x8ca   :  { %v2655_v19 = vpop.f32.mrf.mxu1  ;;  %v2768_v17 = vpop.f32.mrf.mxu0 }
 0x8cb   :  { %v3013_v38 = vmul.f32 0.5, %v2655_v19  ;;  %v11514_v45 = vadd.f32 %v10634_v42, %v3018_v36  ;;  %v11516_v46 = vadd.f32 %v10634_v42, %v3014_v34  ;;  %v3017_v52 = vmul.f32 0.5, %v2768_v17 }
 0x8cc   :  { %v9729_v47 = vpop.f32.mrf.mxu1  ;;  %v9743_v44 = vpop.f32.mrf.mxu0 }
 0x8cd   :  { %v3060_v59 = vsel %vm75_vm1, %v11514_v45, -inf  ;;  %v3048_v48 = vsel %vm75_vm1, %v11516_v46, -inf  ;;  %v11525_v4 = vadd.f32 %v10635_v63, %v3013_v38  ;;  %v3016_v37 = vmul.f32 0.5, %v9729_v47 }
 0x8ce   :  { %v2778_v58 = vpop.f32.mrf.mxu0  ;;  %3061 = vmax.xlane.f32.xlu0 %v3060_v59  ;;  %3049 = vmax.xlane.f32.xlu1 %v3048_v48  ;;  %v2665_v62 = vpop.f32.mrf.mxu1  ;;  %v11534_v7 = vadd.f32 %v10635_v63, %v3017_v52  ;;  %v3020_v43 = vmul.f32 0.5, %v9743_v44 }
 0x8cf   :  { %v3019_v5 = vmul.f32 0.5, %v2778_v58  ;;  %v3015_v39 = vmul.f32 0.5, %v2665_v62  ;;  %v3045_v21 = vsel %vm75_vm1, %v11525_v4, -inf  ;;  %v11545_v51 = vadd.f32 %v10637_v12, %v3016_v37 }
 0x8d0   :  { %v3057_v6 = vsel %vm75_vm1, %v11534_v7, -inf  ;;  %v11549_v13 = vadd.f32 %v10637_v12, %v3020_v43 }
 0x8d1   :  { %v11532_v57 = vadd.f32 %v10636_v40, %v3015_v39  ;;  %v11536_v8 = vadd.f32 %v10636_v40, %v3019_v5  ;;  %v3054_v14 = vsel %vm75_vm1, %v11545_v51, -inf  ;;  %v11591_v39 = vpop.permute.xlu1 %3441 }
 0x8d2   :  { %3046 = vmax.xlane.f32.xlu0 %v3045_v21  ;;  %v3066_v25 = vsel %vm75_vm1, %v11549_v13, -inf }
 0x8d3   :  { %v3051_v30 = vsel %vm75_vm1, %v11532_v57, -inf  ;;  %v3063_v31 = vsel %vm75_vm1, %v11536_v8, -inf }
 0x8d4   :  { %3052 = vmax.xlane.f32.xlu1 %v3051_v30 }
 0x8d5   :  { %v11593_v37 = vpop.permute.xlu1 %3443 }
 0x8d6   :  { %3058 = vmax.xlane.f32.xlu0 %v3057_v6 }
 0x8d8   :  { %3064 = vmax.xlane.f32.xlu1 %v3063_v31 }
 0x8da   :  { %v9768_v15 = vpop.f32.mrf.mxu0  ;;  %v9754_v41 = vpop.f32.mrf.mxu1  ;;  %3055 = vmax.xlane.f32.xlu0 %v3054_v14 }
 0x8db   :  { %v3022_v2 = vmul.f32 0.5, %v9754_v41  ;;  %v3026_v53 = vmul.f32 0.5, %v9768_v15 }
 0x8dc   :  { %v2994_v20 = vpop.f32.mrf.mxu0  ;;  %v2881_v55 = vpop.f32.mrf.mxu1 }
 0x8dd   :  { %v11553_v35 = vadd.f32 %v10634_v42, %v3022_v2  ;;  %v3025_v16 = vmul.f32 0.5, %v2994_v20  ;;  %v3021_v54 = vmul.f32 0.5, %v2881_v55  ;;  %v11559_v28 = vadd.f32 %v10634_v42, %v3026_v53 }
 0x8de   :  { %v9771_v1 = vpop.f32.mrf.mxu0  ;;  %3067 = vmax.xlane.f32.xlu0 %v3066_v25 }
 0x8df   :  { %v11557_v18 = vadd.f32 %v10635_v63, %v3021_v54  ;;  %v9757_v50 = vpop.f32.mrf.mxu1  ;;  %v11561_v22 = vadd.f32 %v10635_v63, %v3025_v16  ;;  %v3072_v34 = vsel %vm75_vm1, %v11553_v35, -inf  ;;  %v3028_v17 = vmul.f32 0.5, %v9771_v1 }
 0x8e0   :  { %v3024_v3 = vmul.f32 0.5, %v9757_v50  ;;  %v3004_v36 = vpop.f32.mrf.mxu0  ;;  %v3084_v38 = vsel %vm75_vm1, %v11559_v28, -inf }
 0x8e1   :  { %v2891_v29 = vpop.f32.mrf.mxu1  ;;  %v3069_v33 = vsel %vm75_vm1, %v11557_v18, -inf  ;;  %v3027_v47 = vmul.f32 0.5, %v3004_v36  ;;  %v3081_v52 = vsel %vm75_vm1, %v11561_v22, -inf  ;;  %v11575_v59 = vadd.f32 %v10637_v12, %v3028_v17 }
 0x8e2   :  { %v3023_v19 = vmul.f32 0.5, %v2891_v29  ;;  %3070 = vmax.xlane.f32.xlu1 %v3069_v33  ;;  %3073 = vmax.xlane.f32.xlu0 %v3072_v34  ;;  %v11569_v42 = vadd.f32 %v10637_v12, %v3024_v3 }
 0x8e3   :  { %v11577_v48 = vadd.f32 %v10636_v40, %v3027_v47  ;;  %v3090_v5 = vsel %vm75_vm1, %v11575_v59, -inf }
 0x8e4   :  { %v11571_v44 = vadd.f32 %v10636_v40, %v3023_v19  ;;  %v3078_v62 = vsel %vm75_vm1, %v11569_v42, -inf }
 0x8e5   :  { %v3087_v63 = vsel %vm75_vm1, %v11577_v48, -inf }
 0x8e6   :  { %3082 = vmax.xlane.f32.xlu1 %v3081_v52  ;;  %3085 = vmax.xlane.f32.xlu0 %v3084_v38  ;;  %v3075_v58 = vsel %vm75_vm1, %v11571_v44, -inf }
 0x8ea   :  { %3076 = vmax.xlane.f32.xlu1 %v3075_v58  ;;  %3079 = vmax.xlane.f32.xlu0 %v3078_v62 }
 0x8ee   :  { %3088 = vmax.xlane.f32.xlu1 %v3087_v63  ;;  %3091 = vmax.xlane.f32.xlu0 %v3090_v5 }
 0x8ff   :  { %3439 = vrot.lane.b32.xlu1 %v11393_v26, %s10651_s4 }
 0x904   :  { %3552 = vrot.lane.b32.xlu0 %v11409_v60, %s10651_s4 }
 0x957   :  { %v3062_v21 = vpop.xlane.xlu0 %3061  ;;  %v3050_v40 = vpop.xlane.xlu1 %3049 }
 0x958   :  { %v3098_v30 = vsub.f32 %v11514_v45, %v3062_v21  ;;  %v3094_v43 = vsub.f32 %v11516_v46, %v3050_v40 }
 0x95a   :  { %v3111_v6 = vmul.f32 1.442695, %v3094_v43  ;;  %v3119_v12 = vmul.f32 1.442695, %v3098_v30 }
 0x95b   :  { %v3047_v31 = vpop.xlane.xlu0 %3046 }
 0x95c   :  { %v3093_v14 = vsub.f32 %v11525_v4, %v3047_v31  ;;  %10410 = vpow2.f32 %v3111_v6 }
 0x95d   :  { %v3053_v26 = vpop.xlane.xlu1 %3052  ;;  %10412 = vpow2.f32 %v3119_v12 }
 0x95e   :  { %v3109_v15 = vmul.f32 1.442695, %v3093_v14  ;;  %v3095_v60 = vsub.f32 %v11532_v57, %v3053_v26 }
 0x95f   :  { %v3059_v41 = vpop.xlane.xlu0 %3058 }
 0x960   :  { %10414 = vpow2.f32 %v3109_v15  ;;  %v3097_v2 = vsub.f32 %v11534_v7, %v3059_v41  ;;  %v3113_v20 = vmul.f32 1.442695, %v3095_v60 }
 0x961   :  { %v3065_v53 = vpop.xlane.xlu1 %3064 }
 0x962   :  { %v3117_v45 = vmul.f32 1.442695, %v3097_v2  ;;  %v3099_v46 = vsub.f32 %v11536_v8, %v3065_v53 }
 0x963   :  { %v3056_v55 = vpop.xlane.xlu0 %3055 }
 0x964   :  { %10416 = vpow2.f32 %v3117_v45  ;;  %v3096_v16 = vsub.f32 %v11545_v51, %v3056_v55  ;;  %v3121_v4 = vmul.f32 1.442695, %v3099_v46 }
 0x965   :  { %10418 = vpow2.f32 %v3113_v20 }
 0x966   :  { %v3115_v54 = vmul.f32 1.442695, %v3096_v16 }
 0x967   :  { %v3068_v25 = vpop.xlane.xlu0 %3067 }
 0x968   :  { %10420 = vpow2.f32 %v3115_v54  ;;  %v3100_v57 = vsub.f32 %v11549_v13, %v3068_v25 }
 0x969   :  { %v11603_v1 = vpop.eup %10410  ;;  %10422 = vpow2.f32 %v3121_v4 }
 0x96a   :  { %v3123_v7 = vmul.f32 1.442695, %v3100_v57  ;;  %v3144_v8 = vsel %vm75_vm1, %v11603_v1, 0.0  ;;  %v11607_v29 = vpop.eup %10412 }
 0x96b   :  { %v3071_v50 = vpop.xlane.xlu1 %3070  ;;  %v3074_v3 = vpop.xlane.xlu0 %3073  ;;  %3145 = vadd.xlane.f32.xlu0 %v3144_v8  ;;  %v3156_v47 = vsel %vm75_vm1, %v11607_v29, 0.0 }
 0x96c   :  { %10424 = vpow2.f32 %v3123_v7  ;;  %v3101_v51 = vsub.f32 %v11557_v18, %v3071_v50  ;;  %v3102_v33 = vsub.f32 %v11553_v35, %v3074_v3 }
 0x96d   :  { %v11611_v34 = vpop.eup %10414 }
 0x96e   :  { %v3125_v13 = vmul.f32 1.442695, %v3101_v51  ;;  %v3127_v36 = vmul.f32 1.442695, %v3102_v33  ;;  %v3141_v19 = vsel %vm75_vm1, %v11611_v34, 0.0 }
 0x96f   :  { %v3083_v17 = vpop.xlane.xlu1 %3082  ;;  %v3086_v38 = vpop.xlane.xlu0 %3085  ;;  %3142 = vadd.xlane.f32.xlu1 %v3141_v19  ;;  %3157 = vadd.xlane.f32.xlu0 %v3156_v47 }
 0x970   :  { %10426 = vpow2.f32 %v3125_v13  ;;  %v3105_v52 = vsub.f32 %v11561_v22, %v3083_v17  ;;  %v3106_v18 = vsub.f32 %v11559_v28, %v3086_v38 }
 0x971   :  { %v11619_v35 = vpop.eup %10416  ;;  %10428 = vpow2.f32 %v3127_v36 }
 0x972   :  { %v3133_v58 = vmul.f32 1.442695, %v3105_v52  ;;  %v3135_v62 = vmul.f32 1.442695, %v3106_v18  ;;  %v3153_v63 = vsel %vm75_vm1, %v11619_v35, 0.0  ;;  %v11623_v5 = vpop.eup %10418 }
 0x973   :  { %v3077_v21 = vpop.xlane.xlu1 %3076  ;;  %v3080_v40 = vpop.xlane.xlu0 %3079  ;;  %3154 = vadd.xlane.f32.xlu1 %v3153_v63  ;;  %v3147_v31 = vsel %vm75_vm1, %v11623_v5, 0.0 }
 0x974   :  { %10430 = vpow2.f32 %v3133_v58  ;;  %v3103_v30 = vsub.f32 %v11571_v44, %v3077_v21  ;;  %v3104_v22 = vsub.f32 %v11569_v42, %v3080_v40 }
 0x975   :  { %v11627_v28 = vpop.eup %10420  ;;  %10432 = vpow2.f32 %v3135_v62 }
 0x976   :  { %v3129_v43 = vmul.f32 1.442695, %v3103_v30  ;;  %v3131_v6 = vmul.f32 1.442695, %v3104_v22  ;;  %v3150_v12 = vsel %vm75_vm1, %v11627_v28, 0.0  ;;  %v11633_v14 = vpop.eup %10422 }
 0x977   :  { %v3089_v26 = vpop.xlane.xlu1 %3088  ;;  %3151 = vadd.xlane.f32.xlu0 %v3150_v12  ;;  %v3092_v15 = vpop.xlane.xlu0 %3091  ;;  %3148 = vadd.xlane.f32.xlu1 %v3147_v31  ;;  %v3159_v20 = vsel %vm75_vm1, %v11633_v14, 0.0 }
 0x978   :  { %10434 = vpow2.f32 %v3129_v43  ;;  %v3107_v42 = vsub.f32 %v11577_v48, %v3089_v26  ;;  %v3108_v44 = vsub.f32 %v11575_v59, %v3092_v15 }
 0x979   :  { %v11637_v60 = vpop.eup %10424  ;;  %10436 = vpow2.f32 %v3131_v6 }
 0x97a   :  { %v3137_v41 = vmul.f32 1.442695, %v3107_v42  ;;  %v3139_v2 = vmul.f32 1.442695, %v3108_v44  ;;  %v3162_v53 = vsel %vm75_vm1, %v11637_v60, 0.0 }
 0x97b   :  { %3163 = vadd.xlane.f32.xlu0 %v3162_v53  ;;  %3160 = vadd.xlane.f32.xlu1 %v3159_v20  ;;  %v3553_v13 = vpop.permute.xlu0 %3552  ;;  %v3440_v36 = vpop.permute.xlu1 %3439 }
 0x97c   :  { %10438 = vpow2.f32 %v3137_v41 }
 0x97d   :  { %v11643_v45 = vpop.eup %10426  ;;  %10440 = vpow2.f32 %v3139_v2 }
 0x97e   :  { %v11645_v48 = vpop.eup %10428  ;;  %v3165_v59 = vsel %vm75_vm1, %v11643_v45, 0.0 }
 0x97f   :  { %v3168_v46 = vsel %vm75_vm1, %v11645_v48, 0.0  ;;  %3166 = vadd.xlane.f32.xlu1 %v3165_v59 }
 0x980   :  { %3169 = vadd.xlane.f32.xlu0 %v3168_v46 }
 0x981   :  { %v11651_v55 = vpop.eup %10430 }
 0x982   :  { %v11653_v16 = vpop.eup %10432  ;;  %v3177_v4 = vsel %vm75_vm1, %v11651_v55, 0.0 }
 0x983   :  { %v3180_v54 = vsel %vm75_vm1, %v11653_v16, 0.0  ;;  %3178 = vadd.xlane.f32.xlu1 %v3177_v4 }
 0x984   :  { %3181 = vadd.xlane.f32.xlu0 %v3180_v54 }
 0x985   :  { %v11659_v25 = vpop.eup %10434 }
 0x986   :  { %v11661_v57 = vpop.eup %10436  ;;  %v3171_v7 = vsel %vm75_vm1, %v11659_v25, 0.0 }
 0x987   :  { %v3174_v50 = vsel %vm75_vm1, %v11661_v57, 0.0  ;;  %3172 = vadd.xlane.f32.xlu1 %v3171_v7 }
 0x988   :  { %3175 = vadd.xlane.f32.xlu0 %v3174_v50 }
 0x989   :  { %v11667_v3 = vpop.eup %10438 }
 0x98a   :  { %v11669_v8 = vpop.eup %10440  ;;  %v3183_v51 = vsel %vm75_vm1, %v11667_v3, 0.0 }
 0x98b   :  { %v3186_v33 = vsel %vm75_vm1, %v11669_v8, 0.0  ;;  %3184 = vadd.xlane.f32.xlu1 %v3183_v51 }
 0x98c   :  { %3187 = vadd.xlane.f32.xlu0 %v3186_v33 }
 0x99c   :  { %3548 = vrot.lane.b32.xlu1 %v11395_v56, %s10651_s4 }
 0x9a2   :  { %3550 = vrot.lane.b32.xlu0 %v11387_v27, %s10651_s4 }
 0x9f4   :  { %v3146_v19 = vpop.xlane.xlu0 %3145 }
 0x9f5   :  { %10442 = vrcp.f32 %v3146_v19 }
 0x9f8   :  { %v3143_v17 = vpop.xlane.xlu1 %3142  ;;  %v3158_v38 = vpop.xlane.xlu0 %3157 }
 0x9f9   :  { %10444 = vrcp.f32 %v3143_v17 }
 0x9fa   :  { %10446 = vrcp.f32 %v3158_v38 }
 0x9fc   :  { %v3155_v47 = vpop.xlane.xlu1 %3154 }
 0x9fd   :  { %10448 = vrcp.f32 %v3155_v47 }
 0xa00   :  { %v3152_v52 = vpop.xlane.xlu0 %3151  ;;  %v3149_v18 = vpop.xlane.xlu1 %3148 }
 0xa01   :  { %10450 = vrcp.f32 %v3152_v52 }
 0xa02   :  { %10452 = vrcp.f32 %v3149_v18  ;;  %v10443_v56 = vpop.eup %10442 }
 0xa03   :  { %v3206_v21 = vmul.f32 %v10443_v56, %v11603_v1 }
 0xa04   :  { %v3164_v58 = vpop.xlane.xlu0 %3163  ;;  %v3161_v62 = vpop.xlane.xlu1 %3160 }
 0xa05   :  { %10454 = vrcp.f32 %v3164_v58 }
 0xa06   :  { %v10445_v63 = vpop.eup %10444  ;;  %10456 = vrcp.f32 %v3161_v62 }
 0xa07   :  { %v3205_v27 = vmul.f32 %v10445_v63, %v11611_v34  ;;  %v10447_v30 = vpop.eup %10446 }
 0xa08   :  { %v3167_v40 = vpop.xlane.xlu1 %3166  ;;  %v3210_v12 = vmul.f32 %v10447_v30, %v11607_v29  ;;  %v8785_v30 = vld [vmem:[%s12955_s23 + $0x88] sm:$0xff] }
 0xa09   :  { %v3170_v22 = vpop.xlane.xlu0 %3169  ;;  %10458 = vrcp.f32 %v3167_v40  ;;  %9780 = vmatprep.mubr.msk.f32.mxu1 %vm75_vm1, %v3205_v27 }
 0xa0a   :  { %v10449_v43 = vpop.eup %10448  ;;  %10460 = vrcp.f32 %v3170_v22  ;;  %9781 = vmatmul.mubr.msk.f32.vlgmr.msra.gmra.mxu1 %vm75_vm1, %v3206_v21  ;;  %v8787_v22 = vld [vmem:[%s12955_s23 + $0x98] sm:$0xff] }
 0xa0b   :  { %9801 = vmatpush3.msra.mxu1 %v11505_v24  ;;  %v3209_v6 = vmul.f32 %v10449_v43, %v11619_v35  ;;  %v8784_v43 = vld [vmem:[%s12955_s23 + $0x80] sm:$0xff] }
 0xa0c   :  { %9802 = vmatprep.subr.mxu1 %v11593_v37  ;;  %v3179_v34 = vpop.xlane.xlu1 %3178 }
 0xa0d   :  { %v3182_v1 = vpop.xlane.xlu0 %3181  ;;  %9803 = vmatpush3.msra.mxu1 %v11593_v37  ;;  %10462 = vrcp.f32 %v3179_v34  ;;  %9794 = vmatprep.mubr.msk.f32.mxu0 %vm75_vm1, %v3209_v6  ;;  %v8786_v6 = vld [vmem:[%s12955_s23 + $0x90] sm:$0xff]  ;;  %v11773_v34 = vld [vmem:[%s12955_s23 + $0xb8] sm:$0xff] }
 0xa0e   :  { %v10451_v31 = vpop.eup %10450  ;;  %10464 = vrcp.f32 %v3182_v1  ;;  %9804 = vmatprep.subr.mxu1 %v11591_v39  ;;  %9795 = vmatmul.mubr.msk.f32.vlgmr.msra.gmra.mxu0 %vm75_vm1, %v3210_v12  ;;  %v11768_v12 = vld [vmem:[%s12955_s23 + $0xa8] sm:$0xff] }
 0xa0f   :  { %v10453_v24 = vpop.eup %10452  ;;  %9805 = vmatpush3.msra.mxu1 %v11591_v39  ;;  %9815 = vmatpush3.msra.mxu0 %v11508_v10  ;;  %v3208_v29 = vmul.f32 %v10451_v31, %v11627_v28 }
 0xa10   :  { %9806 = vmatprep.subr.mxu1 %v3440_v36  ;;  %9816 = vmatprep.subr.mxu0 %v3553_v13  ;;  %v3173_v35 = vpop.xlane.xlu1 %3172  ;;  %v3207_v37 = vmul.f32 %v10453_v24, %v11623_v5 }
 0xa11   :  { %v3176_v26 = vpop.xlane.xlu0 %3175  ;;  %9807 = vmatpush3.msra.mxu1 %v3440_v36  ;;  %9817 = vmatpush3.msra.mxu0 %v3553_v13  ;;  %10466 = vrcp.f32 %v3173_v35 }
 0xa12   :  { %v10455_v15 = vpop.eup %10454  ;;  %10468 = vrcp.f32 %v3176_v26  ;;  %9783 = vmatprep.mubr.msk.f32.mxu1 %vm75_vm1, %v3207_v37 }
 0xa13   :  { %v10457_v42 = vpop.eup %10456  ;;  %9784 = vmatmul.mubr.msk.f32.gmra.mxu1 %vm75_vm1, %v3208_v29  ;;  %v3212_v10 = vmul.f32 %v10455_v15, %v11637_v60 }
 0xa14   :  { %v3185_v39 = vpop.xlane.xlu1 %3184  ;;  %v3211_v28 = vmul.f32 %v10457_v42, %v11633_v14 }
 0xa15   :  { %v3188_v44 = vpop.xlane.xlu0 %3187  ;;  %10470 = vrcp.f32 %v3185_v39 }
 0xa16   :  { %v10459_v41 = vpop.eup %10458  ;;  %10472 = vrcp.f32 %v3188_v44  ;;  %9797 = vmatprep.mubr.msk.f32.mxu0 %vm75_vm1, %v3211_v28 }
 0xa17   :  { %v10461_v5 = vpop.eup %10460  ;;  %9798 = vmatmul.mubr.msk.f32.gmra.mxu0 %vm75_vm1, %v3212_v10  ;;  %v3213_v2 = vmul.f32 %v10459_v41, %v11643_v45 }
 0xa18   :  { %v3214_v53 = vmul.f32 %v10461_v5, %v11645_v48  ;;  %v3549_v59 = vpop.permute.xlu1 %3548 }
 0xa19   :  { %v3551_v20 = vpop.permute.xlu0 %3550  ;;  %9808 = vmatprep.mubr.msk.f32.mxu1 %vm75_vm1, %v3213_v2 }
 0xa1a   :  { %v10463_v60 = vpop.eup %10462  ;;  %9818 = vmatprep.subr.mxu0 %v3551_v20  ;;  %9809 = vmatmul.mubr.msk.f32.vlgmr.msra.gmra.mxu1 %vm75_vm1, %v3214_v53 }
 0xa1b   :  { %v10465_v14 = vpop.eup %10464  ;;  %9819 = vmatpush3.msra.mxu0 %v3551_v20  ;;  %v3217_v46 = vmul.f32 %v10463_v60, %v11651_v55 }
 0xa1c   :  { %v3218_v4 = vmul.f32 %v10465_v14, %v11653_v16  ;;  %9820 = vmatprep.subr.mxu0 %v3549_v59 }
 0xa1d   :  { %9821 = vmatpush3.msra.mxu0 %v3549_v59  ;;  %9822 = vmatprep.mubr.msk.f32.mxu0 %vm75_vm1, %v3217_v46 }
 0xa1e   :  { %v10467_v45 = vpop.eup %10466  ;;  %9823 = vmatmul.mubr.msk.f32.vlgmr.msra.gmra.mxu0 %vm75_vm1, %v3218_v4 }
 0xa1f   :  { %v10469_v48 = vpop.eup %10468  ;;  %v3215_v54 = vmul.f32 %v10467_v45, %v11659_v25  ;;  %v8760_v25 = vld [vmem:[%s12924_s6 + $0x10] sm:$0xf] }
 0xa20   :  { %v3216_v7 = vmul.f32 %v10469_v48, %v11661_v57  ;;  %9828 = vmatprep.subr.msk.mxu1 %vm1775_vm5, %v8760_v25  ;;  %v8761_v57 = vld [vmem:[%s12924_s6 + $0x14] sm:$0xf] }
 0xa21   :  { %9811 = vmatprep.mubr.msk.f32.mxu1 %vm75_vm1, %v3215_v54  ;;  %9829 = vmatpush3.msk.msra.mxu1 %vm1775_vm5, %v8760_v25 }
 0xa22   :  { %v10471_v50 = vpop.eup %10470  ;;  %9812 = vmatmul.mubr.msk.f32.gmra.mxu1 %vm75_vm1, %v3216_v7  ;;  %9836 = vmatprep.subr.msk.mxu0 %vm1775_vm5, %v8761_v57 }
 0xa23   :  { %v10473_v55 = vpop.eup %10472  ;;  %v3219_v16 = vmul.f32 %v10471_v50, %v11667_v3  ;;  %9837 = vmatpush3.msk.msra.mxu0 %vm1775_vm5, %v8761_v57  ;;  %v8762_v3 = vld [vmem:[%s12924_s6 + $0x18] sm:$0xf] }
 0xa24   :  { %v3220_v51 = vmul.f32 %v10473_v55, %v11669_v8  ;;  %9844 = vmatprep.subr.msk.mxu1 %vm1775_vm5, %v8762_v3  ;;  %v8763_v8 = vld [vmem:[%s12924_s6 + $0x1c] sm:$0xf] }
 0xa25   :  { %9825 = vmatprep.mubr.msk.f32.mxu0 %vm75_vm1, %v3219_v16  ;;  %9852 = vmatprep.subr.msk.mxu0 %vm1775_vm5, %v8763_v8 }
 0xa26   :  { %9826 = vmatmul.mubr.msk.f32.gmra.mxu0 %vm75_vm1, %v3220_v51 }
 0xaca   :  { %v9782_v33 = vpop.f32.mrf.mxu1 }
 0xacc   :  { %v3311_v13 = vpop.f32.mrf.mxu1 }
 0xacd   :  { %9830 = vmatprep.mubr.msk.f32.mxu1 %vm674_vm4, %v3311_v13 }
 0xace   :  { %v9796_v36 = vpop.f32.mrf.mxu0  ;;  %9831 = vmatmul.mubr.msk.f32.vlgmr.msra.gmra.mxu1 %vm674_vm4, %v9782_v33 }
 0xacf   :  { %9845 = vmatpush3.msk.msra.mxu1 %vm1775_vm5, %v8762_v3 }
 0xad0   :  { %v3420_v19 = vpop.f32.mrf.mxu0  ;;  %9860 = vmatprep.subr.mxu1 %v8785_v30 }
 0xad1   :  { %9838 = vmatprep.mubr.msk.f32.mxu0 %vm674_vm4, %v3420_v19 }
 0xad2   :  { %9839 = vmatmul.mubr.msk.f32.vlgmr.msra.gmra.mxu0 %vm674_vm4, %v9796_v36 }
 0xad3   :  { %v9785_v17 = vpop.f32.mrf.mxu1  ;;  %9853 = vmatpush3.msk.msra.mxu0 %vm1775_vm5, %v8763_v8 }
 0xad4   :  { %9870 = vmatprep.subr.mxu0 %v8787_v22 }
 0xad5   :  { %v3321_v38 = vpop.f32.mrf.mxu1 }
 0xad6   :  { %9833 = vmatprep.mubr.msk.f32.mxu1 %vm674_vm4, %v3321_v38 }
 0xad7   :  { %v9799_v47 = vpop.f32.mrf.mxu0  ;;  %9834 = vmatmul.mubr.msk.f32.gmra.mxu1 %vm674_vm4, %v9785_v17 }
 0xad9   :  { %v3430_v52 = vpop.f32.mrf.mxu0 }
 0xada   :  { %9841 = vmatprep.mubr.msk.f32.mxu0 %vm674_vm4, %v3430_v52  ;;  %v9810_v18 = vpop.f32.mrf.mxu1 }
 0xadb   :  { %9842 = vmatmul.mubr.msk.f32.gmra.mxu0 %vm674_vm4, %v9799_v47 }
 0xadc   :  { %v3529_v58 = vpop.f32.mrf.mxu1 }
 0xadd   :  { %9846 = vmatprep.mubr.msk.f32.mxu1 %vm674_vm4, %v3529_v58 }
 0xade   :  { %v9824_v62 = vpop.f32.mrf.mxu0  ;;  %9847 = vmatmul.mubr.msk.f32.vlgmr.msra.gmra.mxu1 %vm674_vm4, %v9810_v18 }
 0xadf   :  { %9861 = vmatpush3.msra.mxu1 %v8785_v30 }
 0xae0   :  { %v3638_v56 = vpop.f32.mrf.mxu0  ;;  %9862 = vmatprep.subr.mxu1 %v8784_v43 }
 0xae1   :  { %9854 = vmatprep.mubr.msk.f32.mxu0 %vm674_vm4, %v3638_v56  ;;  %9863 = vmatpush3.msra.mxu1 %v8784_v43 }
 0xae2   :  { %v9813_v63 = vpop.f32.mrf.mxu1  ;;  %9855 = vmatmul.mubr.msk.f32.vlgmr.msra.gmra.mxu0 %vm674_vm4, %v9824_v62  ;;  %9880 = vmatprep.subr.mxu1 %v11768_v12 }
 0xae3   :  { %9871 = vmatpush3.msra.mxu0 %v8787_v22 }
 0xae4   :  { %v3539_v27 = vpop.f32.mrf.mxu1  ;;  %9872 = vmatprep.subr.mxu0 %v8786_v6 }
 0xae5   :  { %9849 = vmatprep.mubr.msk.f32.mxu1 %vm674_vm4, %v3539_v27  ;;  %9873 = vmatpush3.msra.mxu0 %v8786_v6  ;;  %v8788_v27 = vld [vmem:[%s12955_s23 + $0xa0] sm:$0xff] }
 0xae6   :  { %v9827_v21 = vpop.f32.mrf.mxu0  ;;  %9850 = vmatmul.mubr.msk.f32.gmra.mxu1 %vm674_vm4, %v9813_v63  ;;  %9890 = vmatprep.subr.mxu0 %v11773_v34 }
 0xae8   :  { %v3648_v40 = vpop.f32.mrf.mxu0 }
 0xae9   :  { %9857 = vmatprep.mubr.msk.f32.mxu0 %vm674_vm4, %v3648_v40 }
 0xaea   :  { %9858 = vmatmul.mubr.msk.f32.gmra.mxu0 %vm674_vm4, %v9827_v21 }
 0xb8e   :  { %v9832_v1 = vpop.f32.mrf.mxu1 }
 0xb8f   :  { %v4069_v10 = vsel %vm309_vm3, %v9832_v1, 0.0 }
 0xb90   :  { %v3743_v31 = vpop.f32.mrf.mxu1 }
 0xb91   :  { %v4062_v2 = vsel %vm309_vm3, %v3743_v31, 0.0 }
 0xb92   :  { %v9840_v24 = vpop.f32.mrf.mxu0 }
 0xb93   :  { %v4070_v15 = vsel %vm309_vm3, %v9840_v24, 0.0 }
 0xb94   :  { %v3843_v35 = vpop.f32.mrf.mxu0  ;;  %v4071_v44 = vadd.f32 %v4070_v15, %v4069_v10 }
 0xb95   :  { %v4063_v39 = vsel %vm309_vm3, %v3843_v35, 0.0 }
 0xb96   :  { %v4064_v20 = vadd.f32 %v4063_v39, %v4062_v2 }
 0xb97   :  { %v9835_v29 = vpop.f32.mrf.mxu1 }
 0xb98   :  { %v4083_v55 = vsel %vm309_vm3, %v9835_v29, 0.0 }
 0xb99   :  { %v3753_v37 = vpop.f32.mrf.mxu1 }
 0xb9a   :  { %v4076_v33 = vsel %vm309_vm3, %v3753_v37, 0.0 }
 0xb9b   :  { %v9843_v26 = vpop.f32.mrf.mxu0 }
 0xb9c   :  { %v4084_v48 = vsel %vm309_vm3, %v9843_v26, 0.0 }
 0xb9d   :  { %v3853_v41 = vpop.f32.mrf.mxu0  ;;  %v4085_v57 = vadd.f32 %v4084_v48, %v4083_v55 }
 0xb9e   :  { %v9848_v42 = vpop.f32.mrf.mxu1  ;;  %v4077_v16 = vsel %vm309_vm3, %v3853_v41, 0.0 }
 0xb9f   :  { %v4072_v28 = vsel %vm309_vm3, %v9848_v42, 0.0  ;;  %v4078_v36 = vadd.f32 %v4077_v16, %v4076_v33 }
 0xba0   :  { %v3943_v5 = vpop.f32.mrf.mxu1  ;;  %v4073_v60 = vadd.f32 %v4072_v28, %v4071_v44 }
 0xba1   :  { %v4065_v53 = vsel %vm309_vm3, %v3943_v5, 0.0 }
 0xba2   :  { %v9856_v14 = vpop.f32.mrf.mxu0  ;;  %v4066_v46 = vadd.f32 %v4065_v53, %v4064_v20 }
 0xba3   :  { %v4074_v59 = vsel %vm309_vm3, %v9856_v14, 0.0 }
 0xba4   :  { %v4075_v4 = vadd.f32 %v4074_v59, %v4073_v60  ;;  %v4043_v45 = vpop.f32.mrf.mxu0 }
 0xba5   :  { %v4067_v54 = vsel %vm309_vm3, %v4043_v45, 0.0 }
 0xba6   :  { %v4068_v7 = vadd.f32 %v4067_v54, %v4066_v46  ;;  %v9851_v50 = vpop.f32.mrf.mxu1  ;;  %v4091_v51 = vadd.f32 %v11317_v32, %v4075_v4 }
 0xba7   :  { %v4086_v25 = vsel %vm309_vm3, %v9851_v50, 0.0 }
 0xba8   :  { %v4090_v3 = vadd.f32 %v11315_v61, %v4068_v7  ;;  %v3953_v8 = vpop.f32.mrf.mxu1  ;;  %v4087_v19 = vadd.f32 %v4086_v25, %v4085_v57 }
 0xba9   :  { %v4079_v13 = vsel %vm309_vm3, %v3953_v8, 0.0 }
 0xbaa   :  { %10474 = vtanh.f32 %v4090_v3  ;;  %v9859_v17 = vpop.f32.mrf.mxu0  ;;  %v4080_v47 = vadd.f32 %v4079_v13, %v4078_v36 }
 0xbab   :  { %10476 = vtanh.f32 %v4091_v51  ;;  %v4088_v38 = vsel %vm309_vm3, %v9859_v17, 0.0 }
 0xbac   :  { %v4089_v52 = vadd.f32 %v4088_v38, %v4087_v19  ;;  %v4053_v32 = vpop.f32.mrf.mxu0 }
 0xbad   :  { %v4081_v18 = vsel %vm309_vm3, %v4053_v32, 0.0 }
 0xbae   :  { %v4082_v58 = vadd.f32 %v4081_v18, %v4080_v47  ;;  %v4093_v61 = vadd.f32 %v11337_v23, %v4089_v52  ;;  %v10638_v47 = vld [vmem:[%s12956_s27 + $0x8] sm:$0xff] }
 0xbb0   :  { %v4092_v62 = vadd.f32 %v11335_v49, %v4082_v58  ;;  %v8790_v49 = vld [vmem:[%s12955_s23 + $0xb0] sm:$0xff] }
 0xbb2   :  { %10478 = vtanh.f32 %v4092_v62  ;;  %v10639_v62 = vld [vmem:[%s12956_s27] sm:$0xff] }
 0xbb3   :  { %10480 = vtanh.f32 %v4093_v61 }
 0xbb7   :  { %v11797_v56 = vpop.eup %10474 }
 0xbb8   :  { %v11799_v63 = vpop.eup %10476  ;;  %9864 = vmatprep.mubr.msk.f32.mxu1 %vm309_vm3, %v11797_v56  ;;  %9874 = vmatprep.mubr.msk.f32.mxu0 %vm309_vm3, %v11797_v56 }
 0xbb9   :  { %9865 = vmatmul.mubr.msk.f32.vlgmr.msra.gmra.mxu1 %vm309_vm3, %v11799_v63  ;;  %9875 = vmatmul.mubr.msk.f32.vlgmr.msra.gmra.mxu0 %vm309_vm3, %v11799_v63 }
 0xbba   :  { %9881 = vmatpush3.msra.mxu1 %v11768_v12  ;;  %9891 = vmatpush3.msra.mxu0 %v11773_v34 }
 0xbbb   :  { %9882 = vmatprep.subr.mxu1 %v8788_v27  ;;  %9892 = vmatprep.subr.mxu0 %v8790_v49 }
 0xbbc   :  { %9883 = vmatpush3.msra.mxu1 %v8788_v27  ;;  %9893 = vmatpush3.msra.mxu0 %v8790_v49 }
 0xbbf   :  { %v11817_v23 = vpop.eup %10478 }
 0xbc0   :  { %v11819_v21 = vpop.eup %10480  ;;  %9867 = vmatprep.mubr.msk.f32.mxu1 %vm309_vm3, %v11817_v23  ;;  %9877 = vmatprep.mubr.msk.f32.mxu0 %vm309_vm3, %v11817_v23 }
 0xbc1   :  { %9868 = vmatmul.mubr.msk.f32.gmra.mxu1 %vm309_vm3, %v11819_v21  ;;  %9878 = vmatmul.mubr.msk.f32.gmra.mxu0 %vm309_vm3, %v11819_v21 }
 0xbc2   :  { %9884 = vmatprep.mubr.msk.f32.mxu1 %vm309_vm3, %v11797_v56  ;;  %9894 = vmatprep.mubr.msk.f32.mxu0 %vm309_vm3, %v11797_v56 }
 0xbc5   :  { %9885 = vmatmul.mubr.msk.f32.vlgmr.msra.gmra.mxu1 %vm309_vm3, %v11799_v63  ;;  %9895 = vmatmul.mubr.msk.f32.vlgmr.msra.gmra.mxu0 %vm309_vm3, %v11799_v63 }
 0xbc6   :  { %9887 = vmatprep.mubr.msk.f32.mxu1 %vm309_vm3, %v11817_v23  ;;  %9897 = vmatprep.mubr.msk.f32.mxu0 %vm309_vm3, %v11817_v23 }
 0xbc9   :  { %9888 = vmatmul.mubr.msk.f32.gmra.mxu1 %vm309_vm3, %v11819_v21  ;;  %9898 = vmatmul.mubr.msk.f32.gmra.mxu0 %vm309_vm3, %v11819_v21 }
 0xc79   :  { %v11845_v40 = vpop.f32.mrf.mxu1  ;;  %v11847_v30 = vpop.f32.mrf.mxu0 }
 0xc7b   :  { %v4185_v22 = vpop.f32.mrf.mxu1  ;;  %v4270_v43 = vpop.f32.mrf.mxu0 }
 0xc7c   :  { %9908 = vmatprep.mubr.msk.f32.mxu1 %vm674_vm4, %v4185_v22  ;;  %9922 = vmatprep.mubr.msk.f32.mxu0 %vm674_vm4, %v4270_v43 }
 0xc81   :  { %v11851_v6 = vpop.f32.mrf.mxu1  ;;  %v11853_v12 = vpop.f32.mrf.mxu0 }
 0xc82   :  { %4582 = vrot.lane.b32.xlu1 %v11853_v12, %s10650_s24  ;;  %4469 = vrot.lane.b32.xlu0 %v11851_v6, %s10650_s24 }
 0xc83   :  { %v11859_v34 = vpop.f32.mrf.mxu1  ;;  %v11861_v1 = vpop.f32.mrf.mxu0 }
 0xc85   :  { %v11867_v31 = vpop.f32.mrf.mxu1  ;;  %v11869_v24 = vpop.f32.mrf.mxu0 }
 0xc86   :  { %4580 = vrot.lane.b32.xlu1 %v11861_v1, %s10650_s24  ;;  %4467 = vrot.lane.b32.xlu0 %v11859_v34, %s10650_s24 }
 0xc87   :  { %v11875_v29 = vpop.f32.mrf.mxu1  ;;  %v11877_v35 = vpop.f32.mrf.mxu0 }
 0xc89   :  { %v11881_v37 = vpop.f32.mrf.mxu1  ;;  %v11883_v26 = vpop.f32.mrf.mxu0 }
 0xc8a   :  { %4578 = vrot.lane.b32.xlu1 %v11847_v30, %s10650_s24  ;;  %4465 = vrot.lane.b32.xlu0 %v11845_v40, %s10650_s24 }
 0xc8b   :  { %v11889_v15 = vpop.f32.mrf.mxu1  ;;  %v11891_v42 = vpop.f32.mrf.mxu0 }
 0xc8e   :  { %4576 = vrot.lane.b32.xlu1 %v4270_v43, %s10650_s24  ;;  %4463 = vrot.lane.b32.xlu0 %v4185_v22, %s10650_s24 }
 0xc92   :  { %4808 = vrot.lane.b32.xlu1 %v11883_v26, %s10650_s24  ;;  %4695 = vrot.lane.b32.xlu0 %v11881_v37, %s10650_s24 }
 0xc96   :  { %4806 = vrot.lane.b32.xlu1 %v11891_v42, %s10650_s24  ;;  %4693 = vrot.lane.b32.xlu0 %v11889_v15, %s10650_s24 }
 0xc9a   :  { %4804 = vrot.lane.b32.xlu1 %v11869_v24, %s10650_s24  ;;  %4691 = vrot.lane.b32.xlu0 %v11867_v31, %s10650_s24 }
 0xc9e   :  { %4802 = vrot.lane.b32.xlu1 %v11877_v35, %s10650_s24  ;;  %4689 = vrot.lane.b32.xlu0 %v11875_v29, %s10650_s24 }
 0xca2   :  { %5125 = vrot.lane.b32.xlu1 %v11851_v6, %s10651_s4  ;;  %5123 = vrot.lane.b32.xlu0 %v11859_v34, %s10651_s4 }
 0xca6   :  { %5234 = vrot.lane.b32.xlu1 %v11853_v12, %s10651_s4  ;;  %5232 = vrot.lane.b32.xlu0 %v11861_v1, %s10651_s4 }
 0xcaa   :  { %5121 = vrot.lane.b32.xlu1 %v11845_v40, %s10651_s4  ;;  %5230 = vrot.lane.b32.xlu0 %v11847_v30, %s10651_s4 }
 0xcae   :  { %5119 = vrot.lane.b32.xlu1 %v4185_v22, %s10651_s4  ;;  %5343 = vrot.lane.b32.xlu0 %v11881_v37, %s10651_s4 }
 0xcb2   :  { %5228 = vrot.lane.b32.xlu1 %v4270_v43, %s10651_s4  ;;  %5452 = vrot.lane.b32.xlu0 %v11883_v26, %s10651_s4 }
 0xcb6   :  { %5339 = vrot.lane.b32.xlu1 %v11867_v31, %s10651_s4 }
 0xcba   :  { %5341 = vrot.lane.b32.xlu1 %v11889_v15, %s10651_s4 }
 0xcf4   :  { %v4583_v10 = vpop.permute.xlu1 %4582  ;;  %v4470_v39 = vpop.permute.xlu0 %4469 }
 0xcf5   :  { %9900 = vmatprep.subr.msk.mxu1 %vm674_vm4, %v4470_v39  ;;  %9914 = vmatprep.subr.msk.mxu0 %vm674_vm4, %v4583_v10 }
 0xcf6   :  { %9901 = vmatpush3.xpose.msk.msra.mxu1 %vm674_vm4, %v4470_v39  ;;  %9915 = vmatpush3.xpose.msk.msra.mxu0 %vm674_vm4, %v4583_v10  ;;  %v10641_v39 = vld [vmem:[%s12956_s27 + $0x18] sm:$0xff] }
 0xcf8   :  { %v4581_v28 = vpop.permute.xlu1 %4580  ;;  %v4468_v44 = vpop.permute.xlu0 %4467 }
 0xcf9   :  { %9902 = vmatprep.subr.msk.mxu1 %vm674_vm4, %v4468_v44  ;;  %9916 = vmatprep.subr.msk.mxu0 %vm674_vm4, %v4581_v28 }
 0xcfa   :  { %9903 = vmatpush3.xpose.msk.msra.mxu1 %vm674_vm4, %v4468_v44  ;;  %9917 = vmatpush3.xpose.msk.msra.mxu0 %vm674_vm4, %v4581_v28 }
 0xcfc   :  { %v4579_v41 = vpop.permute.xlu1 %4578  ;;  %v4466_v5 = vpop.permute.xlu0 %4465 }
 0xcfd   :  { %9904 = vmatprep.subr.msk.mxu1 %vm674_vm4, %v4466_v5  ;;  %9918 = vmatprep.subr.msk.mxu0 %vm674_vm4, %v4579_v41 }
 0xcfe   :  { %9905 = vmatpush3.xpose.msk.msra.mxu1 %vm674_vm4, %v4466_v5  ;;  %9919 = vmatpush3.xpose.msk.msra.mxu0 %vm674_vm4, %v4579_v41 }
 0xd00   :  { %v4577_v2 = vpop.permute.xlu1 %4576  ;;  %v4464_v53 = vpop.permute.xlu0 %4463 }
 0xd01   :  { %9906 = vmatprep.subr.msk.mxu1 %vm674_vm4, %v4464_v53  ;;  %9920 = vmatprep.subr.msk.mxu0 %vm674_vm4, %v4577_v2 }
 0xd02   :  { %9907 = vmatpush3.xpose.msk.msra.mxu1 %vm674_vm4, %v4464_v53  ;;  %9921 = vmatpush3.xpose.msk.msra.mxu0 %vm674_vm4, %v4577_v2 }
 0xd04   :  { %v4809_v20 = vpop.permute.xlu1 %4808  ;;  %v4696_v60 = vpop.permute.xlu0 %4695 }
 0xd05   :  { %9909 = vmatmul.mubr.msk.f32.vlgmr.msra.gmra.mxu1 %vm674_vm4, %v11845_v40  ;;  %9923 = vmatmul.mubr.msk.f32.vlgmr.msra.gmra.mxu0 %vm674_vm4, %v11847_v30 }
 0xd06   :  { %9928 = vmatprep.subr.msk.mxu1 %vm674_vm4, %v4696_v60  ;;  %9942 = vmatprep.subr.msk.mxu0 %vm674_vm4, %v4809_v20 }
 0xd07   :  { %9911 = vmatprep.mubr.msk.f32.mxu1 %vm674_vm4, %v11859_v34  ;;  %9925 = vmatprep.mubr.msk.f32.mxu0 %vm674_vm4, %v11861_v1  ;;  %v10640_v34 = vld [vmem:[%s12956_s27 + $0x10] sm:$0xff] }
 0xd08   :  { %9929 = vmatpush3.xpose.msk.msra.mxu1 %vm674_vm4, %v4696_v60  ;;  %9943 = vmatpush3.xpose.msk.msra.mxu0 %vm674_vm4, %v4809_v20  ;;  %v4807_v14 = vpop.permute.xlu1 %4806  ;;  %v4694_v59 = vpop.permute.xlu0 %4693 }
 0xd09   :  { %9912 = vmatmul.mubr.msk.f32.gmra.mxu1 %vm674_vm4, %v11851_v6  ;;  %9926 = vmatmul.mubr.msk.f32.gmra.mxu0 %vm674_vm4, %v11853_v12 }
 0xd0a   :  { %9930 = vmatprep.subr.msk.mxu1 %vm674_vm4, %v4694_v59  ;;  %9944 = vmatprep.subr.msk.mxu0 %vm674_vm4, %v4807_v14 }
 0xd0b   :  { %9936 = vmatprep.mubr.msk.f32.mxu1 %vm674_vm4, %v11875_v29  ;;  %9950 = vmatprep.mubr.msk.f32.mxu0 %vm674_vm4, %v11877_v35 }
 0xd0c   :  { %9931 = vmatpush3.xpose.msk.msra.mxu1 %vm674_vm4, %v4694_v59  ;;  %9945 = vmatpush3.xpose.msk.msra.mxu0 %vm674_vm4, %v4807_v14  ;;  %v4805_v46 = vpop.permute.xlu1 %4804  ;;  %v4692_v4 = vpop.permute.xlu0 %4691 }
 0xd0d   :  { %9932 = vmatprep.subr.msk.mxu1 %vm674_vm4, %v4692_v4  ;;  %9946 = vmatprep.subr.msk.mxu0 %vm674_vm4, %v4805_v46 }
 0xd10   :  { %9933 = vmatpush3.xpose.msk.msra.mxu1 %vm674_vm4, %v4692_v4  ;;  %9947 = vmatpush3.xpose.msk.msra.mxu0 %vm674_vm4, %v4805_v46  ;;  %v4803_v45 = vpop.permute.xlu1 %4802  ;;  %v4690_v48 = vpop.permute.xlu0 %4689 }
 0xd11   :  { %9934 = vmatprep.subr.msk.mxu1 %vm674_vm4, %v4690_v48  ;;  %9948 = vmatprep.subr.msk.mxu0 %vm674_vm4, %v4803_v45 }
 0xd14   :  { %9935 = vmatpush3.xpose.msk.msra.mxu1 %vm674_vm4, %v4690_v48  ;;  %9949 = vmatpush3.xpose.msk.msra.mxu0 %vm674_vm4, %v4803_v45  ;;  %v5126_v54 = vpop.permute.xlu1 %5125  ;;  %v5124_v7 = vpop.permute.xlu0 %5123 }
 0xd15   :  { %9956 = vmatprep.subr.mxu1 %v5126_v54 }
 0xd17   :  { %9937 = vmatmul.mubr.msk.f32.vlgmr.msra.gmra.mxu1 %vm674_vm4, %v11867_v31  ;;  %9951 = vmatmul.mubr.msk.f32.vlgmr.msra.gmra.mxu0 %vm674_vm4, %v11869_v24 }
 0xd18   :  { %9939 = vmatprep.mubr.msk.f32.mxu1 %vm674_vm4, %v11889_v15  ;;  %9953 = vmatprep.mubr.msk.f32.mxu0 %vm674_vm4, %v11891_v42  ;;  %v5235_v50 = vpop.permute.xlu1 %5234  ;;  %v5233_v55 = vpop.permute.xlu0 %5232 }
 0xd19   :  { %9957 = vmatpush3.msra.mxu1 %v5126_v54  ;;  %9970 = vmatprep.subr.mxu0 %v5235_v50 }
 0xd1a   :  { %9958 = vmatprep.subr.mxu1 %v5124_v7  ;;  %9971 = vmatpush3.msra.mxu0 %v5235_v50 }
 0xd1b   :  { %9959 = vmatpush3.msra.mxu1 %v5124_v7  ;;  %9954 = vmatmul.mubr.msk.f32.gmra.mxu0 %vm674_vm4, %v11883_v26 }
 0xd1c   :  { %9940 = vmatmul.mubr.msk.f32.gmra.mxu1 %vm674_vm4, %v11881_v37  ;;  %9972 = vmatprep.subr.mxu0 %v5233_v55  ;;  %v5122_v16 = vpop.permute.xlu1 %5121  ;;  %v5231_v51 = vpop.permute.xlu0 %5230 }
 0xd1d   :  { %9973 = vmatpush3.msra.mxu0 %v5233_v55  ;;  %9960 = vmatprep.subr.mxu1 %v5122_v16 }
 0xd1e   :  { %9974 = vmatprep.subr.mxu0 %v5231_v51  ;;  %9961 = vmatpush3.msra.mxu1 %v5122_v16 }
 0xd1f   :  { %9975 = vmatpush3.msra.mxu0 %v5231_v51 }
 0xd20   :  { %v5120_v25 = vpop.permute.xlu1 %5119  ;;  %v11987_v57 = vpop.permute.xlu0 %5343 }
 0xd21   :  { %9962 = vmatprep.subr.mxu1 %v5120_v25 }
 0xd22   :  { %9963 = vmatpush3.msra.mxu1 %v5120_v25 }
 0xd23   :  { %9984 = vmatprep.subr.mxu1 %v11987_v57 }
 0xd24   :  { %v5229_v3 = vpop.permute.xlu1 %5228  ;;  %v11990_v8 = vpop.permute.xlu0 %5452 }
 0xd25   :  { %9976 = vmatprep.subr.mxu0 %v5229_v3 }
 0xd26   :  { %9977 = vmatpush3.msra.mxu0 %v5229_v3 }
 0xd27   :  { %9998 = vmatprep.subr.mxu0 %v11990_v8 }
 0xdc5   :  { %v9910_v33 = vpop.f32.mrf.mxu1  ;;  %v9924_v13 = vpop.f32.mrf.mxu0 }
 0xdc6   :  { %v4912_v36 = vmul.f32 0.5, %v9910_v33  ;;  %v4916_v19 = vmul.f32 0.5, %v9924_v13 }
 0xdc7   :  { %v4553_v17 = vpop.f32.mrf.mxu1  ;;  %v4666_v38 = vpop.f32.mrf.mxu0 }
 0xdc8   :  { %v11996_v52 = vadd.f32 %v10638_v47, %v4912_v36  ;;  %v11998_v32 = vadd.f32 %v10638_v47, %v4916_v19  ;;  %v4911_v18 = vmul.f32 0.5, %v4553_v17  ;;  %v4915_v49 = vmul.f32 0.5, %v4666_v38 }
 0xdc9   :  { %v9913_v58 = vpop.f32.mrf.mxu1  ;;  %v9927_v61 = vpop.f32.mrf.mxu0 }
 0xdca   :  { %v12003_v27 = vadd.f32 %v10639_v62, %v4911_v18  ;;  %v4958_v30 = vsel %vm75_vm1, %v11998_v32, -inf  ;;  %v4946_v22 = vsel %vm75_vm1, %v11996_v52, -inf  ;;  %v12014_v31 = vadd.f32 %v10639_v62, %v4915_v49 }
 0xdcb   :  { %v4676_v40 = vpop.f32.mrf.mxu0  ;;  %v4563_v43 = vpop.f32.mrf.mxu1  ;;  %4959 = vmax.xlane.f32.xlu0 %v4958_v30  ;;  %4947 = vmax.xlane.f32.xlu1 %v4946_v22  ;;  %v4914_v37 = vmul.f32 0.5, %v9913_v58  ;;  %v4918_v44 = vmul.f32 0.5, %v9927_v61 }
 0xdcc   :  { %v4917_v6 = vmul.f32 0.5, %v4676_v40  ;;  %v4913_v12 = vmul.f32 0.5, %v4563_v43  ;;  %v4943_v26 = vsel %vm75_vm1, %v12003_v27, -inf  ;;  %v4955_v41 = vsel %vm75_vm1, %v12014_v31, -inf }
 0xdcd   :  { %v12025_v28 = vadd.f32 %v10641_v39, %v4914_v37  ;;  %v12031_v2 = vadd.f32 %v10641_v39, %v4918_v44 }
 0xdce   :  { %v12012_v1 = vadd.f32 %v10640_v34, %v4913_v12  ;;  %v12018_v15 = vadd.f32 %v10640_v34, %v4917_v6  ;;  %v12073_v12 = vpop.permute.xlu1 %5339 }
 0xdcf   :  { %4944 = vmax.xlane.f32.xlu0 %v4943_v26  ;;  %v4952_v60 = vsel %vm75_vm1, %v12025_v28, -inf  ;;  %v4964_v50 = vsel %vm75_vm1, %v12031_v2, -inf }
 0xdd0   :  { %v4949_v10 = vsel %vm75_vm1, %v12012_v1, -inf  ;;  %v4961_v5 = vsel %vm75_vm1, %v12018_v15, -inf }
 0xdd1   :  { %4950 = vmax.xlane.f32.xlu1 %v4949_v10 }
 0xdd3   :  { %4956 = vmax.xlane.f32.xlu0 %v4955_v41 }
 0xdd5   :  { %4962 = vmax.xlane.f32.xlu1 %v4961_v5 }
 0xdd7   :  { %v9952_v53 = vpop.f32.mrf.mxu0  ;;  %v9938_v20 = vpop.f32.mrf.mxu1  ;;  %4953 = vmax.xlane.f32.xlu0 %v4952_v60 }
 0xdd8   :  { %v4920_v14 = vmul.f32 0.5, %v9938_v20  ;;  %v4924_v48 = vmul.f32 0.5, %v9952_v53 }
 0xdd9   :  { %v4892_v59 = vpop.f32.mrf.mxu0  ;;  %v4779_v46 = vpop.f32.mrf.mxu1 }
 0xdda   :  { %v4923_v4 = vmul.f32 0.5, %v4892_v59  ;;  %v4919_v45 = vmul.f32 0.5, %v4779_v46  ;;  %v12035_v54 = vadd.f32 %v10638_v47, %v4920_v14  ;;  %v12045_v33 = vadd.f32 %v10638_v47, %v4924_v48 }
 0xddb   :  { %v9955_v7 = vpop.f32.mrf.mxu0  ;;  %4965 = vmax.xlane.f32.xlu0 %v4964_v50 }
 0xddc   :  { %v12039_v55 = vadd.f32 %v10639_v62, %v4919_v45  ;;  %v9941_v16 = vpop.f32.mrf.mxu1  ;;  %v12041_v51 = vadd.f32 %v10639_v62, %v4923_v4  ;;  %v4970_v17 = vsel %vm75_vm1, %v12035_v54, -inf  ;;  %v4926_v62 = vmul.f32 0.5, %v9955_v7 }
 0xddd   :  { %v4922_v13 = vmul.f32 0.5, %v9941_v16  ;;  %v4902_v36 = vpop.f32.mrf.mxu0  ;;  %v4982_v47 = vsel %vm75_vm1, %v12045_v33, -inf }
 0xdde   :  { %v4789_v25 = vpop.f32.mrf.mxu1  ;;  %v4967_v3 = vsel %vm75_vm1, %v12039_v55, -inf  ;;  %v4925_v38 = vmul.f32 0.5, %v4902_v36  ;;  %v4979_v58 = vsel %vm75_vm1, %v12041_v51, -inf  ;;  %v12061_v30 = vadd.f32 %v10641_v39, %v4926_v62 }
 0xddf   :  { %v4921_v19 = vmul.f32 0.5, %v4789_v25  ;;  %4968 = vmax.xlane.f32.xlu1 %v4967_v3  ;;  %4971 = vmax.xlane.f32.xlu0 %v4970_v17  ;;  %v12053_v61 = vadd.f32 %v10641_v39, %v4922_v13 }
 0xde0   :  { %v12057_v49 = vadd.f32 %v10640_v34, %v4925_v38  ;;  %v4988_v6 = vsel %vm75_vm1, %v12061_v30, -inf }
 0xde1   :  { %v12049_v18 = vadd.f32 %v10640_v34, %v4921_v19  ;;  %v4976_v22 = vsel %vm75_vm1, %v12053_v61, -inf  ;;  %v12075_v34 = vpop.permute.xlu1 %5341 }
 0xde2   :  { %v4985_v43 = vsel %vm75_vm1, %v12057_v49, -inf }
 0xde3   :  { %4980 = vmax.xlane.f32.xlu1 %v4979_v58  ;;  %4983 = vmax.xlane.f32.xlu0 %v4982_v47  ;;  %v4973_v40 = vsel %vm75_vm1, %v12049_v18, -inf }
 0xde7   :  { %4974 = vmax.xlane.f32.xlu1 %v4973_v40  ;;  %4977 = vmax.xlane.f32.xlu0 %v4976_v22 }
 0xdeb   :  { %4986 = vmax.xlane.f32.xlu1 %v4985_v43  ;;  %4989 = vmax.xlane.f32.xlu0 %v4988_v6 }
 0xdfc   :  { %5337 = vrot.lane.b32.xlu1 %v11875_v29, %s10651_s4 }
 0xe01   :  { %5450 = vrot.lane.b32.xlu0 %v11891_v42, %s10651_s4 }
 0xe54   :  { %v4960_v37 = vpop.xlane.xlu0 %4959  ;;  %v4948_v26 = vpop.xlane.xlu1 %4947 }
 0xe55   :  { %v4996_v10 = vsub.f32 %v11998_v32, %v4960_v37  ;;  %v4992_v39 = vsub.f32 %v11996_v52, %v4948_v26 }
 0xe57   :  { %v5009_v44 = vmul.f32 1.442695, %v4992_v39  ;;  %v5017_v41 = vmul.f32 1.442695, %v4996_v10 }
 0xe58   :  { %v4945_v5 = vpop.xlane.xlu0 %4944 }
 0xe59   :  { %v4991_v53 = vsub.f32 %v12003_v27, %v4945_v5  ;;  %10482 = vpow2.f32 %v5009_v44 }
 0xe5a   :  { %v4951_v20 = vpop.xlane.xlu1 %4950  ;;  %10484 = vpow2.f32 %v5017_v41 }
 0xe5b   :  { %v5007_v29 = vmul.f32 1.442695, %v4991_v53  ;;  %v4993_v42 = vsub.f32 %v12012_v1, %v4951_v20 }
 0xe5c   :  { %v4957_v60 = vpop.xlane.xlu0 %4956 }
 0xe5d   :  { %10486 = vpow2.f32 %v5007_v29  ;;  %v4995_v14 = vsub.f32 %v12014_v31, %v4957_v60  ;;  %v5011_v46 = vmul.f32 1.442695, %v4993_v42 }
 0xe5e   :  { %v4963_v59 = vpop.xlane.xlu1 %4962 }
 0xe5f   :  { %v5015_v32 = vmul.f32 1.442695, %v4995_v14  ;;  %v4997_v52 = vsub.f32 %v12018_v15, %v4963_v59 }
 0xe60   :  { %v4954_v4 = vpop.xlane.xlu0 %4953 }
 0xe61   :  { %10488 = vpow2.f32 %v5015_v32  ;;  %v4994_v45 = vsub.f32 %v12025_v28, %v4954_v4  ;;  %v5019_v27 = vmul.f32 1.442695, %v4997_v52 }
 0xe62   :  { %10490 = vpow2.f32 %v5011_v46 }
 0xe63   :  { %v5013_v48 = vmul.f32 1.442695, %v4994_v45 }
 0xe64   :  { %v4966_v7 = vpop.xlane.xlu0 %4965 }
 0xe65   :  { %10492 = vpow2.f32 %v5013_v48  ;;  %v4998_v1 = vsub.f32 %v12031_v2, %v4966_v7 }
 0xe66   :  { %v12085_v50 = vpop.eup %10482  ;;  %10494 = vpow2.f32 %v5019_v27 }
 0xe67   :  { %v5021_v31 = vmul.f32 1.442695, %v4998_v1  ;;  %v5042_v15 = vsel %vm75_vm1, %v12085_v50, 0.0  ;;  %v12090_v13 = vpop.eup %10484 }
 0xe68   :  { %v4969_v16 = vpop.xlane.xlu1 %4968  ;;  %v4972_v3 = vpop.xlane.xlu0 %4971  ;;  %5043 = vadd.xlane.f32.xlu0 %v5042_v15  ;;  %v5054_v62 = vsel %vm75_vm1, %v12090_v13, 0.0 }
 0xe69   :  { %v4999_v25 = vsub.f32 %v12039_v55, %v4969_v16  ;;  %10496 = vpow2.f32 %v5021_v31  ;;  %v5000_v28 = vsub.f32 %v12035_v54, %v4972_v3 }
 0xe6a   :  { %v12093_v36 = vpop.eup %10486 }
 0xe6b   :  { %v5023_v2 = vmul.f32 1.442695, %v4999_v25  ;;  %v5025_v19 = vmul.f32 1.442695, %v5000_v28  ;;  %v5039_v38 = vsel %vm75_vm1, %v12093_v36, 0.0 }
 0xe6c   :  { %v4981_v17 = vpop.xlane.xlu1 %4980  ;;  %v4984_v58 = vpop.xlane.xlu0 %4983  ;;  %5040 = vadd.xlane.f32.xlu1 %v5039_v38  ;;  %5055 = vadd.xlane.f32.xlu0 %v5054_v62 }
 0xe6d   :  { %10498 = vpow2.f32 %v5023_v2  ;;  %v5003_v55 = vsub.f32 %v12041_v51, %v4981_v17  ;;  %v5004_v54 = vsub.f32 %v12045_v33, %v4984_v58 }
 0xe6e   :  { %10500 = vpow2.f32 %v5025_v19  ;;  %v12101_v47 = vpop.eup %10488 }
 0xe6f   :  { %v5031_v40 = vmul.f32 1.442695, %v5003_v55  ;;  %v5033_v22 = vmul.f32 1.442695, %v5004_v54  ;;  %v5051_v6 = vsel %vm75_vm1, %v12101_v47, 0.0  ;;  %v12105_v37 = vpop.eup %10490 }
 0xe70   :  { %v4975_v43 = vpop.xlane.xlu1 %4974  ;;  %v4978_v26 = vpop.xlane.xlu0 %4977  ;;  %5052 = vadd.xlane.f32.xlu1 %v5051_v6  ;;  %v5045_v53 = vsel %vm75_vm1, %v12105_v37, 0.0 }
 0xe71   :  { %10502 = vpow2.f32 %v5031_v40  ;;  %v5001_v51 = vsub.f32 %v12049_v18, %v4975_v43  ;;  %v5002_v10 = vsub.f32 %v12053_v61, %v4978_v26 }
 0xe72   :  { %10504 = vpow2.f32 %v5033_v22  ;;  %v12109_v33 = vpop.eup %10492 }
 0xe73   :  { %v5027_v39 = vmul.f32 1.442695, %v5001_v51  ;;  %v5029_v44 = vmul.f32 1.442695, %v5002_v10  ;;  %v5048_v5 = vsel %vm75_vm1, %v12109_v33, 0.0  ;;  %v12115_v20 = vpop.eup %10494 }
 0xe74   :  { %v4987_v41 = vpop.xlane.xlu1 %4986  ;;  %5049 = vadd.xlane.f32.xlu0 %v5048_v5  ;;  %v4990_v29 = vpop.xlane.xlu0 %4989  ;;  %5046 = vadd.xlane.f32.xlu1 %v5045_v53  ;;  %v5057_v46 = vsel %vm75_vm1, %v12115_v20, 0.0 }
 0xe75   :  { %10506 = vpow2.f32 %v5027_v39  ;;  %v5005_v18 = vsub.f32 %v12057_v49, %v4987_v41  ;;  %v5006_v61 = vsub.f32 %v12061_v30, %v4990_v29 }
 0xe76   :  { %10508 = vpow2.f32 %v5029_v44  ;;  %v12119_v42 = vpop.eup %10496 }
 0xe77   :  { %v5035_v60 = vmul.f32 1.442695, %v5005_v18  ;;  %v5037_v14 = vmul.f32 1.442695, %v5006_v61  ;;  %v5060_v59 = vsel %vm75_vm1, %v12119_v42, 0.0 }
 0xe78   :  { %5061 = vadd.xlane.f32.xlu0 %v5060_v59  ;;  %5058 = vadd.xlane.f32.xlu1 %v5057_v46  ;;  %v5451_v2 = vpop.permute.xlu0 %5450  ;;  %v5338_v19 = vpop.permute.xlu1 %5337 }
 0xe79   :  { %10510 = vpow2.f32 %v5035_v60 }
 0xe7a   :  { %v12125_v49 = vpop.eup %10498  ;;  %10512 = vpow2.f32 %v5037_v14 }
 0xe7b   :  { %v12127_v32 = vpop.eup %10500  ;;  %v5063_v52 = vsel %vm75_vm1, %v12125_v49, 0.0 }
 0xe7c   :  { %v5066_v30 = vsel %vm75_vm1, %v12127_v32, 0.0  ;;  %5064 = vadd.xlane.f32.xlu1 %v5063_v52 }
 0xe7d   :  { %5067 = vadd.xlane.f32.xlu0 %v5066_v30 }
 0xe7e   :  { %v12133_v4 = vpop.eup %10502 }
 0xe7f   :  { %v12135_v45 = vpop.eup %10504  ;;  %v5075_v48 = vsel %vm75_vm1, %v12133_v4, 0.0 }
 0xe80   :  { %v5078_v27 = vsel %vm75_vm1, %v12135_v45, 0.0  ;;  %5076 = vadd.xlane.f32.xlu1 %v5075_v48 }
 0xe81   :  { %5079 = vadd.xlane.f32.xlu0 %v5078_v27 }
 0xe82   :  { %v12141_v7 = vpop.eup %10506 }
 0xe83   :  { %v12143_v1 = vpop.eup %10508  ;;  %v5069_v16 = vsel %vm75_vm1, %v12141_v7, 0.0 }
 0xe84   :  { %v5072_v31 = vsel %vm75_vm1, %v12143_v1, 0.0  ;;  %5070 = vadd.xlane.f32.xlu1 %v5069_v16 }
 0xe85   :  { %5073 = vadd.xlane.f32.xlu0 %v5072_v31 }
 0xe86   :  { %v12149_v25 = vpop.eup %10510 }
 0xe87   :  { %v12151_v3 = vpop.eup %10512  ;;  %v5081_v28 = vsel %vm75_vm1, %v12149_v25, 0.0 }
 0xe88   :  { %v5084_v15 = vsel %vm75_vm1, %v12151_v3, 0.0  ;;  %5082 = vadd.xlane.f32.xlu1 %v5081_v28 }
 0xe89   :  { %5085 = vadd.xlane.f32.xlu0 %v5084_v15 }
 0xe99   :  { %5446 = vrot.lane.b32.xlu1 %v11877_v35, %s10651_s4 }
 0xe9f   :  { %5448 = vrot.lane.b32.xlu0 %v11869_v24, %s10651_s4 }
 0xef1   :  { %v5044_v17 = vpop.xlane.xlu0 %5043 }
 0xef2   :  { %10514 = vrcp.f32 %v5044_v17 }
 0xef5   :  { %v5041_v38 = vpop.xlane.xlu1 %5040  ;;  %v5056_v55 = vpop.xlane.xlu0 %5055 }
 0xef6   :  { %10516 = vrcp.f32 %v5041_v38 }
 0xef7   :  { %10518 = vrcp.f32 %v5056_v55 }
 0xef9   :  { %v5053_v58 = vpop.xlane.xlu1 %5052 }
 0xefa   :  { %10520 = vrcp.f32 %v5053_v58 }
 0xefd   :  { %v5050_v62 = vpop.xlane.xlu0 %5049  ;;  %v5047_v54 = vpop.xlane.xlu1 %5046 }
 0xefe   :  { %10522 = vrcp.f32 %v5050_v62 }
 0xeff   :  { %10524 = vrcp.f32 %v5047_v54  ;;  %v10515_v35 = vpop.eup %10514 }
 0xf00   :  { %v5104_v6 = vmul.f32 %v10515_v35, %v12085_v50 }
 0xf01   :  { %v5062_v40 = vpop.xlane.xlu0 %5061  ;;  %v5059_v22 = vpop.xlane.xlu1 %5058 }
 0xf02   :  { %10526 = vrcp.f32 %v5062_v40 }
 0xf03   :  { %v10517_v43 = vpop.eup %10516  ;;  %10528 = vrcp.f32 %v5059_v22 }
 0xf04   :  { %v5103_v24 = vmul.f32 %v10517_v43, %v12093_v36  ;;  %v10519_v10 = vpop.eup %10518 }
 0xf05   :  { %v5065_v26 = vpop.xlane.xlu1 %5064  ;;  %v5108_v41 = vmul.f32 %v10519_v10, %v12090_v13  ;;  %v8883_v10 = vld [vmem:[%s12955_s23 + $0xd8] sm:$0xff] }
 0xf06   :  { %v5068_v51 = vpop.xlane.xlu0 %5067  ;;  %9964 = vmatprep.mubr.msk.f32.mxu1 %vm75_vm1, %v5103_v24 }
 0xf07   :  { %10530 = vrcp.f32 %v5068_v51  ;;  %v10521_v39 = vpop.eup %10520  ;;  %9965 = vmatmul.mubr.msk.f32.vlgmr.msra.gmra.mxu1 %vm75_vm1, %v5104_v6 }
 0xf08   :  { %10532 = vrcp.f32 %v5065_v26  ;;  %9985 = vmatpush3.msra.mxu1 %v11987_v57  ;;  %v5107_v44 = vmul.f32 %v10521_v39, %v12101_v47  ;;  %v8881_v26 = vld [vmem:[%s12955_s23 + $0xc8] sm:$0xff]  ;;  %v8880_v39 = vld [vmem:[%s12955_s23 + $0xc0] sm:$0xff] }
 0xf09   :  { %9986 = vmatprep.subr.mxu1 %v12075_v34  ;;  %v5077_v50 = vpop.xlane.xlu1 %5076 }
 0xf0a   :  { %v5080_v36 = vpop.xlane.xlu0 %5079  ;;  %9987 = vmatpush3.msra.mxu1 %v12075_v34  ;;  %9978 = vmatprep.mubr.msk.f32.mxu0 %vm75_vm1, %v5107_v44  ;;  %v8882_v44 = vld [vmem:[%s12955_s23 + $0xd0] sm:$0xff] }
 0xf0b   :  { %10534 = vrcp.f32 %v5080_v36  ;;  %v10523_v5 = vpop.eup %10522  ;;  %9988 = vmatprep.subr.mxu1 %v12073_v12  ;;  %9979 = vmatmul.mubr.msk.f32.vlgmr.msra.gmra.mxu0 %vm75_vm1, %v5108_v41  ;;  %v12250_v41 = vld [vmem:[%s12955_s23 + $0xe8] sm:$0xff]  ;;  %v12255_v36 = vld [vmem:[%s12955_s23 + $0xf8] sm:$0xff] }
 0xf0c   :  { %10536 = vrcp.f32 %v5077_v50  ;;  %v10525_v57 = vpop.eup %10524  ;;  %9989 = vmatpush3.msra.mxu1 %v12073_v12  ;;  %9999 = vmatpush3.msra.mxu0 %v11990_v8  ;;  %v5106_v13 = vmul.f32 %v10523_v5, %v12109_v33 }
 0xf0d   :  { %9990 = vmatprep.subr.mxu1 %v5338_v19  ;;  %10000 = vmatprep.subr.mxu0 %v5451_v2  ;;  %v5071_v53 = vpop.xlane.xlu1 %5070  ;;  %v5105_v34 = vmul.f32 %v10525_v57, %v12105_v37 }
 0xf0e   :  { %v5074_v47 = vpop.xlane.xlu0 %5073  ;;  %9991 = vmatpush3.msra.mxu1 %v5338_v19  ;;  %10001 = vmatpush3.msra.mxu0 %v5451_v2 }
 0xf0f   :  { %10538 = vrcp.f32 %v5074_v47  ;;  %v10527_v18 = vpop.eup %10526  ;;  %9967 = vmatprep.mubr.msk.f32.mxu1 %vm75_vm1, %v5105_v34 }
 0xf10   :  { %10540 = vrcp.f32 %v5071_v53  ;;  %v10529_v29 = vpop.eup %10528  ;;  %9968 = vmatmul.mubr.msk.f32.gmra.mxu1 %vm75_vm1, %v5106_v13  ;;  %v5110_v8 = vmul.f32 %v10527_v18, %v12119_v42 }
 0xf11   :  { %v5083_v33 = vpop.xlane.xlu1 %5082  ;;  %v5109_v61 = vmul.f32 %v10529_v29, %v12115_v20 }
 0xf12   :  { %v5086_v12 = vpop.xlane.xlu0 %5085 }
 0xf13   :  { %10542 = vrcp.f32 %v5086_v12  ;;  %9981 = vmatprep.mubr.msk.f32.mxu0 %vm75_vm1, %v5109_v61 }
 0xf14   :  { %v10531_v60 = vpop.eup %10530  ;;  %10544 = vrcp.f32 %v5083_v33  ;;  %9982 = vmatmul.mubr.msk.f32.gmra.mxu0 %vm75_vm1, %v5110_v8 }
 0xf15   :  { %v10533_v37 = vpop.eup %10532  ;;  %v5112_v14 = vmul.f32 %v10531_v60, %v12127_v32  ;;  %v5447_v42 = vpop.permute.xlu1 %5446 }
 0xf16   :  { %v5449_v59 = vpop.permute.xlu0 %5448  ;;  %v5111_v46 = vmul.f32 %v10533_v37, %v12125_v49 }
 0xf17   :  { %10002 = vmatprep.subr.mxu0 %v5449_v59 }
 0xf18   :  { %v10535_v30 = vpop.eup %10534  ;;  %9992 = vmatprep.mubr.msk.f32.mxu1 %vm75_vm1, %v5111_v46  ;;  %10003 = vmatpush3.msra.mxu0 %v5449_v59 }
 0xf19   :  { %v10537_v20 = vpop.eup %10536  ;;  %v5116_v52 = vmul.f32 %v10535_v30, %v12135_v45  ;;  %9993 = vmatmul.mubr.msk.f32.vlgmr.msra.gmra.mxu1 %vm75_vm1, %v5112_v14  ;;  %10004 = vmatprep.subr.mxu0 %v5447_v42 }
 0xf1a   :  { %10005 = vmatpush3.msra.mxu0 %v5447_v42  ;;  %v5115_v32 = vmul.f32 %v10537_v20, %v12133_v4 }
 0xf1c   :  { %v10539_v27 = vpop.eup %10538  ;;  %10006 = vmatprep.mubr.msk.f32.mxu0 %vm75_vm1, %v5115_v32 }
 0xf1d   :  { %v10541_v48 = vpop.eup %10540  ;;  %10007 = vmatmul.mubr.msk.f32.vlgmr.msra.gmra.mxu0 %vm75_vm1, %v5116_v52  ;;  %v5114_v49 = vmul.f32 %v10539_v27, %v12143_v1  ;;  %v8856_v1 = vld [vmem:[%s12924_s6 + $0x20] sm:$0xf] }
 0xf1e   :  { %v5113_v31 = vmul.f32 %v10541_v48, %v12141_v7  ;;  %10012 = vmatprep.subr.msk.mxu1 %vm1775_vm5, %v8856_v1  ;;  %v8857_v7 = vld [vmem:[%s12924_s6 + $0x24] sm:$0xf] }
 0xf1f   :  { %10013 = vmatpush3.msk.msra.mxu1 %vm1775_vm5, %v8856_v1  ;;  %10020 = vmatprep.subr.msk.mxu0 %vm1775_vm5, %v8857_v7 }
 0xf20   :  { %v10543_v16 = vpop.eup %10542  ;;  %9995 = vmatprep.mubr.msk.f32.mxu1 %vm75_vm1, %v5113_v31  ;;  %10021 = vmatpush3.msk.msra.mxu0 %vm1775_vm5, %v8857_v7 }
 0xf21   :  { %v10545_v45 = vpop.eup %10544  ;;  %9996 = vmatmul.mubr.msk.f32.gmra.mxu1 %vm75_vm1, %v5114_v49  ;;  %v5118_v15 = vmul.f32 %v10543_v16, %v12151_v3  ;;  %v8859_v3 = vld [vmem:[%s12924_s6 + $0x2c] sm:$0xf] }
 0xf22   :  { %v5117_v4 = vmul.f32 %v10545_v45, %v12149_v25  ;;  %v8858_v25 = vld [vmem:[%s12924_s6 + $0x28] sm:$0xf]  ;;  %10036 = vmatprep.subr.msk.mxu0 %vm1775_vm5, %v8859_v3 }
 0xf23   :  { %10028 = vmatprep.subr.msk.mxu1 %vm1775_vm5, %v8858_v25 }
 0xf24   :  { %10009 = vmatprep.mubr.msk.f32.mxu0 %vm75_vm1, %v5117_v4 }
 0xf25   :  { %10010 = vmatmul.mubr.msk.f32.gmra.mxu0 %vm75_vm1, %v5118_v15 }
 0xfc7   :  { %v9966_v28 = vpop.f32.mrf.mxu1 }
 0xfc9   :  { %v5209_v2 = vpop.f32.mrf.mxu1 }
 0xfca   :  { %10014 = vmatprep.mubr.msk.f32.mxu1 %vm674_vm4, %v5209_v2 }
 0xfcb   :  { %v9980_v19 = vpop.f32.mrf.mxu0  ;;  %10015 = vmatmul.mubr.msk.f32.vlgmr.msra.gmra.mxu1 %vm674_vm4, %v9966_v28 }
 0xfcc   :  { %10029 = vmatpush3.msk.msra.mxu1 %vm1775_vm5, %v8858_v25 }
 0xfcd   :  { %v5318_v17 = vpop.f32.mrf.mxu0  ;;  %10044 = vmatprep.subr.mxu1 %v8881_v26 }
 0xfce   :  { %10022 = vmatprep.mubr.msk.f32.mxu0 %vm674_vm4, %v5318_v17 }
 0xfcf   :  { %10023 = vmatmul.mubr.msk.f32.vlgmr.msra.gmra.mxu0 %vm674_vm4, %v9980_v19 }
 0xfd0   :  { %v9969_v38 = vpop.f32.mrf.mxu1  ;;  %10037 = vmatpush3.msk.msra.mxu0 %vm1775_vm5, %v8859_v3 }
 0xfd1   :  { %10054 = vmatprep.subr.mxu0 %v8883_v10 }
 0xfd2   :  { %v5219_v55 = vpop.f32.mrf.mxu1 }
 0xfd3   :  { %10017 = vmatprep.mubr.msk.f32.mxu1 %vm674_vm4, %v5219_v55 }
 0xfd4   :  { %v9983_v58 = vpop.f32.mrf.mxu0  ;;  %10018 = vmatmul.mubr.msk.f32.gmra.mxu1 %vm674_vm4, %v9969_v38 }
 0xfd6   :  { %v5328_v62 = vpop.f32.mrf.mxu0 }
 0xfd7   :  { %10025 = vmatprep.mubr.msk.f32.mxu0 %vm674_vm4, %v5328_v62 }
 0xfd8   :  { %10026 = vmatmul.mubr.msk.f32.gmra.mxu0 %vm674_vm4, %v9983_v58 }
 0xfd9   :  { %v9994_v54 = vpop.f32.mrf.mxu1 }
 0xfdb   :  { %v5427_v40 = vpop.f32.mrf.mxu1 }
 0xfdc   :  { %10030 = vmatprep.mubr.msk.f32.mxu1 %vm674_vm4, %v5427_v40 }
 0xfdd   :  { %v10008_v22 = vpop.f32.mrf.mxu0  ;;  %10031 = vmatmul.mubr.msk.f32.vlgmr.msra.gmra.mxu1 %vm674_vm4, %v9994_v54 }
 0xfde   :  { %10045 = vmatpush3.msra.mxu1 %v8881_v26 }
 0xfdf   :  { %v5536_v35 = vpop.f32.mrf.mxu0  ;;  %10046 = vmatprep.subr.mxu1 %v8880_v39 }
 0xfe0   :  { %10038 = vmatprep.mubr.msk.f32.mxu0 %vm674_vm4, %v5536_v35  ;;  %10047 = vmatpush3.msra.mxu1 %v8880_v39 }
 0xfe1   :  { %v9997_v43 = vpop.f32.mrf.mxu1  ;;  %10039 = vmatmul.mubr.msk.f32.vlgmr.msra.gmra.mxu0 %vm674_vm4, %v10008_v22  ;;  %10064 = vmatprep.subr.mxu1 %v12250_v41 }
 0xfe2   :  { %10055 = vmatpush3.msra.mxu0 %v8883_v10 }
 0xfe3   :  { %v5437_v24 = vpop.f32.mrf.mxu1  ;;  %10056 = vmatprep.subr.mxu0 %v8882_v44 }
 0xfe4   :  { %10033 = vmatprep.mubr.msk.f32.mxu1 %vm674_vm4, %v5437_v24  ;;  %10057 = vmatpush3.msra.mxu0 %v8882_v44  ;;  %v8884_v24 = vld [vmem:[%s12955_s23 + $0xe0] sm:$0xff] }
 0xfe5   :  { %v10011_v6 = vpop.f32.mrf.mxu0  ;;  %10034 = vmatmul.mubr.msk.f32.gmra.mxu1 %vm674_vm4, %v9997_v43  ;;  %10074 = vmatprep.subr.mxu0 %v12255_v36 }
 0xfe7   :  { %v5546_v51 = vpop.f32.mrf.mxu0 }
 0xfe8   :  { %10041 = vmatprep.mubr.msk.f32.mxu0 %vm674_vm4, %v5546_v51 }
 0xfe9   :  { %10042 = vmatmul.mubr.msk.f32.gmra.mxu0 %vm674_vm4, %v10011_v6 }
0x108b   :  { %v10016_v50 = vpop.f32.mrf.mxu1 }
0x108c   :  { %v5967_v8 = vsel %vm309_vm3, %v10016_v50, 0.0 }
0x108d   :  { %v5641_v5 = vpop.f32.mrf.mxu1 }
0x108e   :  { %v5960_v14 = vsel %vm309_vm3, %v5641_v5, 0.0 }
0x108f   :  { %v10024_v57 = vpop.f32.mrf.mxu0 }
0x1090   :  { %v5968_v18 = vsel %vm309_vm3, %v10024_v57, 0.0 }
0x1091   :  { %v5741_v47 = vpop.f32.mrf.mxu0  ;;  %v5969_v61 = vadd.f32 %v5968_v18, %v5967_v8 }
0x1092   :  { %v5961_v12 = vsel %vm309_vm3, %v5741_v47, 0.0 }
0x1093   :  { %v5962_v46 = vadd.f32 %v5961_v12, %v5960_v14 }
0x1094   :  { %v10019_v13 = vpop.f32.mrf.mxu1 }
0x1095   :  { %v5981_v45 = vsel %vm309_vm3, %v10019_v13, 0.0 }
0x1096   :  { %v5651_v53 = vpop.f32.mrf.mxu1 }
0x1097   :  { %v5974_v28 = vsel %vm309_vm3, %v5651_v53, 0.0 }
0x1098   :  { %v10027_v34 = vpop.f32.mrf.mxu0 }
0x1099   :  { %v5982_v48 = vsel %vm309_vm3, %v10027_v34, 0.0 }
0x109a   :  { %v5751_v60 = vpop.f32.mrf.mxu0  ;;  %v5983_v7 = vadd.f32 %v5982_v48, %v5981_v45 }
0x109b   :  { %v5975_v15 = vsel %vm309_vm3, %v5751_v60, 0.0 }
0x109c   :  { %v5976_v19 = vadd.f32 %v5975_v15, %v5974_v28 }
0x109d   :  { %v10032_v29 = vpop.f32.mrf.mxu1 }
0x109e   :  { %v5970_v33 = vsel %vm309_vm3, %v10032_v29, 0.0 }
0x109f   :  { %v5841_v37 = vpop.f32.mrf.mxu1  ;;  %v5971_v30 = vadd.f32 %v5970_v33, %v5969_v61 }
0x10a0   :  { %v5963_v59 = vsel %vm309_vm3, %v5841_v37, 0.0 }
0x10a1   :  { %v10040_v42 = vpop.f32.mrf.mxu0  ;;  %v5964_v52 = vadd.f32 %v5963_v59, %v5962_v46 }
0x10a2   :  { %v5972_v20 = vsel %vm309_vm3, %v10040_v42, 0.0 }
0x10a3   :  { %v5973_v32 = vadd.f32 %v5972_v20, %v5971_v30  ;;  %v5941_v27 = vpop.f32.mrf.mxu0 }
0x10a4   :  { %v5965_v49 = vsel %vm309_vm3, %v5941_v27, 0.0 }
0x10a5   :  { %v5966_v31 = vadd.f32 %v5965_v49, %v5964_v52  ;;  %v10035_v16 = vpop.f32.mrf.mxu1  ;;  %v5989_v4 = vadd.f32 %v11799_v63, %v5973_v32 }
0x10a6   :  { %v5984_v1 = vsel %vm309_vm3, %v10035_v16, 0.0 }
0x10a7   :  { %v5988_v25 = vadd.f32 %v11797_v56, %v5966_v31  ;;  %v5851_v3 = vpop.f32.mrf.mxu1  ;;  %v5985_v17 = vadd.f32 %v5984_v1, %v5983_v7 }
0x10a8   :  { %v5977_v2 = vsel %vm309_vm3, %v5851_v3, 0.0 }
0x10a9   :  { %10546 = vtanh.f32 %v5988_v25  ;;  %v10043_v38 = vpop.f32.mrf.mxu0  ;;  %v5978_v58 = vadd.f32 %v5977_v2, %v5976_v19 }
0x10aa   :  { %10548 = vtanh.f32 %v5989_v4  ;;  %v5986_v55 = vsel %vm309_vm3, %v10043_v38, 0.0 }
0x10ab   :  { %v5987_v62 = vadd.f32 %v5986_v55, %v5985_v17  ;;  %v5951_v63 = vpop.f32.mrf.mxu0 }
0x10ac   :  { %v5979_v54 = vsel %vm309_vm3, %v5951_v63, 0.0 }
0x10ad   :  { %v5980_v40 = vadd.f32 %v5979_v54, %v5978_v58  ;;  %v5991_v56 = vadd.f32 %v11819_v21, %v5987_v62  ;;  %v10642_v58 = vld [vmem:[%s12956_s27 + $0x8] sm:$0xff] }
0x10af   :  { %v5990_v22 = vadd.f32 %v11817_v23, %v5980_v40  ;;  %v8886_v23 = vld [vmem:[%s12955_s23 + $0xf0] sm:$0xff] }
0x10b1   :  { %10550 = vtanh.f32 %v5990_v22  ;;  %v10643_v22 = vld [vmem:[%s12956_s27] sm:$0xff] }
0x10b2   :  { %10552 = vtanh.f32 %v5991_v56 }
0x10b6   :  { %v12279_v35 = vpop.eup %10546 }
0x10b7   :  { %v12281_v43 = vpop.eup %10548  ;;  %10048 = vmatprep.mubr.msk.f32.mxu1 %vm309_vm3, %v12279_v35  ;;  %10058 = vmatprep.mubr.msk.f32.mxu0 %vm309_vm3, %v12279_v35 }
0x10b8   :  { %10049 = vmatmul.mubr.msk.f32.vlgmr.msra.gmra.mxu1 %vm309_vm3, %v12281_v43  ;;  %10059 = vmatmul.mubr.msk.f32.vlgmr.msra.gmra.mxu0 %vm309_vm3, %v12281_v43 }
0x10b9   :  { %10065 = vmatpush3.msra.mxu1 %v12250_v41  ;;  %10075 = vmatpush3.msra.mxu0 %v12255_v36 }
0x10ba   :  { %10066 = vmatprep.subr.mxu1 %v8884_v24  ;;  %10076 = vmatprep.subr.mxu0 %v8886_v23 }
0x10bb   :  { %10067 = vmatpush3.msra.mxu1 %v8884_v24  ;;  %10077 = vmatpush3.msra.mxu0 %v8886_v23 }
0x10be   :  { %v12299_v21 = vpop.eup %10550 }
0x10bf   :  { %v12301_v6 = vpop.eup %10552  ;;  %10051 = vmatprep.mubr.msk.f32.mxu1 %vm309_vm3, %v12299_v21  ;;  %10061 = vmatprep.mubr.msk.f32.mxu0 %vm309_vm3, %v12299_v21 }
0x10c0   :  { %10052 = vmatmul.mubr.msk.f32.gmra.mxu1 %vm309_vm3, %v12301_v6  ;;  %10062 = vmatmul.mubr.msk.f32.gmra.mxu0 %vm309_vm3, %v12301_v6 }
0x10c1   :  { %10068 = vmatprep.mubr.msk.f32.mxu1 %vm309_vm3, %v12279_v35  ;;  %10078 = vmatprep.mubr.msk.f32.mxu0 %vm309_vm3, %v12279_v35 }
0x10c4   :  { %10069 = vmatmul.mubr.msk.f32.vlgmr.msra.gmra.mxu1 %vm309_vm3, %v12281_v43  ;;  %10079 = vmatmul.mubr.msk.f32.vlgmr.msra.gmra.mxu0 %vm309_vm3, %v12281_v43 }
0x10c5   :  { %10071 = vmatprep.mubr.msk.f32.mxu1 %vm309_vm3, %v12299_v21  ;;  %10081 = vmatprep.mubr.msk.f32.mxu0 %vm309_vm3, %v12299_v21 }
0x10c8   :  { %10072 = vmatmul.mubr.msk.f32.gmra.mxu1 %vm309_vm3, %v12301_v6  ;;  %10082 = vmatmul.mubr.msk.f32.gmra.mxu0 %vm309_vm3, %v12301_v6 }
0x1178   :  { %v12327_v51 = vpop.f32.mrf.mxu1  ;;  %v12329_v26 = vpop.f32.mrf.mxu0 }
0x117a   :  { %v6083_v10 = vpop.f32.mrf.mxu1  ;;  %v6168_v39 = vpop.f32.mrf.mxu0 }
0x117b   :  { %10092 = vmatprep.mubr.msk.f32.mxu1 %vm674_vm4, %v6083_v10  ;;  %10106 = vmatprep.mubr.msk.f32.mxu0 %vm674_vm4, %v6168_v39 }
0x1180   :  { %v12333_v44 = vpop.f32.mrf.mxu1  ;;  %v12335_v41 = vpop.f32.mrf.mxu0 }
0x1181   :  { %6480 = vrot.lane.b32.xlu1 %v12335_v41, %s10650_s24  ;;  %6367 = vrot.lane.b32.xlu0 %v12333_v44, %s10650_s24 }
0x1182   :  { %v12341_v36 = vpop.f32.mrf.mxu1  ;;  %v12343_v50 = vpop.f32.mrf.mxu0 }
0x1184   :  { %v12349_v5 = vpop.f32.mrf.mxu1  ;;  %v12351_v57 = vpop.f32.mrf.mxu0 }
0x1185   :  { %6478 = vrot.lane.b32.xlu1 %v12343_v50, %s10650_s24  ;;  %6365 = vrot.lane.b32.xlu0 %v12341_v36, %s10650_s24 }
0x1186   :  { %v12357_v13 = vpop.f32.mrf.mxu1  ;;  %v12359_v47 = vpop.f32.mrf.mxu0 }
0x1188   :  { %v12363_v53 = vpop.f32.mrf.mxu1  ;;  %v12365_v34 = vpop.f32.mrf.mxu0 }
0x1189   :  { %6476 = vrot.lane.b32.xlu1 %v12329_v26, %s10650_s24  ;;  %6363 = vrot.lane.b32.xlu0 %v12327_v51, %s10650_s24 }
0x118a   :  { %v12371_v18 = vpop.f32.mrf.mxu1  ;;  %v12373_v29 = vpop.f32.mrf.mxu0 }
0x118d   :  { %6474 = vrot.lane.b32.xlu1 %v6168_v39, %s10650_s24  ;;  %6361 = vrot.lane.b32.xlu0 %v6083_v10, %s10650_s24 }
0x1191   :  { %6706 = vrot.lane.b32.xlu1 %v12365_v34, %s10650_s24  ;;  %6593 = vrot.lane.b32.xlu0 %v12363_v53, %s10650_s24 }
0x1195   :  { %6704 = vrot.lane.b32.xlu1 %v12373_v29, %s10650_s24  ;;  %6591 = vrot.lane.b32.xlu0 %v12371_v18, %s10650_s24 }
0x1199   :  { %6702 = vrot.lane.b32.xlu1 %v12351_v57, %s10650_s24  ;;  %6589 = vrot.lane.b32.xlu0 %v12349_v5, %s10650_s24 }
0x119d   :  { %6700 = vrot.lane.b32.xlu1 %v12359_v47, %s10650_s24  ;;  %6587 = vrot.lane.b32.xlu0 %v12357_v13, %s10650_s24 }
0x11a1   :  { %7023 = vrot.lane.b32.xlu1 %v12333_v44, %s10651_s4  ;;  %7021 = vrot.lane.b32.xlu0 %v12341_v36, %s10651_s4 }
0x11a5   :  { %7132 = vrot.lane.b32.xlu1 %v12335_v41, %s10651_s4  ;;  %7130 = vrot.lane.b32.xlu0 %v12343_v50, %s10651_s4 }
0x11a9   :  { %7019 = vrot.lane.b32.xlu1 %v12327_v51, %s10651_s4  ;;  %7128 = vrot.lane.b32.xlu0 %v12329_v26, %s10651_s4 }
0x11ad   :  { %7017 = vrot.lane.b32.xlu1 %v6083_v10, %s10651_s4  ;;  %7241 = vrot.lane.b32.xlu0 %v12363_v53, %s10651_s4 }
0x11b1   :  { %7126 = vrot.lane.b32.xlu1 %v6168_v39, %s10651_s4  ;;  %7350 = vrot.lane.b32.xlu0 %v12365_v34, %s10651_s4 }
0x11b5   :  { %7237 = vrot.lane.b32.xlu1 %v12349_v5, %s10651_s4 }
0x11b9   :  { %7239 = vrot.lane.b32.xlu1 %v12371_v18, %s10651_s4 }
0x11f3   :  { %v6481_v8 = vpop.permute.xlu1 %6480  ;;  %v6368_v12 = vpop.permute.xlu0 %6367 }
0x11f4   :  { %10084 = vmatprep.subr.msk.mxu1 %vm674_vm4, %v6368_v12  ;;  %10098 = vmatprep.subr.msk.mxu0 %vm674_vm4, %v6481_v8 }
0x11f5   :  { %10085 = vmatpush3.xpose.msk.msra.mxu1 %vm674_vm4, %v6368_v12  ;;  %10099 = vmatpush3.xpose.msk.msra.mxu0 %vm674_vm4, %v6481_v8  ;;  %v10645_v12 = vld [vmem:[%s12956_s27 + $0x18] sm:$0xff] }
0x11f7   :  { %v6479_v33 = vpop.permute.xlu1 %6478  ;;  %v6366_v61 = vpop.permute.xlu0 %6365 }
0x11f8   :  { %10086 = vmatprep.subr.msk.mxu1 %vm674_vm4, %v6366_v61  ;;  %10100 = vmatprep.subr.msk.mxu0 %vm674_vm4, %v6479_v33 }
0x11f9   :  { %10087 = vmatpush3.xpose.msk.msra.mxu1 %vm674_vm4, %v6366_v61  ;;  %10101 = vmatpush3.xpose.msk.msra.mxu0 %vm674_vm4, %v6479_v33 }
0x11fb   :  { %v6477_v60 = vpop.permute.xlu1 %6476  ;;  %v6364_v37 = vpop.permute.xlu0 %6363 }
0x11fc   :  { %10088 = vmatprep.subr.msk.mxu1 %vm674_vm4, %v6364_v37  ;;  %10102 = vmatprep.subr.msk.mxu0 %vm674_vm4, %v6477_v60 }
0x11fd   :  { %10089 = vmatpush3.xpose.msk.msra.mxu1 %vm674_vm4, %v6364_v37  ;;  %10103 = vmatpush3.xpose.msk.msra.mxu0 %vm674_vm4, %v6477_v60 }
0x11ff   :  { %v6475_v14 = vpop.permute.xlu1 %6474  ;;  %v6362_v59 = vpop.permute.xlu0 %6361 }
0x1200   :  { %10090 = vmatprep.subr.msk.mxu1 %vm674_vm4, %v6362_v59  ;;  %10104 = vmatprep.subr.msk.mxu0 %vm674_vm4, %v6475_v14 }
0x1201   :  { %10091 = vmatpush3.xpose.msk.msra.mxu1 %vm674_vm4, %v6362_v59  ;;  %10105 = vmatpush3.xpose.msk.msra.mxu0 %vm674_vm4, %v6475_v14 }
0x1203   :  { %v6707_v46 = vpop.permute.xlu1 %6706  ;;  %v6594_v30 = vpop.permute.xlu0 %6593 }
0x1204   :  { %10093 = vmatmul.mubr.msk.f32.vlgmr.msra.gmra.mxu1 %vm674_vm4, %v12327_v51  ;;  %10107 = vmatmul.mubr.msk.f32.vlgmr.msra.gmra.mxu0 %vm674_vm4, %v12329_v26 }
0x1205   :  { %10112 = vmatprep.subr.msk.mxu1 %vm674_vm4, %v6594_v30  ;;  %10126 = vmatprep.subr.msk.mxu0 %vm674_vm4, %v6707_v46 }
0x1206   :  { %10095 = vmatprep.mubr.msk.f32.mxu1 %vm674_vm4, %v12341_v36  ;;  %10109 = vmatprep.mubr.msk.f32.mxu0 %vm674_vm4, %v12343_v50  ;;  %v10644_v36 = vld [vmem:[%s12956_s27 + $0x10] sm:$0xff] }
0x1207   :  { %10113 = vmatpush3.xpose.msk.msra.mxu1 %vm674_vm4, %v6594_v30  ;;  %10127 = vmatpush3.xpose.msk.msra.mxu0 %vm674_vm4, %v6707_v46  ;;  %v6705_v42 = vpop.permute.xlu1 %6704  ;;  %v6592_v20 = vpop.permute.xlu0 %6591 }
0x1208   :  { %10096 = vmatmul.mubr.msk.f32.gmra.mxu1 %vm674_vm4, %v12333_v44  ;;  %10110 = vmatmul.mubr.msk.f32.gmra.mxu0 %vm674_vm4, %v12335_v41 }
0x1209   :  { %10114 = vmatprep.subr.msk.mxu1 %vm674_vm4, %v6592_v20  ;;  %10128 = vmatprep.subr.msk.mxu0 %vm674_vm4, %v6705_v42 }
0x120a   :  { %10120 = vmatprep.mubr.msk.f32.mxu1 %vm674_vm4, %v12357_v13  ;;  %10134 = vmatprep.mubr.msk.f32.mxu0 %vm674_vm4, %v12359_v47 }
0x120b   :  { %10115 = vmatpush3.xpose.msk.msra.mxu1 %vm674_vm4, %v6592_v20  ;;  %10129 = vmatpush3.xpose.msk.msra.mxu0 %vm674_vm4, %v6705_v42  ;;  %v6703_v52 = vpop.permute.xlu1 %6702  ;;  %v6590_v32 = vpop.permute.xlu0 %6589 }
0x120c   :  { %10116 = vmatprep.subr.msk.mxu1 %vm674_vm4, %v6590_v32  ;;  %10130 = vmatprep.subr.msk.mxu0 %vm674_vm4, %v6703_v52 }
0x120f   :  { %10117 = vmatpush3.xpose.msk.msra.mxu1 %vm674_vm4, %v6590_v32  ;;  %10131 = vmatpush3.xpose.msk.msra.mxu0 %vm674_vm4, %v6703_v52  ;;  %v6701_v27 = vpop.permute.xlu1 %6700  ;;  %v6588_v48 = vpop.permute.xlu0 %6587 }
0x1210   :  { %10118 = vmatprep.subr.msk.mxu1 %vm674_vm4, %v6588_v48  ;;  %10132 = vmatprep.subr.msk.mxu0 %vm674_vm4, %v6701_v27 }
0x1213   :  { %10119 = vmatpush3.xpose.msk.msra.mxu1 %vm674_vm4, %v6588_v48  ;;  %10133 = vmatpush3.xpose.msk.msra.mxu0 %vm674_vm4, %v6701_v27  ;;  %v7024_v49 = vpop.permute.xlu1 %7023  ;;  %v7022_v31 = vpop.permute.xlu0 %7021 }
0x1214   :  { %10140 = vmatprep.subr.mxu1 %v7024_v49 }
0x1216   :  { %10121 = vmatmul.mubr.msk.f32.vlgmr.msra.gmra.mxu1 %vm674_vm4, %v12349_v5  ;;  %10135 = vmatmul.mubr.msk.f32.vlgmr.msra.gmra.mxu0 %vm674_vm4, %v12351_v57 }
0x1217   :  { %10123 = vmatprep.mubr.msk.f32.mxu1 %vm674_vm4, %v12371_v18  ;;  %10137 = vmatprep.mubr.msk.f32.mxu0 %vm674_vm4, %v12373_v29  ;;  %v7133_v16 = vpop.permute.xlu1 %7132  ;;  %v7131_v45 = vpop.permute.xlu0 %7130 }
0x1218   :  { %10141 = vmatpush3.msra.mxu1 %v7024_v49  ;;  %10154 = vmatprep.subr.mxu0 %v7133_v16 }
0x1219   :  { %10142 = vmatprep.subr.mxu1 %v7022_v31  ;;  %10155 = vmatpush3.msra.mxu0 %v7133_v16 }
0x121a   :  { %10143 = vmatpush3.msra.mxu1 %v7022_v31  ;;  %10138 = vmatmul.mubr.msk.f32.gmra.mxu0 %vm674_vm4, %v12365_v34 }
0x121b   :  { %10124 = vmatmul.mubr.msk.f32.gmra.mxu1 %vm674_vm4, %v12363_v53  ;;  %10156 = vmatprep.subr.mxu0 %v7131_v45  ;;  %v7020_v15 = vpop.permute.xlu1 %7019  ;;  %v7129_v4 = vpop.permute.xlu0 %7128 }
0x121c   :  { %10157 = vmatpush3.msra.mxu0 %v7131_v45  ;;  %10144 = vmatprep.subr.mxu1 %v7020_v15 }
0x121d   :  { %10158 = vmatprep.subr.mxu0 %v7129_v4  ;;  %10145 = vmatpush3.msra.mxu1 %v7020_v15 }
0x121e   :  { %10159 = vmatpush3.msra.mxu0 %v7129_v4 }
0x121f   :  { %v7018_v1 = vpop.permute.xlu1 %7017  ;;  %v12469_v7 = vpop.permute.xlu0 %7241 }
0x1220   :  { %10146 = vmatprep.subr.mxu1 %v7018_v1 }
0x1221   :  { %10147 = vmatpush3.msra.mxu1 %v7018_v1 }
0x1222   :  { %10168 = vmatprep.subr.mxu1 %v12469_v7 }
0x1223   :  { %v7127_v25 = vpop.permute.xlu1 %7126  ;;  %v12472_v3 = vpop.permute.xlu0 %7350 }
0x1224   :  { %10160 = vmatprep.subr.mxu0 %v7127_v25 }
0x1225   :  { %10161 = vmatpush3.msra.mxu0 %v7127_v25 }
0x1226   :  { %10182 = vmatprep.subr.mxu0 %v12472_v3 }
0x12c4   :  { %v10094_v28 = vpop.f32.mrf.mxu1  ;;  %v10108_v2 = vpop.f32.mrf.mxu0 }
0x12c5   :  { %v6810_v19 = vmul.f32 0.5, %v10094_v28  ;;  %v6814_v17 = vmul.f32 0.5, %v10108_v2 }
0x12c6   :  { %v6451_v38 = vpop.f32.mrf.mxu1  ;;  %v6564_v55 = vpop.f32.mrf.mxu0 }
0x12c7   :  { %v12478_v62 = vadd.f32 %v10642_v58, %v6810_v19  ;;  %v12480_v63 = vadd.f32 %v10642_v58, %v6814_v17  ;;  %v6809_v54 = vmul.f32 0.5, %v6451_v38  ;;  %v6813_v23 = vmul.f32 0.5, %v6564_v55 }
0x12c8   :  { %v10097_v40 = vpop.f32.mrf.mxu1  ;;  %v10111_v56 = vpop.f32.mrf.mxu0 }
0x12c9   :  { %v12485_v24 = vadd.f32 %v10643_v22, %v6809_v54  ;;  %v6856_v26 = vsel %vm75_vm1, %v12480_v63, -inf  ;;  %v6844_v10 = vsel %vm75_vm1, %v12478_v62, -inf  ;;  %v12496_v5 = vadd.f32 %v10643_v22, %v6813_v23 }
0x12ca   :  { %v6574_v51 = vpop.f32.mrf.mxu0  ;;  %v6461_v39 = vpop.f32.mrf.mxu1  ;;  %6857 = vmax.xlane.f32.xlu0 %v6856_v26  ;;  %6845 = vmax.xlane.f32.xlu1 %v6844_v10  ;;  %v6812_v53 = vmul.f32 0.5, %v10097_v40  ;;  %v6816_v61 = vmul.f32 0.5, %v10111_v56 }
0x12cb   :  { %v6815_v44 = vmul.f32 0.5, %v6574_v51  ;;  %v6811_v41 = vmul.f32 0.5, %v6461_v39  ;;  %v6841_v34 = vsel %vm75_vm1, %v12485_v24, -inf  ;;  %v6853_v60 = vsel %vm75_vm1, %v12496_v5, -inf }
0x12cc   :  { %v12507_v33 = vadd.f32 %v10645_v12, %v6812_v53  ;;  %v12513_v14 = vadd.f32 %v10645_v12, %v6816_v61 }
0x12cd   :  { %v12494_v50 = vadd.f32 %v10644_v36, %v6811_v41  ;;  %v12500_v18 = vadd.f32 %v10644_v36, %v6815_v44  ;;  %v12555_v41 = vpop.permute.xlu1 %7237 }
0x12ce   :  { %6842 = vmax.xlane.f32.xlu0 %v6841_v34  ;;  %v6850_v30 = vsel %vm75_vm1, %v12507_v33, -inf  ;;  %v6862_v16 = vsel %vm75_vm1, %v12513_v14, -inf }
0x12cf   :  { %v6847_v8 = vsel %vm75_vm1, %v12494_v50, -inf  ;;  %v6859_v37 = vsel %vm75_vm1, %v12500_v18, -inf }
0x12d0   :  { %6848 = vmax.xlane.f32.xlu1 %v6847_v8 }
0x12d2   :  { %6854 = vmax.xlane.f32.xlu0 %v6853_v60 }
0x12d4   :  { %6860 = vmax.xlane.f32.xlu1 %v6859_v37 }
0x12d6   :  { %v10136_v59 = vpop.f32.mrf.mxu0  ;;  %v10122_v46 = vpop.f32.mrf.mxu1  ;;  %6851 = vmax.xlane.f32.xlu0 %v6850_v30 }
0x12d7   :  { %v6818_v42 = vmul.f32 0.5, %v10122_v46  ;;  %v6822_v48 = vmul.f32 0.5, %v10136_v59 }
0x12d8   :  { %v6790_v20 = vpop.f32.mrf.mxu0  ;;  %v6677_v52 = vpop.f32.mrf.mxu1 }
0x12d9   :  { %v6821_v32 = vmul.f32 0.5, %v6790_v20  ;;  %v6817_v27 = vmul.f32 0.5, %v6677_v52  ;;  %v12517_v49 = vadd.f32 %v10642_v58, %v6818_v42  ;;  %v12527_v28 = vadd.f32 %v10642_v58, %v6822_v48 }
0x12da   :  { %v10139_v31 = vpop.f32.mrf.mxu0  ;;  %6863 = vmax.xlane.f32.xlu0 %v6862_v16 }
0x12db   :  { %v12521_v45 = vadd.f32 %v10643_v22, %v6817_v27  ;;  %v10125_v15 = vpop.f32.mrf.mxu1  ;;  %v12523_v4 = vadd.f32 %v10643_v22, %v6821_v32  ;;  %v6868_v38 = vsel %vm75_vm1, %v12517_v49, -inf  ;;  %v6824_v22 = vmul.f32 0.5, %v10139_v31 }
0x12dc   :  { %v6820_v2 = vmul.f32 0.5, %v10125_v15  ;;  %v6800_v19 = vpop.f32.mrf.mxu0  ;;  %v6880_v58 = vsel %vm75_vm1, %v12527_v28, -inf }
0x12dd   :  { %v6687_v1 = vpop.f32.mrf.mxu1  ;;  %v6865_v25 = vsel %vm75_vm1, %v12521_v45, -inf  ;;  %v6823_v55 = vmul.f32 0.5, %v6800_v19  ;;  %v6877_v40 = vsel %vm75_vm1, %v12523_v4, -inf  ;;  %v12543_v26 = vadd.f32 %v10645_v12, %v6824_v22 }
0x12de   :  { %v6819_v17 = vmul.f32 0.5, %v6687_v1  ;;  %6866 = vmax.xlane.f32.xlu1 %v6865_v25  ;;  %6869 = vmax.xlane.f32.xlu0 %v6868_v38  ;;  %v12535_v56 = vadd.f32 %v10645_v12, %v6820_v2 }
0x12df   :  { %v12539_v23 = vadd.f32 %v10644_v36, %v6823_v55  ;;  %v6886_v44 = vsel %vm75_vm1, %v12543_v26, -inf }
0x12e0   :  { %v12531_v54 = vadd.f32 %v10644_v36, %v6819_v17  ;;  %v6874_v10 = vsel %vm75_vm1, %v12535_v56, -inf  ;;  %v12557_v36 = vpop.permute.xlu1 %7239 }
0x12e1   :  { %v6883_v39 = vsel %vm75_vm1, %v12539_v23, -inf }
0x12e2   :  { %6878 = vmax.xlane.f32.xlu1 %v6877_v40  ;;  %6881 = vmax.xlane.f32.xlu0 %v6880_v58  ;;  %v6871_v51 = vsel %vm75_vm1, %v12531_v54, -inf }
0x12e6   :  { %6872 = vmax.xlane.f32.xlu1 %v6871_v51  ;;  %6875 = vmax.xlane.f32.xlu0 %v6874_v10 }
0x12ea   :  { %6884 = vmax.xlane.f32.xlu1 %v6883_v39  ;;  %6887 = vmax.xlane.f32.xlu0 %v6886_v44 }
0x12fb   :  { %7235 = vrot.lane.b32.xlu1 %v12357_v13, %s10651_s4 }
0x1300   :  { %7348 = vrot.lane.b32.xlu0 %v12373_v29, %s10651_s4 }
0x1353   :  { %v6858_v53 = vpop.xlane.xlu0 %6857  ;;  %v6846_v34 = vpop.xlane.xlu1 %6845 }
0x1354   :  { %v6894_v8 = vsub.f32 %v12480_v63, %v6858_v53  ;;  %v6890_v12 = vsub.f32 %v12478_v62, %v6846_v34 }
0x1356   :  { %v6907_v61 = vmul.f32 1.442695, %v6890_v12  ;;  %v6915_v60 = vmul.f32 1.442695, %v6894_v8 }
0x1357   :  { %v6843_v37 = vpop.xlane.xlu0 %6842 }
0x1358   :  { %v6889_v59 = vsub.f32 %v12485_v24, %v6843_v37  ;;  %10554 = vpow2.f32 %v6907_v61 }
0x1359   :  { %v6849_v46 = vpop.xlane.xlu1 %6848  ;;  %10556 = vpow2.f32 %v6915_v60 }
0x135a   :  { %v6905_v13 = vmul.f32 1.442695, %v6889_v59  ;;  %v6891_v29 = vsub.f32 %v12494_v50, %v6849_v46 }
0x135b   :  { %v6855_v30 = vpop.xlane.xlu0 %6854 }
0x135c   :  { %10558 = vpow2.f32 %v6905_v13  ;;  %v6893_v42 = vsub.f32 %v12496_v5, %v6855_v30  ;;  %v6909_v52 = vmul.f32 1.442695, %v6891_v29 }
0x135d   :  { %v6861_v20 = vpop.xlane.xlu1 %6860 }
0x135e   :  { %v6913_v63 = vmul.f32 1.442695, %v6893_v42  ;;  %v6895_v62 = vsub.f32 %v12500_v18, %v6861_v20 }
0x135f   :  { %v6852_v32 = vpop.xlane.xlu0 %6851 }
0x1360   :  { %10560 = vpow2.f32 %v6913_v63  ;;  %v6892_v27 = vsub.f32 %v12507_v33, %v6852_v32  ;;  %v6917_v24 = vmul.f32 1.442695, %v6895_v62 }
0x1361   :  { %10562 = vpow2.f32 %v6909_v52 }
0x1362   :  { %v6911_v48 = vmul.f32 1.442695, %v6892_v27 }
0x1363   :  { %v6864_v31 = vpop.xlane.xlu0 %6863 }
0x1364   :  { %10564 = vpow2.f32 %v6911_v48  ;;  %v6896_v50 = vsub.f32 %v12513_v14, %v6864_v31 }
0x1365   :  { %v12567_v16 = vpop.eup %10554  ;;  %10566 = vpow2.f32 %v6917_v24 }
0x1366   :  { %v6919_v5 = vmul.f32 1.442695, %v6896_v50  ;;  %v6940_v18 = vsel %vm75_vm1, %v12567_v16, 0.0  ;;  %v12572_v2 = vpop.eup %10556 }
0x1367   :  { %v6867_v15 = vpop.xlane.xlu1 %6866  ;;  %v6870_v25 = vpop.xlane.xlu0 %6869  ;;  %6941 = vadd.xlane.f32.xlu0 %v6940_v18  ;;  %v6952_v22 = vsel %vm75_vm1, %v12572_v2, 0.0 }
0x1368   :  { %v6897_v1 = vsub.f32 %v12521_v45, %v6867_v15  ;;  %10568 = vpow2.f32 %v6919_v5  ;;  %v6898_v33 = vsub.f32 %v12517_v49, %v6870_v25 }
0x1369   :  { %v12575_v19 = vpop.eup %10558 }
0x136a   :  { %v6921_v14 = vmul.f32 1.442695, %v6897_v1  ;;  %v6923_v17 = vmul.f32 1.442695, %v6898_v33  ;;  %v6937_v55 = vsel %vm75_vm1, %v12575_v19, 0.0 }
0x136b   :  { %v6879_v38 = vpop.xlane.xlu1 %6878  ;;  %v6882_v40 = vpop.xlane.xlu0 %6881  ;;  %6938 = vadd.xlane.f32.xlu1 %v6937_v55  ;;  %6953 = vadd.xlane.f32.xlu0 %v6952_v22 }
0x136c   :  { %10570 = vpow2.f32 %v6921_v14  ;;  %v6901_v45 = vsub.f32 %v12523_v4, %v6879_v38  ;;  %v6902_v49 = vsub.f32 %v12527_v28, %v6882_v40  ;;  %v12646_v14 = vld [vmem:[%s12952_s22] sm:$0x3] }
0x136d   :  { %10572 = vpow2.f32 %v6923_v17  ;;  %v12583_v58 = vpop.eup %10560  ;;  %v7898_v17 = vsel %vm7897_vm6, %v12646_v14, -inf }
0x136e   :  { %v6929_v51 = vmul.f32 1.442695, %v6901_v45  ;;  %v6931_v10 = vmul.f32 1.442695, %v6902_v49  ;;  %v6949_v44 = vsel %vm75_vm1, %v12583_v58, 0.0  ;;  %v12587_v53 = vpop.eup %10562 }
0x136f   :  { %v6873_v39 = vpop.xlane.xlu1 %6872  ;;  %v6876_v34 = vpop.xlane.xlu0 %6875  ;;  %6950 = vadd.xlane.f32.xlu1 %v6949_v44  ;;  %v6943_v59 = vsel %vm75_vm1, %v12587_v53, 0.0 }
0x1370   :  { %10574 = vpow2.f32 %v6929_v51  ;;  %v6899_v4 = vsub.f32 %v12531_v54, %v6873_v39  ;;  %v6900_v8 = vsub.f32 %v12535_v56, %v6876_v34 }
0x1371   :  { %10576 = vpow2.f32 %v6931_v10  ;;  %v12591_v28 = vpop.eup %10564 }
0x1372   :  { %v6925_v12 = vmul.f32 1.442695, %v6899_v4  ;;  %v6927_v61 = vmul.f32 1.442695, %v6900_v8  ;;  %v6946_v37 = vsel %vm75_vm1, %v12591_v28, 0.0  ;;  %v12597_v46 = vpop.eup %10566 }
0x1373   :  { %v6885_v60 = vpop.xlane.xlu1 %6884  ;;  %6947 = vadd.xlane.f32.xlu0 %v6946_v37  ;;  %v6888_v13 = vpop.xlane.xlu0 %6887  ;;  %6944 = vadd.xlane.f32.xlu1 %v6943_v59  ;;  %v6955_v52 = vsel %vm75_vm1, %v12597_v46, 0.0 }
0x1374   :  { %10578 = vpow2.f32 %v6925_v12  ;;  %v6903_v54 = vsub.f32 %v12539_v23, %v6885_v60  ;;  %v6904_v56 = vsub.f32 %v12543_v26, %v6888_v13 }
0x1375   :  { %10580 = vpow2.f32 %v6927_v61  ;;  %v12601_v29 = vpop.eup %10568 }
0x1376   :  { %v6933_v30 = vmul.f32 1.442695, %v6903_v54  ;;  %v6935_v42 = vmul.f32 1.442695, %v6904_v56  ;;  %v6958_v20 = vsel %vm75_vm1, %v12601_v29, 0.0 }
0x1377   :  { %6959 = vadd.xlane.f32.xlu0 %v6958_v20  ;;  %6956 = vadd.xlane.f32.xlu1 %v6955_v52  ;;  %v7349_v38 = vpop.permute.xlu0 %7348  ;;  %v7236_v55 = vpop.permute.xlu1 %7235 }
0x1378   :  { %10582 = vpow2.f32 %v6933_v30 }
0x1379   :  { %v12607_v23 = vpop.eup %10570  ;;  %10584 = vpow2.f32 %v6935_v42 }
0x137a   :  { %v12609_v63 = vpop.eup %10572  ;;  %v6961_v62 = vsel %vm75_vm1, %v12607_v23, 0.0 }
0x137b   :  { %v6964_v26 = vsel %vm75_vm1, %v12609_v63, 0.0  ;;  %6962 = vadd.xlane.f32.xlu1 %v6961_v62 }
0x137c   :  { %6965 = vadd.xlane.f32.xlu0 %v6964_v26 }
0x137d   :  { %v12615_v32 = vpop.eup %10574 }
0x137e   :  { %v12617_v27 = vpop.eup %10576  ;;  %v6973_v48 = vsel %vm75_vm1, %v12615_v32, 0.0 }
0x137f   :  { %v6976_v24 = vsel %vm75_vm1, %v12617_v27, 0.0  ;;  %6974 = vadd.xlane.f32.xlu1 %v6973_v48 }
0x1380   :  { %6977 = vadd.xlane.f32.xlu0 %v6976_v24 }
0x1381   :  { %v12623_v31 = vpop.eup %10578 }
0x1382   :  { %v12625_v50 = vpop.eup %10580  ;;  %v6967_v15 = vsel %vm75_vm1, %v12623_v31, 0.0 }
0x1383   :  { %v6970_v5 = vsel %vm75_vm1, %v12625_v50, 0.0  ;;  %6968 = vadd.xlane.f32.xlu1 %v6967_v15 }
0x1384   :  { %6971 = vadd.xlane.f32.xlu0 %v6970_v5 }
0x1385   :  { %v12631_v1 = vpop.eup %10582 }
0x1386   :  { %v12633_v25 = vpop.eup %10584  ;;  %v6979_v33 = vsel %vm75_vm1, %v12631_v1, 0.0 }
0x1387   :  { %v6982_v18 = vsel %vm75_vm1, %v12633_v25, 0.0  ;;  %6980 = vadd.xlane.f32.xlu1 %v6979_v33 }
0x1388   :  { %6983 = vadd.xlane.f32.xlu0 %v6982_v18 }
0x1398   :  { %7344 = vrot.lane.b32.xlu1 %v12359_v47, %s10651_s4 }
0x139e   :  { %7346 = vrot.lane.b32.xlu0 %v12351_v57, %s10651_s4 }
0x13bd   :  { %7899 = vmax.xlane.f32.xlu0 %v7898_v17 }
0x13f0   :  { %v6942_v45 = vpop.xlane.xlu0 %6941 }
0x13f1   :  { %10586 = vrcp.f32 %v6942_v45 }
0x13f4   :  { %v6939_v40 = vpop.xlane.xlu1 %6938  ;;  %v6954_v22 = vpop.xlane.xlu0 %6953 }
0x13f5   :  { %10588 = vrcp.f32 %v6939_v40 }
0x13f6   :  { %10590 = vrcp.f32 %v6954_v22 }
0x13f8   :  { %v6951_v47 = vpop.xlane.xlu1 %6950 }
0x13f9   :  { %10592 = vrcp.f32 %v6951_v47 }
0x13fc   :  { %v6948_v57 = vpop.xlane.xlu0 %6947  ;;  %v6945_v49 = vpop.xlane.xlu1 %6944 }
0x13fd   :  { %10594 = vrcp.f32 %v6948_v57 }
0x13fe   :  { %10596 = vrcp.f32 %v6945_v49  ;;  %v10587_v39 = vpop.eup %10586 }
0x13ff   :  { %v7002_v34 = vmul.f32 %v10587_v39, %v12567_v16 }
0x1400   :  { %v6960_v51 = vpop.xlane.xlu0 %6959  ;;  %v6957_v10 = vpop.xlane.xlu1 %6956 }
0x1401   :  { %10598 = vrcp.f32 %v6960_v51 }
0x1402   :  { %v10589_v44 = vpop.eup %10588  ;;  %10600 = vrcp.f32 %v6957_v10 }
0x1403   :  { %v7001_v4 = vmul.f32 %v10589_v44, %v12575_v19  ;;  %v10591_v61 = vpop.eup %10590 }
0x1404   :  { %v6963_v12 = vpop.xlane.xlu1 %6962  ;;  %v7006_v59 = vmul.f32 %v10591_v61, %v12572_v2 }
0x1405   :  { %v6966_v8 = vpop.xlane.xlu0 %6965  ;;  %10148 = vmatprep.mubr.msk.f32.mxu1 %vm75_vm1, %v7001_v4 }
0x1406   :  { %10602 = vrcp.f32 %v6966_v8  ;;  %v10593_v60 = vpop.eup %10592  ;;  %10149 = vmatmul.mubr.msk.f32.vlgmr.msra.gmra.mxu1 %vm75_vm1, %v7002_v34 }
0x1407   :  { %10604 = vrcp.f32 %v6963_v12  ;;  %10169 = vmatpush3.msra.mxu1 %v12469_v7  ;;  %v7005_v37 = vmul.f32 %v10593_v60, %v12583_v58 }
0x1408   :  { %10170 = vmatprep.subr.mxu1 %v12557_v36  ;;  %v6975_v16 = vpop.xlane.xlu1 %6974 }
0x1409   :  { %v6978_v19 = vpop.xlane.xlu0 %6977  ;;  %10171 = vmatpush3.msra.mxu1 %v12557_v36  ;;  %10162 = vmatprep.mubr.msk.f32.mxu0 %vm75_vm1, %v7005_v37 }
0x140a   :  { %10606 = vrcp.f32 %v6978_v19  ;;  %v10595_v54 = vpop.eup %10594  ;;  %10172 = vmatprep.subr.mxu1 %v12555_v41  ;;  %10163 = vmatmul.mubr.msk.f32.vlgmr.msra.gmra.mxu0 %vm75_vm1, %v7006_v59  ;;  %v7988_v19 = vld [vmem:[%s12925_s7 + $0x8] sm:$0xff] }
0x140b   :  { %10608 = vrcp.f32 %v6975_v16  ;;  %v10597_v7 = vpop.eup %10596  ;;  %10173 = vmatpush3.msra.mxu1 %v12555_v41  ;;  %10183 = vmatpush3.msra.mxu0 %v12472_v3  ;;  %v7004_v2 = vmul.f32 %v10595_v54, %v12591_v28  ;;  %v7987_v16 = vld [vmem:[%s12925_s7] sm:$0xff]  ;;  %s10652_s7 = smov 8  }
0x140c   :  { %10174 = vmatprep.subr.mxu1 %v7236_v55  ;;  %10184 = vmatprep.subr.mxu0 %v7349_v38  ;;  %v6969_v13 = vpop.xlane.xlu1 %6968  ;;  %v7003_v36 = vmul.f32 %v10597_v7, %v12587_v53 }
0x140d   :  { %v6972_v58 = vpop.xlane.xlu0 %6971  ;;  %10175 = vmatpush3.msra.mxu1 %v7236_v55  ;;  %10185 = vmatpush3.msra.mxu0 %v7349_v38  ;;  %v12707_v38 = vand.u32 127, %v153_v9 }
0x140e   :  { %10610 = vrcp.f32 %v6972_v58  ;;  %v10599_v56 = vpop.eup %10598  ;;  %10151 = vmatprep.mubr.msk.f32.mxu1 %vm75_vm1, %v7003_v36  ;;  %8069 = vrot.lane.b32.xlu0 %v12646_v14, %s10652_s7 }
0x140f   :  { %10612 = vrcp.f32 %v6969_v13  ;;  %v10601_v30 = vpop.eup %10600  ;;  %10152 = vmatmul.mubr.msk.f32.gmra.mxu1 %vm75_vm1, %v7004_v2  ;;  %v7008_v3 = vmul.f32 %v10599_v56, %v12601_v29  ;;  %v7896_v45 = vcvt.s32.f32 %v12707_v38 }
0x1410   :  { %v6981_v28 = vpop.xlane.xlu1 %6980  ;;  %v7007_v42 = vmul.f32 %v10601_v30, %v12597_v46 }
0x1411   :  { %v6984_v41 = vpop.xlane.xlu0 %6983 }
0x1412   :  { %10614 = vrcp.f32 %v6984_v41  ;;  %10165 = vmatprep.mubr.msk.f32.mxu0 %vm75_vm1, %v7007_v42 }
0x1413   :  { %v10603_v20 = vpop.eup %10602  ;;  %10616 = vrcp.f32 %v6981_v28  ;;  %10166 = vmatmul.mubr.msk.f32.gmra.mxu0 %vm75_vm1, %v7008_v3 }
0x1414   :  { %v10605_v53 = vpop.eup %10604  ;;  %v7010_v52 = vmul.f32 %v10603_v20, %v12609_v63  ;;  %v7345_v29 = vpop.permute.xlu1 %7344 }
0x1415   :  { %v7347_v26 = vpop.permute.xlu0 %7346  ;;  %v7009_v62 = vmul.f32 %v10605_v53, %v12607_v23 }
0x1416   :  { %10186 = vmatprep.subr.mxu0 %v7347_v26 }
0x1417   :  { %v10607_v24 = vpop.eup %10606  ;;  %10176 = vmatprep.mubr.msk.f32.mxu1 %vm75_vm1, %v7009_v62  ;;  %10187 = vmatpush3.msra.mxu0 %v7347_v26 }
0x1418   :  { %v10609_v46 = vpop.eup %10608  ;;  %v7014_v48 = vmul.f32 %v10607_v24, %v12617_v27  ;;  %10177 = vmatmul.mubr.msk.f32.vlgmr.msra.gmra.mxu1 %vm75_vm1, %v7010_v52  ;;  %10188 = vmatprep.subr.mxu0 %v7345_v29 }
0x1419   :  { %10189 = vmatpush3.msra.mxu0 %v7345_v29  ;;  %v7013_v63 = vmul.f32 %v10609_v46, %v12615_v32 }
0x141b   :  { %v10611_v5 = vpop.eup %10610  ;;  %10190 = vmatprep.mubr.msk.f32.mxu0 %vm75_vm1, %v7013_v63 }
0x141c   :  { %v10613_v15 = vpop.eup %10612  ;;  %10191 = vmatmul.mubr.msk.f32.vlgmr.msra.gmra.mxu0 %vm75_vm1, %v7014_v48  ;;  %v7012_v23 = vmul.f32 %v10611_v5, %v12625_v50  ;;  %v8952_v50 = vld [vmem:[%s12924_s6 + $0x30] sm:$0xf] }
0x141d   :  { %v7011_v18 = vmul.f32 %v10613_v15, %v12623_v31  ;;  %10196 = vmatprep.subr.msk.mxu1 %vm1775_vm5, %v8952_v50  ;;  %v8953_v31 = vld [vmem:[%s12924_s6 + $0x34] sm:$0xf] }
0x141e   :  { %10197 = vmatpush3.msk.msra.mxu1 %vm1775_vm5, %v8952_v50  ;;  %10204 = vmatprep.subr.msk.mxu0 %vm1775_vm5, %v8953_v31 }
0x141f   :  { %v10615_v33 = vpop.eup %10614  ;;  %10179 = vmatprep.mubr.msk.f32.mxu1 %vm75_vm1, %v7011_v18  ;;  %10205 = vmatpush3.msk.msra.mxu0 %vm1775_vm5, %v8953_v31 }
0x1420   :  { %v10617_v27 = vpop.eup %10616  ;;  %10180 = vmatmul.mubr.msk.f32.gmra.mxu1 %vm75_vm1, %v7012_v23  ;;  %v7016_v17 = vmul.f32 %v10615_v33, %v12633_v25  ;;  %v8955_v25 = vld [vmem:[%s12924_s6 + $0x3c] sm:$0xf] }
0x1421   :  { %v7015_v32 = vmul.f32 %v10617_v27, %v12631_v1  ;;  %v8954_v1 = vld [vmem:[%s12924_s6 + $0x38] sm:$0xf]  ;;  %10220 = vmatprep.subr.msk.mxu0 %vm1775_vm5, %v8955_v25 }
0x1422   :  { %10212 = vmatprep.subr.msk.mxu1 %vm1775_vm5, %v8954_v1 }
0x1423   :  { %10193 = vmatprep.mubr.msk.f32.mxu0 %vm75_vm1, %v7015_v32 }
0x1424   :  { %10194 = vmatmul.mubr.msk.f32.gmra.mxu0 %vm75_vm1, %v7016_v17 }
0x1446   :  { %v7900_v55 = vpop.xlane.xlu0 %7899 }
0x1447   :  { %vm7901_vm7 = vcmp.ge.f32.partialorder %v12646_v14, %v7900_v55 }
0x1448   :  { %v7902_v40 = vsel %vm7901_vm7, %v7896_v45, 16.0 }
0x1449   :  { %v7903_v22 = vsel %vm7897_vm6, %v7902_v40, inf }
0x144a   :  { %7904 = vmin.xlane.f32.xlu1 %v7903_v22 }
0x14c6   :  { %v10150_v47 = vpop.f32.mrf.mxu1 }
0x14c8   :  { %v7107_v57 = vpop.f32.mrf.mxu1 }
0x14c9   :  { %10198 = vmatprep.mubr.msk.f32.mxu1 %vm674_vm4, %v7107_v57 }
0x14ca   :  { %v10164_v49 = vpop.f32.mrf.mxu0  ;;  %10199 = vmatmul.mubr.msk.f32.vlgmr.msra.gmra.mxu1 %vm674_vm4, %v10150_v47 }
0x14cb   :  { %10213 = vmatpush3.msk.msra.mxu1 %vm1775_vm5, %v8954_v1 }
0x14cc   :  { %v7216_v9 = vpop.f32.mrf.mxu0  ;;  %10228 = vmatprep.subr.mxu1 %v10647_v0 }
0x14cd   :  { %10206 = vmatprep.mubr.msk.f32.mxu0 %vm674_vm4, %v7216_v9 }
0x14ce   :  { %10207 = vmatmul.mubr.msk.f32.vlgmr.msra.gmra.mxu0 %vm674_vm4, %v10164_v49 }
0x14cf   :  { %v10153_v51 = vpop.f32.mrf.mxu1  ;;  %10221 = vmatpush3.msk.msra.mxu0 %vm1775_vm5, %v8955_v25 }
0x14d0   :  { %10239 = vmatprep.subr.mxu0 %v10647_v0 }
0x14d1   :  { %v7117_v10 = vpop.f32.mrf.mxu1 }
0x14d2   :  { %10201 = vmatprep.mubr.msk.f32.mxu1 %vm674_vm4, %v7117_v10 }
0x14d3   :  { %v10167_v39 = vpop.f32.mrf.mxu0  ;;  %10202 = vmatmul.mubr.msk.f32.gmra.mxu1 %vm674_vm4, %v10153_v51 }
0x14d5   :  { %v7226_v44 = vpop.f32.mrf.mxu0 }
0x14d6   :  { %10209 = vmatprep.mubr.msk.f32.mxu0 %vm674_vm4, %v7226_v44 }
0x14d7   :  { %10210 = vmatmul.mubr.msk.f32.gmra.mxu0 %vm674_vm4, %v10167_v39 }
0x14d8   :  { %v10178_v4 = vpop.f32.mrf.mxu1 }
0x14da   :  { %v7325_v34 = vpop.f32.mrf.mxu1 }
0x14db   :  { %10214 = vmatprep.mubr.msk.f32.mxu1 %vm674_vm4, %v7325_v34 }
0x14dc   :  { %v10192_v8 = vpop.f32.mrf.mxu0  ;;  %10215 = vmatmul.mubr.msk.f32.vlgmr.msra.gmra.mxu1 %vm674_vm4, %v10178_v4 }
0x14de   :  { %v7434_v12 = vpop.f32.mrf.mxu0 }
0x14df   :  { %10222 = vmatprep.mubr.msk.f32.mxu0 %vm674_vm4, %v7434_v12 }
0x14e0   :  { %v10181_v61 = vpop.f32.mrf.mxu1  ;;  %10223 = vmatmul.mubr.msk.f32.vlgmr.msra.gmra.mxu0 %vm674_vm4, %v10192_v8  ;;  %v7908_v8 = vmul.u32 16, %v10791_v11 }
0x14e1   :  { %10240 = vmatpush3.msra.mxu0 %v7988_v19 }
0x14e2   :  { %v7335_v60 = vpop.f32.mrf.mxu1  ;;  %10241 = vmatprep.subr.mxu0 %v10647_v0  ;;  %v7909_v12 = vsub.s32 %v12707_v38, %v7908_v8  ;;  %v8076_v38 = vld [vmem:[%s12926_s9 + $0x18] sm:$0xff] }
0x14e3   :  { %10217 = vmatprep.mubr.msk.f32.mxu1 %vm674_vm4, %v7335_v60  ;;  %10242 = vmatpush3.msra.mxu0 %v7987_v16  ;;  %v7905_v60 = vpop.xlane.xlu1 %7904 }
0x14e4   :  { %v10195_v37 = vpop.f32.mrf.mxu0  ;;  %10218 = vmatmul.mubr.msk.f32.gmra.mxu1 %vm674_vm4, %v10181_v61  ;;  %10259 = vmatprep.subr.mxu0 %v10647_v0  ;;  %v7910_v61 = vcvt.s32.f32 %v7909_v12 }
0x14e5   :  { %10236 = vmatprep.mubr.msk.f32.mxu1 %vm10648_vm0, %v10647_v0 }
0x14e6   :  { %v7444_v59 = vpop.f32.mrf.mxu0  ;;  %vm7911_vm8 = vcmp.eq.f32.partialorder %v7910_v61, %v7905_v60 }
0x14e7   :  { %10225 = vmatprep.mubr.msk.f32.mxu0 %vm674_vm4, %v7444_v59  ;;  %v8075_v59 = vld [vmem:[%s12926_s9 + $0x10] sm:$0xff] }
0x14e8   :  { %10226 = vmatmul.mubr.msk.f32.gmra.mxu0 %vm674_vm4, %v10195_v37 }
0x14e9   :  { %10243 = vmatprep.mubr.msk.f32.mxu0 %vm10648_vm0, %v10647_v0 }
0x158a   :  { %v10200_v54 = vpop.f32.mrf.mxu1 }
0x158b   :  { %v7865_v53 = vsel %vm309_vm3, %v10200_v54, 0.0  ;;  %v8074_v54 = vld [vmem:[%s12926_s9 + $0x8] sm:$0xff] }
0x158c   :  { %v7539_v7 = vpop.f32.mrf.mxu1 }
0x158d   :  { %v7858_v48 = vsel %vm309_vm3, %v7539_v7, 0.0  ;;  %v8073_v7 = vld [vmem:[%s12926_s9] sm:$0xff] }
0x158e   :  { %v10208_v2 = vpop.f32.mrf.mxu0 }
0x158f   :  { %v7866_v42 = vsel %vm309_vm3, %v10208_v2, 0.0  ;;  %v8978_v2 = vld [vmem:[%s12927_s8] ss:$0 sm:$0xff] }
0x1590   :  { %v7639_v13 = vpop.f32.mrf.mxu0  ;;  %v7867_v63 = vadd.f32 %v7866_v42, %v7865_v53  ;;  %v8161_v42 = vld [vmem:[%s12928_s11 + $0x8] sm:$0xff]  ;;  %v8331_v53 = vld [vmem:[%s12929_s15 + $0x10] sm:$0xff] }
0x1591   :  { %v7859_v52 = vsel %vm309_vm3, %v7639_v13, 0.0  ;;  %v8070_v13 = vpop.permute.xlu0 %8069 }
0x1592   :  { %v7860_v32 = vadd.f32 %v7859_v52, %v7858_v48  ;;  %v8330_v52 = vld [vmem:[%s12929_s15 + $0x8] sm:$0xff] }
0x1593   :  { %v10203_v58 = vpop.f32.mrf.mxu1 }
0x1594   :  { %v7879_v62 = vsel %vm309_vm3, %v10203_v58, 0.0 }
0x1595   :  { %v7549_v36 = vpop.f32.mrf.mxu1 }
0x1596   :  { %v7872_v18 = vsel %vm309_vm3, %v7549_v36, 0.0 }
0x1597   :  { %v10211_v56 = vpop.f32.mrf.mxu0 }
0x1598   :  { %v7880_v20 = vsel %vm309_vm3, %v10211_v56, 0.0 }
0x1599   :  { %v7649_v3 = vpop.f32.mrf.mxu0  ;;  %v7881_v5 = vadd.f32 %v7880_v20, %v7879_v62  ;;  %v8160_v20 = vld [vmem:[%s12928_s11] sm:$0xff] }
0x159a   :  { %v7873_v24 = vsel %vm309_vm3, %v7649_v3, 0.0  ;;  %v8163_v3 = vld [vmem:[%s12928_s11 + $0x18] sm:$0xff]  ;;  %v8980_v62 = vld [vmem:[%s12930_s10] ss:$0 sm:$0xff] }
0x159b   :  { %v7874_v50 = vadd.f32 %v7873_v24, %v7872_v18  ;;  %v8245_v18 = vld [vmem:[%s12931_s13] sm:$0xff] }
0x159c   :  { %v10216_v30 = vpop.f32.mrf.mxu1 }
0x159d   :  { %v7868_v29 = vsel %vm309_vm3, %v10216_v30, 0.0 }
0x159e   :  { %v7739_v41 = vpop.f32.mrf.mxu1  ;;  %v7869_v31 = vadd.f32 %v7868_v29, %v7867_v63  ;;  %v8247_v63 = vld [vmem:[%s12931_s13 + $0x10] sm:$0xff] }
0x159f   :  { %v7861_v33 = vsel %vm309_vm3, %v7739_v41, 0.0  ;;  %v8162_v41 = vld [vmem:[%s12928_s11 + $0x10] sm:$0xff] }
0x15a0   :  { %v10224_v28 = vpop.f32.mrf.mxu0  ;;  %v7862_v40 = vadd.f32 %v7861_v33, %v7860_v32  ;;  %v8982_v33 = vld [vmem:[%s12932_s12] ss:$0 sm:$0xff] }
0x15a1   :  { %v7870_v27 = vsel %vm309_vm3, %v10224_v28, 0.0  ;;  %v8332_v28 = vld [vmem:[%s12929_s15 + $0x18] sm:$0xff] }
0x15a2   :  { %v7839_v15 = vpop.f32.mrf.mxu0  ;;  %v7871_v22 = vadd.f32 %v7870_v27, %v7869_v31 }
0x15a3   :  { %v7863_v55 = vsel %vm309_vm3, %v7839_v15, 0.0  ;;  %v8246_v15 = vld [vmem:[%s12931_s13 + $0x8] sm:$0xff] }
0x15a4   :  { %v10219_v26 = vpop.f32.mrf.mxu1  ;;  %v7864_v51 = vadd.f32 %v7863_v55, %v7862_v40  ;;  %v7887_v44 = vadd.f32 %v12281_v43, %v7871_v22  ;;  %v8413_v55 = vld [vmem:[%s12934_s17 + $0x10] sm:$0xff]  ;;  %v8411_v40 = vld [vmem:[%s12934_s17] sm:$0xff] }
0x15a5   :  { %v7882_v46 = vsel %vm309_vm3, %v10219_v26, 0.0  ;;  %v8329_v26 = vld [vmem:[%s12929_s15] sm:$0xff] }
0x15a6   :  { %v7749_v23 = vpop.f32.mrf.mxu1  ;;  %v7883_v1 = vadd.f32 %v7882_v46, %v7881_v5  ;;  %v7886_v34 = vadd.f32 %v12279_v35, %v7864_v51  ;;  %v8976_v35 = vsel %vm7911_vm8, 1.0, %v10647_v0  ;;  %v26_v51 = vstv %s12936_s20 }
0x15a7   :  { %v7875_v17 = vsel %vm309_vm3, %v7749_v23, 0.0  ;;  %27 = vst [vmem:[#allocation2] sm:$0x1] %v26_v51 }
0x15a8   :  { %v10227_v25 = vpop.f32.mrf.mxu0  ;;  %v7876_v47 = vadd.f32 %v7875_v17, %v7874_v50  ;;  %v8986_v50 = vld [vmem:[%s12933_s16] ss:$0 sm:$0xff] }
0x15a9   :  { %v7884_v45 = vsel %vm309_vm3, %v10227_v25, 0.0 }
0x15aa   :  { %v7885_v57 = vadd.f32 %v7884_v45, %v7883_v1  ;;  %v7849_v49 = vpop.f32.mrf.mxu0  ;;  %v8414_v1 = vld [vmem:[%s12934_s17 + $0x18] sm:$0xff]  ;;  %v8412_v45 = vld [vmem:[%s12934_s17 + $0x8] sm:$0xff] }
0x15ab   :  { %v7877_v9 = vsel %vm309_vm3, %v7849_v49, 0.0  ;;  %v8497_v49 = vld [vmem:[%s12935_s19 + $0x8] sm:$0xff] }
0x15ac   :  { %v7889_v10 = vadd.f32 %v12301_v6, %v7885_v57  ;;  %v7878_v39 = vadd.f32 %v7877_v9, %v7876_v47  ;;  %v8499_v47 = vld [vmem:[%s12935_s19 + $0x18] sm:$0xff]  ;;  %v8498_v57 = vld [vmem:[%s12935_s19 + $0x10] sm:$0xff]  ;;  %v8496_v9 = vld [vmem:[%s12935_s19] sm:$0xff] }
0x15ae   :  { %10618 = vtanh.f32 %v7889_v10  ;;  %v7888_v4 = vadd.f32 %v12299_v21, %v7878_v39  ;;  %v8077_v21 = vld [vmem:[%s12926_s9 + $0x20] sm:$0xff] }
0x15af   :  { %v8984_v10 = vld [vmem:[%s12937_s14] ss:$0 sm:$0xff]  ;;  %s10654_s14 = smov 40  }
0x15b0   :  { %10620 = vtanh.f32 %v7888_v4  ;;  %v8990_v60 = vld [vmem:[#allocation2] ss:$0 sm:$0xff] }
0x15b1   :  { %10622 = vtanh.f32 %v7887_v44 }
0x15b2   :  { %10624 = vtanh.f32 %v7886_v34  ;;  %v8988_v34 = vld [vmem:[%s12938_s18] ss:$0 sm:$0xff] }
0x15bb   :  { %v10619_v37 = vpop.eup %10618 }
0x15bc   :  { %10229 = vmatpush3.msra.mxu1 %v10619_v37 }
0x15bd   :  { %v10621_v6 = vpop.eup %10620  ;;  %10230 = vmatprep.subr.mxu1 %v10647_v0 }
0x15be   :  { %10231 = vmatpush3.msra.mxu1 %v10621_v6  ;;  %v10623_v43 = vpop.eup %10622 }
0x15bf   :  { %10232 = vmatprep.subr.mxu1 %v10647_v0  ;;  %v10625_v11 = vpop.eup %10624 }
0x15c0   :  { %10233 = vmatpush3.msra.mxu1 %v10623_v43 }
0x15c1   :  { %10234 = vmatprep.subr.mxu1 %v10647_v0 }
0x15c2   :  { %10235 = vmatpush3.msra.mxu1 %v10625_v11 }
0x15c3   :  { %10237 = vmatmul.mubr.msk.f32.vlgmr.msra.gmra.mxu1 %vm75_vm1, %v8976_v35  ;;  %10246 = vmatprep.subr.mxu1 %v10647_v0 }
0x15c4   :  { %10256 = vmatprep.mubr.msk.f32.mxu1 %vm10648_vm0, %v10647_v0  ;;  %10247 = vmatpush3.msra.mxu1 %v8077_v21 }
0x15c5   :  { %10248 = vmatprep.subr.mxu1 %v10647_v0 }
0x15c6   :  { %10249 = vmatpush3.msra.mxu1 %v8076_v38 }
0x15c7   :  { %10250 = vmatprep.subr.mxu1 %v10647_v0 }
0x15c8   :  { %10251 = vmatpush3.msra.mxu1 %v8075_v59 }
0x15c9   :  { %10252 = vmatprep.subr.mxu1 %v10647_v0 }
0x15ca   :  { %10253 = vmatpush3.msra.mxu1 %v8074_v54 }
0x15cb   :  { %10254 = vmatprep.subr.mxu1 %v10647_v0 }
0x15cc   :  { %10255 = vmatpush3.msra.mxu1 %v8073_v7 }
0x15cd   :  { %10281 = vmatprep.subr.mxu1 %v10647_v0 }
0x1683   :  { %v7983_v19 = vpop.f32.mrf.mxu1 }
0x1684   :  { %10244 = vmatmul.mubr.msk.f32.vlgmr.msra.gmra.mxu0 %vm309_vm3, %v7983_v19 }
0x1685   :  { %v10238_v16 = vpop.f32.mrf.mxu1  ;;  %10267 = vmatprep.mubr.msk.f32.mxu0 %vm10648_vm0, %v10647_v0  ;;  %10260 = vmatpush3.msra.mxu0 %v8163_v3 }
0x1686   :  { %10261 = vmatprep.subr.mxu0 %v10647_v0 }
0x1687   :  { %10262 = vmatpush3.msra.mxu0 %v8162_v41 }
0x1688   :  { %10263 = vmatprep.subr.mxu0 %v10647_v0 }
0x1689   :  { %10264 = vmatpush3.msra.mxu0 %v8161_v42 }
0x168a   :  { %10265 = vmatprep.subr.mxu0 %v10647_v0 }
0x168b   :  { %10266 = vmatpush3.msra.mxu0 %v8160_v20 }
0x168c   :  { %10270 = vmatprep.subr.mxu0 %v10647_v0 }
0x1744   :  { %v8065_v58 = vpop.f32.mrf.mxu0 }
0x1745   :  { %v8066_v36 = vadd.f32 %v8978_v2, %v8065_v58 }
0x1746   :  { %v10245_v56 = vpop.f32.mrf.mxu0 }
0x1747   :  { %v8072_v30 = vsel %vm195_vm2, %v8066_v36, %v8070_v13 }
0x1748   :  { %10257 = vmatmul.mubr.msk.f32.vlgmr.msra.gmra.mxu1 %vm8085_vm9, %v8072_v30 }
0x1749   :  { %10289 = vmatprep.mubr.msk.f32.mxu1 %vm10648_vm0, %v10647_v0  ;;  %10282 = vmatpush3.msra.mxu1 %v8332_v28 }
0x174a   :  { %10283 = vmatprep.subr.mxu1 %v10647_v0 }
0x174b   :  { %10284 = vmatpush3.msra.mxu1 %v8331_v53 }
0x174c   :  { %10285 = vmatprep.subr.mxu1 %v10647_v0 }
0x174d   :  { %10286 = vmatpush3.msra.mxu1 %v8330_v52 }
0x174e   :  { %10287 = vmatprep.subr.mxu1 %v10647_v0 }
0x174f   :  { %10288 = vmatpush3.msra.mxu1 %v8329_v26 }
0x1750   :  { %10290 = vmatmul.mubr.msk.f32.vlgmr.msra.gmra.mxu1 %vm75_vm1, %v12646_v14  ;;  %10303 = vmatprep.subr.mxu1 %v10647_v0  ;;  %v8248_v14 = vld [vmem:[%s12931_s13 + $0x18] sm:$0xff] }
0x1751   :  { %10311 = vmatprep.mubr.msk.f32.mxu1 %vm10648_vm0, %v10647_v0  ;;  %10304 = vmatpush3.msra.mxu1 %v8499_v47 }
0x1752   :  { %10305 = vmatprep.subr.mxu1 %v10647_v0 }
0x1753   :  { %10306 = vmatpush3.msra.mxu1 %v8498_v57 }
0x1754   :  { %10307 = vmatprep.subr.mxu1 %v10647_v0 }
0x1755   :  { %10308 = vmatpush3.msra.mxu1 %v8497_v49 }
0x1756   :  { %10309 = vmatprep.subr.mxu1 %v10647_v0 }
0x1757   :  { %10310 = vmatpush3.msra.mxu1 %v8496_v9 }
0x1808   :  { %v8155_v24 = vpop.f32.mrf.mxu1 }
0x1809   :  { %v8156_v29 = vadd.f32 %v8980_v62, %v8155_v24 }
0x180a   :  { %v10258_v46 = vpop.f32.mrf.mxu1 }
0x180b   :  { %10626 = vtanh.f32 %v8156_v29 }
0x1810   :  { %v8406_v5 = vpop.f32.mrf.mxu1 }
0x1811   :  { %v8407_v31 = vadd.f32 %v8986_v50, %v8406_v5 }
0x1812   :  { %v10291_v23 = vpop.f32.mrf.mxu1 }
0x1818   :  { %v10627_v48 = vpop.eup %10626 }
0x1819   :  { %10268 = vmatmul.mubr.msk.f32.vlgmr.msra.gmra.mxu0 %vm75_vm1, %v10627_v48 }
0x181a   :  { %10278 = vmatprep.mubr.msk.f32.mxu0 %vm10648_vm0, %v10647_v0  ;;  %10271 = vmatpush3.msra.mxu0 %v8248_v14 }
0x181b   :  { %10272 = vmatprep.subr.mxu0 %v10647_v0 }
0x181c   :  { %10273 = vmatpush3.msra.mxu0 %v8247_v63 }
0x181d   :  { %10274 = vmatprep.subr.mxu0 %v10647_v0 }
0x181e   :  { %10275 = vmatpush3.msra.mxu0 %v8246_v15 }
0x181f   :  { %10276 = vmatprep.subr.mxu0 %v10647_v0 }
0x1820   :  { %10277 = vmatpush3.msra.mxu0 %v8245_v18 }
0x1821   :  { %10292 = vmatprep.subr.mxu0 %v10647_v0 }
0x18d9   :  { %v8240_v27 = vpop.f32.mrf.mxu0 }
0x18da   :  { %v8241_v17 = vadd.f32 %v8982_v33, %v8240_v27 }
0x18db   :  { %v10269_v32 = vpop.f32.mrf.mxu0 }
0x18dc   :  { %10628 = vtanh.f32 %v8241_v17 }
0x18dd   :  { %10630 = vtanh.f32 %v8407_v31 }
0x18e9   :  { %v10629_v25 = vpop.eup %10628 }
0x18ea   :  { %10279 = vmatmul.mubr.msk.f32.vlgmr.msra.gmra.mxu0 %vm75_vm1, %v10629_v25  ;;  %v10631_v22 = vpop.eup %10630 }
0x18eb   :  { %10293 = vmatpush3.msra.mxu0 %v8414_v1  ;;  %10300 = vmatprep.mubr.msk.f32.mxu0 %vm10648_vm0, %v10647_v0 }
0x18ec   :  { %10294 = vmatprep.subr.mxu0 %v10647_v0 }
0x18ed   :  { %10295 = vmatpush3.msra.mxu0 %v8413_v55 }
0x18ee   :  { %10296 = vmatprep.subr.mxu0 %v10647_v0 }
0x18ef   :  { %10297 = vmatpush3.msra.mxu0 %v8412_v45 }
0x18f0   :  { %10298 = vmatprep.subr.mxu0 %v10647_v0 }
0x18f1   :  { %10299 = vmatpush3.msra.mxu0 %v8411_v40 }
0x18f2   :  { %10301 = vmatmul.mubr.msk.f32.vlgmr.msra.gmra.mxu0 %vm75_vm1, %v10631_v22 }
0x19aa   :  { %v8325_v39 = vpop.f32.mrf.mxu0 }
0x19ab   :  { %v8326_v44 = vadd.f32 %v8984_v10, %v8325_v39 }
0x19ac   :  { %v10280_v4 = vpop.f32.mrf.mxu0 }
0x19ad   :  { %8581 = vrot.lane.b32.xlu1 %v8326_v44, %s10653_s30 }
0x19b2   :  { %v8491_v0 = vpop.f32.mrf.mxu0 }
0x19b3   :  { %v8492_v8 = vadd.f32 %v8988_v34, %v8491_v0 }
0x19b4   :  { %v10302_v12 = vpop.f32.mrf.mxu0 }
0x19b5   :  { %10632 = vtanh.f32 %v8492_v8 }
0x19c2   :  { %v10633_v61 = vpop.eup %10632 }
0x19c3   :  { %10312 = vmatmul.mubr.msk.f32.vlgmr.msra.gmra.mxu1 %vm75_vm1, %v10633_v61 }
0x1a1f   :  { %v8582_v35 = vpop.permute.xlu1 %8581 }
0x1a20   :  { %v8588_v11 = vsel %vm75_vm1, %v10629_v25, %v8582_v35 }
0x1a83   :  { %v8576_v37 = vpop.f32.mrf.mxu1 }
0x1a84   :  { %v8577_v6 = vadd.f32 %v8990_v60, %v8576_v37 }
0x1a85   :  { %v10313_v43 = vpop.f32.mrf.mxu1 }
0x1a86   :  { %8585 = vrot.lane.b32.xlu0 %v8577_v6, %s10654_s14 }
0x1af8   :  { %v8586_v21 = vpop.permute.xlu0 %8585 }
0x1af9   :  { %v8589_v38 = vsel %vm8085_vm9, %v8588_v11, %v8586_v21 }
0x1afa   :  { %v8591_v59 = vsel %vm8590_vm10, %v8589_v38, 0.0 }
0x1afb   :  { %v8593_v19 = vsel %vm8592_vm11, %v8591_v59, 0.0 }
0x1afc   :  { %8594 = vst [vmem:[%s12939_s21] sm:$0xff] %v8593_v19 }

</bundles_post_ra>
